<compile_context>
chip_gen: v5e
topology: v5e:2x2
jax: 0.10.0
libtpu: 0.0.40
codegen_flags: <defaults>
</compile_context>

<pallas_src>
import jax
import jax.numpy as jnp
from jax import lax
from jax.experimental import pallas as pl
from jax.experimental.pallas import tpu as pltpu

EPS = 1e-3  # matches BatchNorm2d(eps=0.001)


def _bn_kernel(x_ref, gamma_ref, beta_ref, o_ref):
    # x_ref: (tile_c, M) with M = N*H*W fully inside the block -> exact stats.
    # gamma_ref / beta_ref: full (C, 1), resident across the whole grid.
    tile_c = x_ref.shape[0]
    c0 = pl.multiple_of(pl.program_id(0) * tile_c, tile_c)

    x = x_ref[...].astype(jnp.float32)
    inv_m = 1.0 / float(x.shape[1])

    # Two-pass, numerically-safe statistics (the tile is VMEM-resident, so the
    # second traversal is essentially free).
    mean = jnp.sum(x, axis=1, keepdims=True) * inv_m          # (tile_c, 1)
    d = x - mean
    var = jnp.sum(d * d, axis=1, keepdims=True) * inv_m       # biased variance
    inv_std = lax.rsqrt(var + EPS)

    gamma = gamma_ref[pl.ds(c0, tile_c), :]                   # (tile_c, 1)
    beta = beta_ref[pl.ds(c0, tile_c), :]                     # (tile_c, 1)
    o_ref[...] = (d * (gamma * inv_std) + beta).astype(o_ref.dtype)


def _pick_tile_c(c, m, itemsize):
    """Channel tile size.

    Preference order: EVEN grid-step counts first (balanced split across a
    2-TensorCore chip such as v7x), fewest steps first within each parity
    (per-step overhead ~0.35 us dominates this tiny HBM-bound kernel), subject
    to the double-buffered in+out tile footprint fitting a conservative VMEM
    budget (safe for v7x's 64 MiB total / 32 MiB scoped as well as v5e/v6e).
    """
    vmem_budget = 12 * 1024 * 1024
    m_pad = -(-m // 128) * 128            # lane padding to 128
    io_bytes = max(itemsize, 4)           # f32 compute copy

    def ok(n_tiles):
        if c % n_tiles:
            return False
        tc = c // n_tiles
        if tc != c and tc % 8:            # sublane alignment when tiled
            return False
        tile_bytes = tc * m_pad * io_bytes
        return 2 * 2 * tile_bytes <= vmem_budget   # (in + out) x double-buffer

    for n_tiles in list(range(2, 65, 2)) + list(range(1, 65, 2)):
        if ok(n_tiles):
            return c // n_tiles
    return c


@jax.jit
def batchnorm2d_pallas(x_nchw, gamma, beta):
    """Training-mode BatchNorm2d forward. x_nchw: (N, C, H, W); gamma/beta: (C,)."""
    n, c, h, w = x_nchw.shape
    m = n * h * w

    # NCHW -> (C, N*H*W).  For N == 1 this only moves a size-1 axis (bitcast).
    x2d = jnp.transpose(x_nchw, (1, 0, 2, 3)).reshape(c, m)
    g2d = gamma.reshape(c, 1).astype(jnp.float32)
    b2d = beta.reshape(c, 1).astype(jnp.float32)

    tile_c = _pick_tile_c(c, m, x2d.dtype.itemsize)
    grid = (c // tile_c,)

    cost = pl.CostEstimate(
        flops=7 * c * m,
        transcendentals=c,
        bytes_accessed=2 * c * m * x2d.dtype.itemsize + 2 * c * 4,
    )

    out2d = pl.pallas_call(
        _bn_kernel,
        out_shape=jax.ShapeDtypeStruct((c, m), x2d.dtype),
        grid=grid,
        in_specs=[
            pl.BlockSpec((tile_c, m), lambda j: (j, 0)),
            # gamma/beta: full block + constant index map -> DMA'd once and
            # kept VMEM-resident across all grid steps.
            pl.BlockSpec((c, 1), lambda j: (0, 0)),
            pl.BlockSpec((c, 1), lambda j: (0, 0)),
        ],
        out_specs=pl.BlockSpec((tile_c, m), lambda j: (j, 0)),
        compiler_params=pltpu.CompilerParams(
            dimension_semantics=("parallel",),   # megacore split on 2-TC chips
        ),
        cost_estimate=cost,
    )(x2d, g2d, b2d)

    # (C, N*H*W) -> NCHW (again a bitcast for N == 1).
    return jnp.transpose(out2d.reshape(c, n, h, w), (1, 0, 2, 3))


def reference_bn(x_nchw, gamma, beta):
    # Pure-JAX reference (training-mode batch norm, biased variance).
    mean = jnp.mean(x_nchw, axis=(0, 2, 3), keepdims=True)
    var = jnp.mean((x_nchw - mean) ** 2, axis=(0, 2, 3), keepdims=True)
    g = gamma.reshape(1, -1, 1, 1)
    b = beta.reshape(1, -1, 1, 1)
    return (x_nchw - mean) * lax.rsqrt(var + EPS) * g + b


if __name__ == "__main__":
    key = jax.random.PRNGKey(0)
    N, C, H, W = 1, 1200, 14, 14  # shape implied by the module's forward
    x = jax.random.normal(key, (N, C, H, W), dtype=jnp.float32)

    # PyTorch BatchNorm2d default init: weight = 1, bias = 0 (affine=True)
    gamma = jnp.ones((C,), dtype=jnp.float32)
    beta = jnp.zeros((C,), dtype=jnp.float32)

    out = jax.block_until_ready(batchnorm2d_pallas(x, gamma, beta))
    ref = reference_bn(x, gamma, beta)

    assert out.shape == (N, C, H, W)
    assert jnp.allclose(out, ref, atol=1e-4, rtol=1e-4), "mismatch vs reference"

    print("KERNEL_OK")
</pallas_src>

<mosaic_0001>
module attributes {stable_mosaic.version = 11 : i64} {
  func.func @_bn_kernel(%arg0: i32, %arg1: memref<600x196xf32, #tpu.memory_space<vmem>>, %arg2: memref<1200x1xf32, #tpu.memory_space<vmem>>, %arg3: memref<1200x1xf32, #tpu.memory_space<vmem>>, %arg4: memref<600x196xf32, #tpu.memory_space<vmem>>) attributes {dimension_semantics = [#tpu.dimension_semantics<parallel>], iteration_bounds = array<i64: 2>, scalar_prefetch = 0 : i64, scratch_operands = 0 : i64, tpu.core_type = #tpu.core_type<tc>, window_params = [{transform_indices = @transform_0, window_bounds = array<i64: 600, 196>}, {pipeline_mode = #tpu.pipeline_mode<synchronous>, transform_indices = @transform_1, window_bounds = array<i64: 1200, 1>}, {pipeline_mode = #tpu.pipeline_mode<synchronous>, transform_indices = @transform_2, window_bounds = array<i64: 1200, 1>}, {transform_indices = @transform_3, window_bounds = array<i64: 600, 196>}]} {
    %c600_i32 = arith.constant 600 : i32
    %0 = arith.muli %arg0, %c600_i32 : i32
    %1 = tpu.assume_multiple %0, 600 : i32
    %c0 = arith.constant 0 : index
    %c0_0 = arith.constant 0 : index
    %2 = vector.load %arg1[%c0, %c0_0] : memref<600x196xf32, #tpu.memory_space<vmem>>, vector<600x196xf32>
    %cst = arith.constant dense<0.000000e+00> : vector<600xf32>
    %3 = vector.multi_reduction <add>, %2, %cst [1] : vector<600x196xf32> to vector<600xf32>
    %4 = vector.shape_cast %3 : vector<600xf32> to vector<600x1xf32>
    %cst_1 = arith.constant 0.00510204071 : f32
    %5 = vector.broadcast %cst_1 : f32 to vector<600x1xf32>
    %6 = arith.mulf %4, %5 : vector<600x1xf32>
    %7 = vector.broadcast %6 : vector<600x1xf32> to vector<600x196xf32>
    %8 = arith.subf %2, %7 : vector<600x196xf32>
    %9 = arith.mulf %8, %8 : vector<600x196xf32>
    %cst_2 = arith.constant dense<0.000000e+00> : vector<600xf32>
    %10 = vector.multi_reduction <add>, %9, %cst_2 [1] : vector<600x196xf32> to vector<600xf32>
    %11 = vector.shape_cast %10 : vector<600xf32> to vector<600x1xf32>
    %cst_3 = arith.constant 0.00510204071 : f32
    %12 = vector.broadcast %cst_3 : f32 to vector<600x1xf32>
    %13 = arith.mulf %11, %12 : vector<600x1xf32>
    %cst_4 = arith.constant 1.000000e-03 : f32
    %14 = vector.broadcast %cst_4 : f32 to vector<600x1xf32>
    %15 = arith.addf %13, %14 : vector<600x1xf32>
    %16 = math.rsqrt %15 : vector<600x1xf32>
    %17 = arith.index_cast %1 : i32 to index
    %c0_5 = arith.constant 0 : index
    %18 = vector.load %arg2[%17, %c0_5] : memref<1200x1xf32, #tpu.memory_space<vmem>>, vector<600x1xf32>
    %19 = arith.index_cast %1 : i32 to index
    %c0_6 = arith.constant 0 : index
    %20 = vector.load %arg3[%19, %c0_6] : memref<1200x1xf32, #tpu.memory_space<vmem>>, vector<600x1xf32>
    %21 = arith.mulf %18, %16 : vector<600x1xf32>
    %22 = vector.broadcast %21 : vector<600x1xf32> to vector<600x196xf32>
    %23 = arith.mulf %8, %22 : vector<600x196xf32>
    %24 = vector.broadcast %20 : vector<600x1xf32> to vector<600x196xf32>
    %25 = arith.addf %23, %24 : vector<600x196xf32>
    %c0_7 = arith.constant 0 : index
    %c0_8 = arith.constant 0 : index
    %26 = vector.load %arg4[%c0_7, %c0_8] : memref<600x196xf32, #tpu.memory_space<vmem>>, vector<600x196xf32>
    tpu.vector_store %arg4[%c0_7, %c0_8], %25 {strides = array<i32>} : memref<600x196xf32, #tpu.memory_space<vmem>>, vector<600x196xf32>,
    return
  }
  func.func @transform_0(%arg0: i32) -> (i32, i32) {
    %c0_i32 = arith.constant 0 : i32
    %c0_i32_0 = arith.constant 0 : i32
    return %arg0, %c0_i32 : i32, i32
  }
  func.func @transform_1(%arg0: i32) -> (i32, i32) {
    %c0_i32 = arith.constant 0 : i32
    %c0_i32_0 = arith.constant 0 : i32
    %c0_i32_1 = arith.constant 0 : i32
    return %c0_i32, %c0_i32_0 : i32, i32
  }
  func.func @transform_2(%arg0: i32) -> (i32, i32) {
    %c0_i32 = arith.constant 0 : i32
    %c0_i32_0 = arith.constant 0 : i32
    %c0_i32_1 = arith.constant 0 : i32
    return %c0_i32, %c0_i32_0 : i32, i32
  }
  func.func @transform_3(%arg0: i32) -> (i32, i32) {
    %c0_i32 = arith.constant 0 : i32
    %c0_i32_0 = arith.constant 0 : i32
    return %arg0, %c0_i32 : i32, i32
  }
}

</mosaic_0001>

<bundles_post_ra>
// kernel: batchnorm2d_pallas.1
= control target key start
LH: loop header
LB: loop body
LE: loop exit
PB: predicated region body
PF: predicated region fallthrough
CT: control target
= control target key end

     0   :  { %s3991_s12 = smov 0   ;;  %s8103_s0 = inlined_call_operand.vmem [shape: f32[1200,196], index: 0, kind: input, shape index: {}]   ;;  %s8104_s1 = inlined_call_operand.vmem [shape: f32[1200,1], index: 1, kind: input, shape index: {}]   ;;  %s8105_s2 = inlined_call_operand.vmem [shape: f32[1200,1], index: 2, kind: input, shape index: {}]   ;;  %s8106_s3 = inlined_call_operand.vmem [shape: f32[1200,196], index: 3, kind: output, shape index: {}]  }
   0x1 LB: > { %s3695_s13 = sadd.s32 4294967295, %s3968_s12   ;;  %p3699_p0 = scmp.ge.s32.totalorder %s3968_s12, 1  ;;  %s3968_s12 = sphi %s3991_s12, %s13_s12  }
   0x2   : > { %p139_p1 = scmp.lt.s32.totalorder %s3968_s12, 3 }
   0x4   : > { %p140_p2 = pnand %p3699_p0, %p139_p1 }
   0x6   : > { %143 = sbr.rel (%p140_p2) target bundleno = 959 (0x3bf), region = 32 }
   0xb   : > { %s165_s14 = smul.u32 75, %s3695_s13  ;;  %vm330_vm0 = vcmask 556032  }
   0xc   : > { %s5607_s19 = smul.u32 600, %s3695_s13 }
   0xd   : > { %p166_p3 = scmp.lt.s32.totalorder %s165_s14, 149 }
   0xe   : > { %s5636_s22 = scalar_lea.vmem %s8104_s1, %s5607_s19  ;;  %s7390_s25 = scalar_lea.vmem %s8105_s2, %s5607_s19 }
   0xf   : > { %s8892_s14 = smov (!%p166_p3, %s165_s14), 149 }
  0x10   : > { %s3706_s15 = sshll.u32 %s8892_s14, 4 }
  0x11   : > { %s4009_s18 = scalar_lea.vmem %s8103_s0, %s3706_s15  ;;  %s7538_s28 = scalar_lea.vmem %s8106_s3, %s3706_s15 }
  0x12   : > { %v4012_v0 = vld [vmem:[%s4009_s18 + $0x40] sm:$0xff]  ;;  %v4015_v1 = vld [vmem:[%s4009_s18 + $0x48] sm:$0xff]  ;;  %v4037_v10 = vld [vmem:[%s4009_s18 + $0x58] sm:$0xff] }
  0x13   : > { %v4018_v2 = vld [vmem:[%s4009_s18 + $0x20] sm:$0xff]  ;;  %v347_v3 = vsel %vm330_vm0, %v4015_v1, 0.0  ;;  %v4023_v4 = vld [vmem:[%s4009_s18 + $0x28] sm:$0xff]  ;;  %v4042_v13 = vld [vmem:[%s4009_s18 + $0x38] sm:$0xff]  ;;  %v351_v16 = vsel %vm330_vm0, %v4037_v10, 0.0 }
  0x14   : > { %v4026_v5 = vld [vmem:[%s4009_s18] sm:$0xff]  ;;  %v4029_v6 = vld [vmem:[%s4009_s18 + $0x8] sm:$0xff]  ;;  %v348_v7 = vadd.f32 %v347_v3, %v4012_v0  ;;  %v339_v8 = vsel %vm330_vm0, %v4023_v4, 0.0  ;;  %v4045_v14 = vld [vmem:[%s4009_s18 + $0x18] sm:$0xff]  ;;  %v343_v18 = vsel %vm330_vm0, %v4042_v13, 0.0 }
  0x15   : > { %v331_v9 = vsel %vm330_vm0, %v4029_v6, 0.0  ;;  %v340_v11 = vadd.f32 %v339_v8, %v4018_v2  ;;  %v4048_v15 = vld [vmem:[%s4009_s18 + $0x50] sm:$0xff]  ;;  %v335_v20 = vsel %vm330_vm0, %v4045_v14, 0.0  ;;  %v4066_v24 = vld [vmem:[%s4009_s18 + $0x88] sm:$0xff]  ;;  %v4069_v25 = vld [vmem:[%s4009_s18 + $0x78] sm:$0xff] }
  0x16   : > { %v332_v12 = vadd.f32 %v331_v9, %v4026_v5  ;;  %349 = vadd.xlane.f32.xlu2 %v348_v7  ;;  %v4053_v17 = vld [vmem:[%s4009_s18 + $0x30] sm:$0xff]  ;;  %v352_v21 = vadd.f32 %v351_v16, %v4048_v15  ;;  %v4072_v26 = vld [vmem:[%s4009_s18 + $0x68] sm:$0xff]  ;;  %v4075_v27 = vld [vmem:[%s4009_s18 + $0x80] sm:$0xff]  ;;  %v363_v28 = vsel %vm330_vm0, %v4066_v24, 0.0  ;;  %v359_v30 = vsel %vm330_vm0, %v4069_v25, 0.0 }
  0x17   : > { %341 = vadd.xlane.f32.xlu1 %v340_v11  ;;  %v4058_v19 = vld [vmem:[%s4009_s18 + $0x10] sm:$0xff]  ;;  %v344_v22 = vadd.f32 %v343_v18, %v4053_v17  ;;  %v4085_v31 = vld [vmem:[%s4009_s18 + $0x60] sm:$0xff]  ;;  %v355_v32 = vsel %vm330_vm0, %v4072_v26, 0.0  ;;  %v364_v33 = vadd.f32 %v363_v28, %v4075_v27  ;;  %v4093_v36 = vld [vmem:[%s4009_s18 + $0xb8] sm:$0xff] }
  0x18   : > { %333 = vadd.xlane.f32.xlu0 %v332_v12  ;;  %v336_v23 = vadd.f32 %v335_v20, %v4058_v19  ;;  %v4080_v29 = vld [vmem:[%s4009_s18 + $0x70] sm:$0xff]  ;;  %v356_v35 = vadd.f32 %v355_v32, %v4085_v31  ;;  %v4096_v37 = vld [vmem:[%s4009_s18 + $0xa8] sm:$0xff]  ;;  %v4099_v38 = vld [vmem:[%s4009_s18 + $0x98] sm:$0xff]  ;;  %v375_v40 = vsel %vm330_vm0, %v4093_v36, 0.0 }
  0x19   : > { %v360_v34 = vadd.f32 %v359_v30, %v4080_v29  ;;  %v4102_v39 = vld [vmem:[%s4009_s18 + $0xb0] sm:$0xff]  ;;  %v4107_v41 = vld [vmem:[%s4009_s18 + $0xa0] sm:$0xff]  ;;  %v371_v42 = vsel %vm330_vm0, %v4096_v37, 0.0  ;;  %v367_v44 = vsel %vm330_vm0, %v4099_v38, 0.0  ;;  %v4120_v48 = vld [vmem:[%s4009_s18 + $0xe8] sm:$0xff] }
  0x1a   : > { %v4112_v43 = vld [vmem:[%s4009_s18 + $0x90] sm:$0xff]  ;;  %v376_v45 = vadd.f32 %v375_v40, %v4102_v39  ;;  %v372_v46 = vadd.f32 %v371_v42, %v4107_v41  ;;  %v4123_v49 = vld [vmem:[%s4009_s18 + $0xd8] sm:$0xff]  ;;  %v4126_v50 = vld [vmem:[%s4009_s18 + $0xc8] sm:$0xff]  ;;  %v387_v52 = vsel %vm330_vm0, %v4120_v48, 0.0 }
  0x1b   : > { %v368_v47 = vadd.f32 %v367_v44, %v4112_v43  ;;  %v4129_v51 = vld [vmem:[%s4009_s18 + $0xe0] sm:$0xff]  ;;  %v4134_v53 = vld [vmem:[%s4009_s18 + $0xd0] sm:$0xff]  ;;  %v383_v54 = vsel %vm330_vm0, %v4123_v49, 0.0  ;;  %v379_v56 = vsel %vm330_vm0, %v4126_v50, 0.0  ;;  %v4147_v60 = vld [vmem:[%s4009_s18 + $0x118] sm:$0xff] }
  0x1c   : > { %v4139_v55 = vld [vmem:[%s4009_s18 + $0xc0] sm:$0xff]  ;;  %v388_v57 = vadd.f32 %v387_v52, %v4129_v51  ;;  %v384_v58 = vadd.f32 %v383_v54, %v4134_v53  ;;  %8309 = vst [vmem:[#allocation2_spill] sm:$0xff] %v4147_v60  ;;  %v4150_v61 = vld [vmem:[%s4009_s18 + $0x108] sm:$0xff]  ;;  %v4153_v62 = vld [vmem:[%s4009_s18 + $0xf8] sm:$0xff]  ;;  %v399_v3 = vsel %vm330_vm0, %v4147_v60, 0.0 }
  0x1d   : > { %v380_v59 = vadd.f32 %v379_v56, %v4139_v55  ;;  %8310 = vst [vmem:[#allocation3_spill] sm:$0xff] %v4150_v61  ;;  %v4156_v63 = vld [vmem:[%s4009_s18 + $0x110] sm:$0xff]  ;;  %v4161_v7 = vld [vmem:[%s4009_s18 + $0x100] sm:$0xff]  ;;  %v395_v8 = vsel %vm330_vm0, %v4150_v61, 0.0  ;;  %v391_v11 = vsel %vm330_vm0, %v4153_v62, 0.0  ;;  %v4174_v20 = vld [vmem:[%s4009_s18 + $0x148] sm:$0xff] }
  0x1e   : > { %353 = vadd.xlane.f32.xlu2 %v352_v21  ;;  %8311 = vst [vmem:[#allocation4_spill] sm:$0xff] %v4153_v62  ;;  %v4166_v9 = vld [vmem:[%s4009_s18 + $0xf0] sm:$0xff]  ;;  %v400_v12 = vadd.f32 %v399_v3, %v4156_v63  ;;  %v396_v16 = vadd.f32 %v395_v8, %v4161_v7  ;;  %v4177_v21 = vld [vmem:[%s4009_s18 + $0x138] sm:$0xff]  ;;  %v411_v28 = vsel %vm330_vm0, %v4174_v20, 0.0  ;;  %v4215_v54 = vld [vmem:[%s4009_s18 + $0x160] sm:$0xff] }
  0x1f   : > { %345 = vadd.xlane.f32.xlu1 %v344_v22  ;;  %8312 = vst [vmem:[#allocation5_spill] sm:$0xff] %v4156_v63  ;;  %v392_v18 = vadd.f32 %v391_v11, %v4166_v9  ;;  %v4180_v22 = vld [vmem:[%s4009_s18 + $0x128] sm:$0xff]  ;;  %v4188_v30 = vld [vmem:[%s4009_s18 + $0x130] sm:$0xff]  ;;  %v407_v32 = vsel %vm330_vm0, %v4177_v21, 0.0  ;;  %v4201_v44 = vld [vmem:[%s4009_s18 + $0x178] sm:$0xff] }
  0x20   : > { %337 = vadd.xlane.f32.xlu0 %v336_v23  ;;  %8313 = vst [vmem:[#allocation6_spill] sm:$0xff] %v4161_v7  ;;  %v4183_v23 = vld [vmem:[%s4009_s18 + $0x140] sm:$0xff]  ;;  %v408_v40 = vadd.f32 %v407_v32, %v4188_v30  ;;  %v423_v52 = vsel %vm330_vm0, %v4201_v44, 0.0  ;;  %v4228_v11 = vld [vmem:[%s4009_s18 + $0x1a8] sm:$0xff]  ;;  %v4242_v32 = vld [vmem:[%s4009_s18 + $0x190] sm:$0xff] }
  0x21   : > { %8314 = vst [vmem:[#allocation7_spill] sm:$0xff] %v4166_v9  ;;  %v294_v9 = vld [vmem:[%s4009_s18 + $0x390] sm:$0xff]  ;;  %v300_v62 = vld [vmem:[%s4009_s18 + $0x3c0] sm:$0xff] }
  0x22   : > { %8315 = vst [vmem:[#allocation8_spill] sm:$0xff] %v4174_v20  ;;  %v302_v7 = vld [vmem:[%s4009_s18 + $0x3d0] sm:$0xff]  ;;  %v308_v61 = vld [vmem:[%s4009_s18 + $0x400] sm:$0xff] }
  0x23   : > { %8316 = vst [vmem:[#allocation9_spill] sm:$0xff] %v4177_v21  ;;  %v296_v21 = vld [vmem:[%s4009_s18 + $0x3a0] sm:$0xff] }
  0x24   : > { %8317 = vst [vmem:[#allocation10_spill] sm:$0xff] %v4180_v22 }
  0x25   : > { %8318 = vst [vmem:[#allocation11_spill] sm:$0xff] %v4183_v23 }
  0x26   : > { %365 = vadd.xlane.f32.xlu2 %v364_v33  ;;  %8319 = vst [vmem:[#allocation12_spill] sm:$0xff] %v4188_v30  ;;  %v4193_v33 = vld [vmem:[%s4009_s18 + $0x120] sm:$0xff]  ;;  %v290_v30 = vld [vmem:[%s4009_s18 + $0x370] sm:$0xff] }
  0x27   : > { %361 = vadd.xlane.f32.xlu1 %v360_v34  ;;  %8320 = vst [vmem:[#allocation13_spill] sm:$0xff] %v4193_v33  ;;  %v403_v34 = vsel %vm330_vm0, %v4180_v22, 0.0  ;;  %v288_v22 = vld [vmem:[%s4009_s18 + $0x360] sm:$0xff] }
  0x28   : > { %357 = vadd.xlane.f32.xlu0 %v356_v35  ;;  %v412_v35 = vadd.f32 %v411_v28, %v4183_v23  ;;  %v404_v42 = vadd.f32 %v403_v34, %v4193_v33  ;;  %8321 = vst [vmem:[#allocation14_spill] sm:$0xff] %v4201_v44  ;;  %v435_v28 = vsel %vm330_vm0, %v4228_v11, 0.0  ;;  %v282_v33 = vld [vmem:[%s4009_s18 + $0x330] sm:$0xff] }
  0x29   : > { %8325 = vst [vmem:[#allocation18_spill] sm:$0xff] %v4215_v54 }
  0x2a   : > { %8327 = vst [vmem:[#allocation20_spill] sm:$0xff] %v4228_v11  ;;  %v242_v11 = vld [vmem:[%s4009_s18 + $0x1f0] sm:$0xff] }
  0x2b   : > { %8331 = vst [vmem:[#allocation24_spill] sm:$0xff] %v4242_v32 }
  0x2e   : > { %377 = vadd.xlane.f32.xlu2 %v376_v45  ;;  %v4204_v45 = vld [vmem:[%s4009_s18 + $0x168] sm:$0xff] }
  0x2f   : > { %373 = vadd.xlane.f32.xlu1 %v372_v46  ;;  %8322 = vst [vmem:[#allocation15_spill] sm:$0xff] %v4204_v45  ;;  %v4207_v46 = vld [vmem:[%s4009_s18 + $0x158] sm:$0xff]  ;;  %v419_v56 = vsel %vm330_vm0, %v4204_v45, 0.0  ;;  %v284_v45 = vld [vmem:[%s4009_s18 + $0x340] sm:$0xff] }
  0x30   : > { %369 = vadd.xlane.f32.xlu0 %v368_v47  ;;  %8323 = vst [vmem:[#allocation16_spill] sm:$0xff] %v4207_v46  ;;  %v4210_v47 = vld [vmem:[%s4009_s18 + $0x170] sm:$0xff]  ;;  %v420_v3 = vadd.f32 %v419_v56, %v4215_v54 }
  0x31   : > { %8324 = vst [vmem:[#allocation17_spill] sm:$0xff] %v4210_v47  ;;  %v278_v54 = vld [vmem:[%s4009_s18 + $0x310] sm:$0xff] }
  0x36   : > { %389 = vadd.xlane.f32.xlu2 %v388_v57  ;;  %v4220_v57 = vld [vmem:[%s4009_s18 + $0x150] sm:$0xff] }
  0x37   : > { %385 = vadd.xlane.f32.xlu1 %v384_v58  ;;  %8326 = vst [vmem:[#allocation19_spill] sm:$0xff] %v4220_v57  ;;  %v415_v58 = vsel %vm330_vm0, %v4207_v46, 0.0  ;;  %v276_v46 = vld [vmem:[%s4009_s18 + $0x300] sm:$0xff] }
  0x38   : > { %381 = vadd.xlane.f32.xlu0 %v380_v59  ;;  %v424_v59 = vadd.f32 %v423_v52, %v4210_v47  ;;  %v416_v8 = vadd.f32 %v415_v58, %v4220_v57  ;;  %v4255_v58 = vld [vmem:[%s4009_s18 + $0x1d8] sm:$0xff]  ;;  %v273_v57 = vld [vmem:[%s4009_s18 + $0x2e8] sm:$0xff] }
  0x39   : > { %8333 = vst [vmem:[#allocation26_spill] sm:$0xff] %v4255_v58 }
  0x3e   : > { %401 = vadd.xlane.f32.xlu2 %v400_v12  ;;  %v4231_v12 = vld [vmem:[%s4009_s18 + $0x198] sm:$0xff] }
  0x3f   : > { %397 = vadd.xlane.f32.xlu1 %v396_v16  ;;  %8328 = vst [vmem:[#allocation21_spill] sm:$0xff] %v4231_v12  ;;  %v4234_v16 = vld [vmem:[%s4009_s18 + $0x188] sm:$0xff]  ;;  %v431_v34 = vsel %vm330_vm0, %v4231_v12, 0.0 }
  0x40   : > { %393 = vadd.xlane.f32.xlu0 %v392_v18  ;;  %8329 = vst [vmem:[#allocation22_spill] sm:$0xff] %v4234_v16  ;;  %v4237_v18 = vld [vmem:[%s4009_s18 + $0x1a0] sm:$0xff]  ;;  %v432_v52 = vadd.f32 %v431_v34, %v4242_v32 }
  0x41   : > { %8330 = vst [vmem:[#allocation23_spill] sm:$0xff] %v4237_v18  ;;  %v236_v34 = vld [vmem:[%s4009_s18 + $0x1c0] sm:$0xff] }
  0x46   : > { %413 = vadd.xlane.f32.xlu2 %v412_v35  ;;  %v4247_v35 = vld [vmem:[%s4009_s18 + $0x180] sm:$0xff] }
  0x47   : > { %409 = vadd.xlane.f32.xlu1 %v408_v40  ;;  %8332 = vst [vmem:[#allocation25_spill] sm:$0xff] %v4247_v35  ;;  %v427_v40 = vsel %vm330_vm0, %v4234_v16, 0.0  ;;  %v243_v16 = vld [vmem:[%s4009_s18 + $0x1f8] sm:$0xff] }
  0x48   : > { %405 = vadd.xlane.f32.xlu0 %v404_v42  ;;  %v436_v42 = vadd.f32 %v435_v28, %v4237_v18  ;;  %v428_v56 = vadd.f32 %v427_v40, %v4247_v35  ;;  %v447_v28 = vsel %vm330_vm0, %v4255_v58, 0.0  ;;  %v234_v35 = vld [vmem:[%s4009_s18 + $0x1b0] sm:$0xff]  ;;  %v245_v18 = vld [vmem:[%s4009_s18 + $0x208] sm:$0xff] }
  0x49   : > { %v241_v58 = vld [vmem:[%s4009_s18 + $0x1e8] sm:$0xff]  ;;  %v459_v12 = vsel %vm330_vm0, %v245_v18, 0.0  ;;  %v250_v18 = vld [vmem:[%s4009_s18 + $0x230] sm:$0xff] }
  0x4e   : > { %425 = vadd.xlane.f32.xlu2 %v424_v59  ;;  %v4258_v59 = vld [vmem:[%s4009_s18 + $0x1c8] sm:$0xff] }
  0x4f   : > { %421 = vadd.xlane.f32.xlu1 %v420_v3  ;;  %8334 = vst [vmem:[#allocation27_spill] sm:$0xff] %v4258_v59  ;;  %v4261_v3 = vld [vmem:[%s4009_s18 + $0x1b8] sm:$0xff]  ;;  %v443_v40 = vsel %vm330_vm0, %v4258_v59, 0.0  ;;  %v244_v59 = vld [vmem:[%s4009_s18 + $0x200] sm:$0xff] }
  0x50   : > { %417 = vadd.xlane.f32.xlu0 %v416_v8  ;;  %8335 = vst [vmem:[#allocation28_spill] sm:$0xff] %v4261_v3  ;;  %v4264_v8 = vld [vmem:[%s4009_s18 + $0x1d0] sm:$0xff]  ;;  %v439_v32 = vsel %vm330_vm0, %v4261_v3, 0.0  ;;  %v455_v3 = vsel %vm330_vm0, %v243_v16, 0.0 }
  0x51   : > { %8336 = vst [vmem:[#allocation29_spill] sm:$0xff] %v4264_v8 }
  0x56   : > { %437 = vadd.xlane.f32.xlu2 %v436_v42  ;;  %v448_v42 = vadd.f32 %v447_v28, %v4264_v8  ;;  %v240_v28 = vld [vmem:[%s4009_s18 + $0x1e0] sm:$0xff]  ;;  %v251_v8 = vld [vmem:[%s4009_s18 + $0x238] sm:$0xff] }
  0x57   : > { %433 = vadd.xlane.f32.xlu1 %v432_v52  ;;  %v444_v52 = vadd.f32 %v443_v40, %v236_v34  ;;  %v456_v34 = vadd.f32 %v455_v3, %v242_v11  ;;  %v471_v16 = vsel %vm330_vm0, %v251_v8, 0.0  ;;  %v246_v11 = vld [vmem:[%s4009_s18 + $0x210] sm:$0xff]  ;;  %v256_v8 = vld [vmem:[%s4009_s18 + $0x260] sm:$0xff] }
  0x58   : > { %429 = vadd.xlane.f32.xlu0 %v428_v56  ;;  %v440_v56 = vadd.f32 %v439_v32, %v234_v35  ;;  %v451_v32 = vsel %vm330_vm0, %v241_v58, 0.0  ;;  %v460_v35 = vadd.f32 %v459_v12, %v244_v59  ;;  %v472_v59 = vadd.f32 %v471_v16, %v250_v18  ;;  %v252_v18 = vld [vmem:[%s4009_s18 + $0x240] sm:$0xff] }
  0x59   : > { %v452_v40 = vadd.f32 %v451_v32, %v240_v28  ;;  %v257_v32 = vld [vmem:[%s4009_s18 + $0x268] sm:$0xff] }
  0x5e   : > { %449 = vadd.xlane.f32.xlu2 %v448_v42  ;;  %v249_v42 = vld [vmem:[%s4009_s18 + $0x228] sm:$0xff] }
  0x5f   : > { %445 = vadd.xlane.f32.xlu1 %v444_v52  ;;  %v247_v52 = vld [vmem:[%s4009_s18 + $0x218] sm:$0xff]  ;;  %v467_v58 = vsel %vm330_vm0, %v249_v42, 0.0  ;;  %v254_v42 = vld [vmem:[%s4009_s18 + $0x250] sm:$0xff] }
  0x60   : > { %441 = vadd.xlane.f32.xlu0 %v440_v56  ;;  %v248_v56 = vld [vmem:[%s4009_s18 + $0x220] sm:$0xff]  ;;  %v463_v12 = vsel %vm330_vm0, %v247_v52, 0.0 }
  0x61   : > { %v468_v3 = vadd.f32 %v467_v58, %v248_v56  ;;  %v464_v28 = vadd.f32 %v463_v12, %v246_v11  ;;  %v263_v12 = vld [vmem:[%s4009_s18 + $0x298] sm:$0xff] }
  0x66   : > { %461 = vadd.xlane.f32.xlu2 %v460_v35  ;;  %v255_v35 = vld [vmem:[%s4009_s18 + $0x258] sm:$0xff] }
  0x67   : > { %457 = vadd.xlane.f32.xlu1 %v456_v34  ;;  %v253_v34 = vld [vmem:[%s4009_s18 + $0x248] sm:$0xff]  ;;  %v479_v52 = vsel %vm330_vm0, %v255_v35, 0.0  ;;  %v260_v35 = vld [vmem:[%s4009_s18 + $0x280] sm:$0xff] }
  0x68   : > { %453 = vadd.xlane.f32.xlu0 %v452_v40  ;;  %v483_v40 = vsel %vm330_vm0, %v257_v32, 0.0  ;;  %v475_v16 = vsel %vm330_vm0, %v253_v34, 0.0  ;;  %v480_v58 = vadd.f32 %v479_v52, %v254_v42  ;;  %v495_v32 = vsel %vm330_vm0, %v263_v12, 0.0 }
  0x69   : > { %v484_v56 = vadd.f32 %v483_v40, %v256_v8  ;;  %v476_v11 = vadd.f32 %v475_v16, %v252_v18  ;;  %v258_v8 = vld [vmem:[%s4009_s18 + $0x270] sm:$0xff]  ;;  %v269_v16 = vld [vmem:[%s4009_s18 + $0x2c8] sm:$0xff] }
  0x6a   : > { %v507_v12 = vsel %vm330_vm0, %v269_v16, 0.0  ;;  %v272_v16 = vld [vmem:[%s4009_s18 + $0x2e0] sm:$0xff] }
  0x6e   : > { %473 = vadd.xlane.f32.xlu2 %v472_v59  ;;  %v261_v59 = vld [vmem:[%s4009_s18 + $0x288] sm:$0xff] }
  0x6f   : > { %469 = vadd.xlane.f32.xlu1 %v468_v3  ;;  %v259_v3 = vld [vmem:[%s4009_s18 + $0x278] sm:$0xff]  ;;  %v491_v34 = vsel %vm330_vm0, %v261_v59, 0.0  ;;  %v266_v59 = vld [vmem:[%s4009_s18 + $0x2b0] sm:$0xff] }
  0x70   : > { %465 = vadd.xlane.f32.xlu0 %v464_v28  ;;  %v262_v28 = vld [vmem:[%s4009_s18 + $0x290] sm:$0xff]  ;;  %v487_v40 = vsel %vm330_vm0, %v259_v3, 0.0  ;;  %v492_v52 = vadd.f32 %v491_v34, %v260_v35 }
  0x71   : > { %v496_v42 = vadd.f32 %v495_v32, %v262_v28  ;;  %v488_v18 = vadd.f32 %v487_v40, %v258_v8  ;;  %v264_v28 = vld [vmem:[%s4009_s18 + $0x2a0] sm:$0xff]  ;;  %v275_v40 = vld [vmem:[%s4009_s18 + $0x2f8] sm:$0xff] }
  0x76   : > { %485 = vadd.xlane.f32.xlu2 %v484_v56  ;;  %v267_v56 = vld [vmem:[%s4009_s18 + $0x2b8] sm:$0xff] }
  0x77   : > { %481 = vadd.xlane.f32.xlu1 %v480_v58  ;;  %v265_v58 = vld [vmem:[%s4009_s18 + $0x2a8] sm:$0xff]  ;;  %v503_v3 = vsel %vm330_vm0, %v267_v56, 0.0  ;;  %v515_v56 = vsel %vm330_vm0, %v273_v57, 0.0  ;;  %v280_v57 = vld [vmem:[%s4009_s18 + $0x320] sm:$0xff] }
  0x78   : > { %477 = vadd.xlane.f32.xlu0 %v476_v11  ;;  %v268_v11 = vld [vmem:[%s4009_s18 + $0x2c0] sm:$0xff]  ;;  %v499_v32 = vsel %vm330_vm0, %v265_v58, 0.0  ;;  %v504_v34 = vadd.f32 %v503_v3, %v266_v59  ;;  %v270_v58 = vld [vmem:[%s4009_s18 + $0x2d0] sm:$0xff] }
  0x79   : > { %v508_v35 = vadd.f32 %v507_v12, %v268_v11  ;;  %v500_v8 = vadd.f32 %v499_v32, %v264_v28  ;;  %v516_v32 = vadd.f32 %v515_v56, %v272_v16 }
  0x7e   : > { %497 = vadd.xlane.f32.xlu2 %v496_v42  ;;  %v271_v42 = vld [vmem:[%s4009_s18 + $0x2d8] sm:$0xff] }
  0x7f   : > { %493 = vadd.xlane.f32.xlu1 %v492_v52  ;;  %v274_v52 = vld [vmem:[%s4009_s18 + $0x2f0] sm:$0xff]  ;;  %v511_v11 = vsel %vm330_vm0, %v271_v42, 0.0 }
  0x80   : > { %489 = vadd.xlane.f32.xlu0 %v488_v18  ;;  %v519_v18 = vsel %vm330_vm0, %v275_v40, 0.0  ;;  %v277_v40 = vld [vmem:[%s4009_s18 + $0x308] sm:$0xff] }
  0x81   : > { %v520_v28 = vadd.f32 %v519_v18, %v274_v52  ;;  %v523_v52 = vsel %vm330_vm0, %v277_v40, 0.0 }
  0x86   : > { %509 = vadd.xlane.f32.xlu2 %v508_v35  ;;  %v512_v35 = vadd.f32 %v511_v11, %v270_v58 }
  0x87   : > { %505 = vadd.xlane.f32.xlu1 %v504_v34  ;;  %v281_v34 = vld [vmem:[%s4009_s18 + $0x328] sm:$0xff] }
  0x88   : > { %501 = vadd.xlane.f32.xlu0 %v500_v8  ;;  %v279_v8 = vld [vmem:[%s4009_s18 + $0x318] sm:$0xff]  ;;  %v531_v42 = vsel %vm330_vm0, %v281_v34, 0.0 }
  0x89   : > { %v4329_v12 = vpop.xlane.xlu2 %349  ;;  %v527_v47 = vsel %vm330_vm0, %v279_v8, 0.0  ;;  %v532_v58 = vadd.f32 %v531_v42, %v280_v57  ;;  %v283_v34 = vld [vmem:[%s4009_s18 + $0x338] sm:$0xff]  ;;  %v286_v8 = vld [vmem:[%s4009_s18 + $0x350] sm:$0xff] }
  0x8a   : > { %v4331_v59 = vpop.xlane.xlu1 %341  ;;  %v528_v11 = vadd.f32 %v527_v47, %v278_v54 }
  0x8b   : > { %v4333_v3 = vpop.xlane.xlu0 %333 }
  0x8e   : > { %521 = vadd.xlane.f32.xlu2 %v520_v28  ;;  %v524_v28 = vadd.f32 %v523_v52, %v276_v46  ;;  %v535_v46 = vsel %vm330_vm0, %v283_v34, 0.0 }
  0x8f   : > { %517 = vadd.xlane.f32.xlu1 %v516_v32  ;;  %v287_v32 = vld [vmem:[%s4009_s18 + $0x358] sm:$0xff] }
  0x90   : > { %513 = vadd.xlane.f32.xlu0 %v512_v35  ;;  %v285_v35 = vld [vmem:[%s4009_s18 + $0x348] sm:$0xff]  ;;  %v543_v40 = vsel %vm330_vm0, %v287_v32, 0.0 }
  0x91   : > { %v4344_v18 = vpop.xlane.xlu2 %353  ;;  %v539_v44 = vsel %vm330_vm0, %v285_v35, 0.0  ;;  %v544_v42 = vadd.f32 %v543_v40, %v286_v8  ;;  %v289_v32 = vld [vmem:[%s4009_s18 + $0x368] sm:$0xff]  ;;  %v292_v35 = vld [vmem:[%s4009_s18 + $0x380] sm:$0xff] }
  0x92   : > { %v4346_v16 = vpop.xlane.xlu1 %345  ;;  %v540_v52 = vadd.f32 %v539_v44, %v284_v45 }
  0x93   : > { %v4348_v56 = vpop.xlane.xlu0 %337 }
  0x96   : > { %533 = vadd.xlane.f32.xlu2 %v532_v58  ;;  %v536_v58 = vadd.f32 %v535_v46, %v282_v33  ;;  %v547_v33 = vsel %vm330_vm0, %v289_v32, 0.0 }
  0x97   : > { %529 = vadd.xlane.f32.xlu1 %v528_v11  ;;  %v293_v11 = vld [vmem:[%s4009_s18 + $0x388] sm:$0xff] }
  0x98   : > { %525 = vadd.xlane.f32.xlu0 %v524_v28  ;;  %v291_v28 = vld [vmem:[%s4009_s18 + $0x378] sm:$0xff]  ;;  %v555_v34 = vsel %vm330_vm0, %v293_v11, 0.0 }
  0x99   : > { %v4359_v47 = vpop.xlane.xlu2 %365  ;;  %v551_v23 = vsel %vm330_vm0, %v291_v28, 0.0  ;;  %v556_v40 = vadd.f32 %v555_v34, %v292_v35  ;;  %v295_v11 = vld [vmem:[%s4009_s18 + $0x398] sm:$0xff]  ;;  %v298_v28 = vld [vmem:[%s4009_s18 + $0x3b0] sm:$0xff] }
  0x9a   : > { %v4361_v54 = vpop.xlane.xlu1 %361  ;;  %v552_v46 = vadd.f32 %v551_v23, %v290_v30 }
  0x9b   : > { %v4363_v57 = vpop.xlane.xlu0 %357 }
  0x9e   : > { %545 = vadd.xlane.f32.xlu2 %v544_v42  ;;  %v548_v42 = vadd.f32 %v547_v33, %v288_v22  ;;  %v559_v22 = vsel %vm330_vm0, %v295_v11, 0.0 }
  0x9f   : > { %541 = vadd.xlane.f32.xlu1 %v540_v52  ;;  %v299_v52 = vld [vmem:[%s4009_s18 + $0x3b8] sm:$0xff] }
  0xa0   : > { %537 = vadd.xlane.f32.xlu0 %v536_v58  ;;  %v297_v58 = vld [vmem:[%s4009_s18 + $0x3a8] sm:$0xff]  ;;  %v567_v32 = vsel %vm330_vm0, %v299_v52, 0.0 }
  0xa1   : > { %v4374_v44 = vpop.xlane.xlu2 %377  ;;  %v563_v20 = vsel %vm330_vm0, %v297_v58, 0.0  ;;  %v568_v34 = vadd.f32 %v567_v32, %v298_v28  ;;  %v301_v52 = vld [vmem:[%s4009_s18 + $0x3c8] sm:$0xff]  ;;  %v304_v58 = vld [vmem:[%s4009_s18 + $0x3e0] sm:$0xff] }
  0xa2   : > { %v4376_v45 = vpop.xlane.xlu1 %373  ;;  %v564_v33 = vadd.f32 %v563_v20, %v296_v21 }
  0xa3   : > { %v4378_v8 = vpop.xlane.xlu0 %369 }
  0xa6   : > { %557 = vadd.xlane.f32.xlu2 %v556_v40  ;;  %v560_v40 = vadd.f32 %v559_v22, %v294_v9  ;;  %v571_v9 = vsel %vm330_vm0, %v301_v52, 0.0 }
  0xa7   : > { %553 = vadd.xlane.f32.xlu1 %v552_v46  ;;  %v305_v46 = vld [vmem:[%s4009_s18 + $0x3e8] sm:$0xff] }
  0xa8   : > { %549 = vadd.xlane.f32.xlu0 %v548_v42  ;;  %v303_v42 = vld [vmem:[%s4009_s18 + $0x3d8] sm:$0xff]  ;;  %v579_v11 = vsel %vm330_vm0, %v305_v46, 0.0 }
  0xa9   : > { %v4389_v23 = vpop.xlane.xlu2 %389  ;;  %v575_v63 = vsel %vm330_vm0, %v303_v42, 0.0  ;;  %v580_v32 = vadd.f32 %v579_v11, %v304_v58  ;;  %v307_v46 = vld [vmem:[%s4009_s18 + $0x3f8] sm:$0xff]  ;;  %v310_v42 = vld [vmem:[%s4009_s18 + $0x410] sm:$0xff] }
  0xaa   : > { %v4391_v30 = vpop.xlane.xlu1 %385  ;;  %v576_v22 = vadd.f32 %v575_v63, %v302_v7 }
  0xab   : > { %v4393_v35 = vpop.xlane.xlu0 %381 }
  0xae   : > { %569 = vadd.xlane.f32.xlu2 %v568_v34  ;;  %v572_v34 = vadd.f32 %v571_v9, %v300_v62  ;;  %v583_v62 = vsel %vm330_vm0, %v307_v46, 0.0 }
  0xaf   : > { %565 = vadd.xlane.f32.xlu1 %v564_v33  ;;  %v311_v33 = vld [vmem:[%s4009_s18 + $0x418] sm:$0xff] }
  0xb0   : > { %561 = vadd.xlane.f32.xlu0 %v560_v40  ;;  %v309_v40 = vld [vmem:[%s4009_s18 + $0x408] sm:$0xff]  ;;  %v591_v52 = vsel %vm330_vm0, %v311_v33, 0.0 }
  0xb1   : > { %v4404_v20 = vpop.xlane.xlu2 %401  ;;  %v587_v60 = vsel %vm330_vm0, %v309_v40, 0.0  ;;  %v592_v11 = vadd.f32 %v591_v52, %v310_v42  ;;  %v313_v33 = vld [vmem:[%s4009_s18 + $0x428] sm:$0xff]  ;;  %v316_v40 = vld [vmem:[%s4009_s18 + $0x440] sm:$0xff] }
  0xb2   : > { %v4406_v21 = vpop.xlane.xlu1 %397  ;;  %v588_v9 = vadd.f32 %v587_v60, %v308_v61  ;;  %v595_v60 = vsel %vm330_vm0, %v313_v33, 0.0 }
  0xb3   : > { %8337 = vst [vmem:[#allocation30_spill] sm:$0xff] %v4406_v21  ;;  %v4408_v28 = vpop.xlane.xlu0 %393  ;;  %v318_v21 = vld [vmem:[%s4009_s18 + $0x450] sm:$0xff] }
  0xb4   : > { %8338 = vst [vmem:[#allocation31_spill] sm:$0xff] %v4408_v28  ;;  %v306_v28 = vld [vmem:[%s4009_s18 + $0x3f0] sm:$0xff] }
  0xb6   : > { %581 = vadd.xlane.f32.xlu2 %v580_v32  ;;  %v584_v32 = vadd.f32 %v583_v62, %v306_v28 }
  0xb7   : > { %577 = vadd.xlane.f32.xlu1 %v576_v22  ;;  %v317_v22 = vld [vmem:[%s4009_s18 + $0x448] sm:$0xff] }
  0xb8   : > { %573 = vadd.xlane.f32.xlu0 %v572_v34  ;;  %v315_v34 = vld [vmem:[%s4009_s18 + $0x438] sm:$0xff]  ;;  %v603_v46 = vsel %vm330_vm0, %v317_v22, 0.0 }
  0xb9   : > { %v4419_v63 = vpop.xlane.xlu2 %413  ;;  %v604_v52 = vadd.f32 %v603_v46, %v316_v40  ;;  %v319_v22 = vld [vmem:[%s4009_s18 + $0x458] sm:$0xff] }
  0xba   : > { %8339 = vst [vmem:[#allocation32_spill] sm:$0xff] %v4419_v63  ;;  %v4421_v7 = vpop.xlane.xlu1 %409  ;;  %v314_v63 = vld [vmem:[%s4009_s18 + $0x430] sm:$0xff]  ;;  %v607_v40 = vsel %vm330_vm0, %v319_v22, 0.0  ;;  %v632_v22 = vmul.f32 0.0051020407, %v4348_v56 }
  0xbb   : > { %8340 = vst [vmem:[#allocation33_spill] sm:$0xff] %v4421_v7  ;;  %v4423_v58 = vpop.xlane.xlu0 %405  ;;  %v599_v7 = vsel %vm330_vm0, %v315_v34, 0.0  ;;  %v322_v34 = vld [vmem:[%s4009_s18 + $0x470] sm:$0xff] }
  0xbc   : > { %8341 = vst [vmem:[#allocation34_spill] sm:$0xff] %v4423_v58  ;;  %v312_v58 = vld [vmem:[%s4009_s18 + $0x420] sm:$0xff]  ;;  %v600_v62 = vadd.f32 %v599_v7, %v314_v63  ;;  %v4476_v56 = vsub.f32 %v4045_v14, %v632_v22  ;;  %v4491_v14 = vsub.f32 %v4058_v19, %v632_v22 }
  0xbe   : > { %593 = vadd.xlane.f32.xlu2 %v592_v11  ;;  %v596_v11 = vadd.f32 %v595_v60, %v312_v58  ;;  %8350 = vst [vmem:[#allocation43_spill] sm:$0xff] %v4476_v56 }
  0xbf   : > { %589 = vadd.xlane.f32.xlu1 %v588_v9  ;;  %v323_v9 = vld [vmem:[%s4009_s18 + $0x478] sm:$0xff]  ;;  %8353 = vst [vmem:[#allocation46_spill] sm:$0xff] %v4491_v14 }
  0xc0   : > { %585 = vadd.xlane.f32.xlu0 %v584_v32  ;;  %v321_v32 = vld [vmem:[%s4009_s18 + $0x468] sm:$0xff]  ;;  %v615_v33 = vsel %vm330_vm0, %v323_v9, 0.0  ;;  %v631_v9 = vmul.f32 0.0051020407, %v4333_v3 }
  0xc1   : > { %v4434_v61 = vpop.xlane.xlu2 %425  ;;  %v616_v46 = vadd.f32 %v615_v33, %v322_v34 }
  0xc2   : > { %8342 = vst [vmem:[#allocation35_spill] sm:$0xff] %v4434_v61  ;;  %v4436_v28 = vpop.xlane.xlu1 %421  ;;  %v320_v61 = vld [vmem:[%s4009_s18 + $0x460] sm:$0xff]  ;;  %v4471_v3 = vsub.f32 %v4029_v6, %v631_v9  ;;  %v4487_v6 = vsub.f32 %v4026_v5, %v631_v9 }
  0xc3   : > { %8343 = vst [vmem:[#allocation36_spill] sm:$0xff] %v4436_v28  ;;  %v4438_v42 = vpop.xlane.xlu0 %417  ;;  %v611_v28 = vsel %vm330_vm0, %v321_v32, 0.0  ;;  %v327_v32 = vld [vmem:[%s4009_s18 + $0x498] sm:$0xff] }
  0xc4   : > { %8344 = vst [vmem:[#allocation37_spill] sm:$0xff] %v4438_v42  ;;  %v612_v60 = vadd.f32 %v611_v28, %v320_v61  ;;  %v325_v42 = vld [vmem:[%s4009_s18 + $0x488] sm:$0xff]  ;;  %v623_v34 = vsel %vm330_vm0, %v327_v32, 0.0  ;;  %v324_v61 = vld [vmem:[%s4009_s18 + $0x480] sm:$0xff] }
  0xc5   : > { %8349 = vst [vmem:[#allocation42_spill] sm:$0xff] %v4471_v3 }
  0xc6   : > { %605 = vadd.xlane.f32.xlu2 %v604_v52  ;;  %v608_v52 = vadd.f32 %v607_v40, %v318_v21  ;;  %v619_v21 = vsel %vm330_vm0, %v325_v42, 0.0  ;;  %8352 = vst [vmem:[#allocation45_spill] sm:$0xff] %v4487_v6 }
  0xc7   : > { %601 = vadd.xlane.f32.xlu1 %v600_v62  ;;  %v329_v62 = vld [vmem:[%s4009_s18 + $0x4a8] sm:$0xff]  ;;  %v620_v42 = vadd.f32 %v619_v21, %v324_v61 }
  0xc8   : > { %597 = vadd.xlane.f32.xlu0 %v596_v11  ;;  %v633_v11 = vmul.f32 0.0051020407, %v4331_v59 }
  0xc9   : > { %v4449_v63 = vpop.xlane.xlu2 %437 }
  0xca   : > { %8345 = vst [vmem:[#allocation38_spill] sm:$0xff] %v4449_v63  ;;  %v4451_v7 = vpop.xlane.xlu1 %433  ;;  %v627_v63 = vsel %vm330_vm0, %v329_v62, 0.0  ;;  %v4468_v59 = vsub.f32 %v4023_v4, %v633_v11  ;;  %v4484_v4 = vsub.f32 %v4018_v2, %v633_v11  ;;  %v636_v62 = vmul.f32 0.0051020407, %v4344_v18 }
  0xcb   : > { %8346 = vst [vmem:[#allocation39_spill] sm:$0xff] %v4451_v7  ;;  %v4453_v58 = vpop.xlane.xlu0 %429  ;;  %v328_v7 = vld [vmem:[%s4009_s18 + $0x4a0] sm:$0xff]  ;;  %v859_v2 = vmul.f32 %v4476_v56, %v4476_v56  ;;  %v856_v18 = vmul.f32 %v4487_v6, %v4487_v6 }
  0xcc   : > { %8347 = vst [vmem:[#allocation40_spill] sm:$0xff] %v4453_v58  ;;  %v326_v58 = vld [vmem:[%s4009_s18 + $0x490] sm:$0xff]  ;;  %v861_v32 = vmul.f32 %v4468_v59, %v4468_v59  ;;  %v860_v19 = vmul.f32 %v4484_v4, %v4484_v4 }
  0xcd   : > { %8348 = vst [vmem:[#allocation41_spill] sm:$0xff] %v4468_v59  ;;  %v1010_v61 = vsel %vm330_vm0, %v859_v2, 0.0 }
  0xce   : > { %617 = vadd.xlane.f32.xlu2 %v616_v46  ;;  %v628_v46 = vadd.f32 %v627_v63, %v328_v7  ;;  %8351 = vst [vmem:[#allocation44_spill] sm:$0xff] %v4484_v4  ;;  %v857_v63 = vmul.f32 %v4471_v3, %v4471_v3  ;;  %v4508_v7 = vsub.f32 %v4037_v10, %v636_v62 }
  0xcf   : > { %613 = vadd.xlane.f32.xlu1 %v612_v60  ;;  %v635_v60 = vmul.f32 0.0051020407, %v4329_v12  ;;  %v634_v12 = vmul.f32 0.0051020407, %v4346_v16  ;;  %v1014_v16 = vsel %vm330_vm0, %v861_v32, 0.0 }
  0xd0   : > { %609 = vadd.xlane.f32.xlu0 %v608_v52  ;;  %v624_v52 = vadd.f32 %v623_v34, %v326_v58  ;;  %8355 = vst [vmem:[#allocation48_spill] sm:$0xff] %v4508_v7  ;;  %v1006_v11 = vsel %vm330_vm0, %v857_v63, 0.0  ;;  %v638_v63 = vmul.f32 0.0051020407, %v4361_v54 }
  0xd1   : > { %v4473_v28 = vpop.xlane.xlu2 %449  ;;  %v4501_v5 = vsub.f32 %v4015_v1, %v635_v60  ;;  %v858_v1 = vmul.f32 %v4491_v14, %v4491_v14  ;;  %v4517_v9 = vsub.f32 %v4042_v13, %v634_v12  ;;  %v4525_v10 = vsub.f32 %v4012_v0, %v635_v60 }
  0xd2   : > { %v4478_v33 = vpop.xlane.xlu1 %445  ;;  %v1007_v13 = vadd.f32 %v1006_v11, %v856_v18  ;;  %v4534_v32 = vsub.f32 %v4053_v17, %v634_v12  ;;  %v867_v0 = vmul.f32 %v4508_v7, %v4508_v7  ;;  %v637_v60 = vmul.f32 0.0051020407, %v4363_v57 }
  0xd3   : > { %v4480_v40 = vpop.xlane.xlu0 %441  ;;  %8354 = vst [vmem:[#allocation47_spill] sm:$0xff] %v4501_v5  ;;  %v865_v21 = vmul.f32 %v4501_v5, %v4501_v5  ;;  %v1011_v3 = vadd.f32 %v1010_v61, %v858_v1  ;;  %v864_v54 = vmul.f32 %v4525_v10, %v4525_v10  ;;  %v4570_v11 = vsub.f32 %v4080_v29, %v638_v63 }
  0xd4   : > { %8356 = vst [vmem:[#allocation49_spill] sm:$0xff] %v4517_v9  ;;  %v1026_v57 = vsel %vm330_vm0, %v867_v0, 0.0  ;;  %v862_v2 = vmul.f32 %v4534_v32, %v4534_v32 }
  0xd5   : > { %8357 = vst [vmem:[#allocation50_spill] sm:$0xff] %v4525_v10 }
  0xd6   : > { %629 = vadd.xlane.f32.xlu2 %v628_v46  ;;  %v4530_v46 = vsub.f32 %v4048_v15, %v636_v62  ;;  %8359 = vst [vmem:[#allocation52_spill] sm:$0xff] %v4534_v32  ;;  %v863_v15 = vmul.f32 %v4517_v9, %v4517_v9  ;;  %v4550_v62 = vsub.f32 %v4069_v25, %v638_v63  ;;  %v8421_v9 = vld [vmem:[#allocation19_spill] sm:$0xff] }
  0xd7   : > { %625 = vadd.xlane.f32.xlu1 %v624_v52  ;;  %v639_v52 = vmul.f32 0.0051020407, %v4359_v47  ;;  %8364 = vst [vmem:[#allocation57_spill] sm:$0xff] %v4570_v11 }
  0xd8   : > { %621 = vadd.xlane.f32.xlu0 %v620_v42  ;;  %8358 = vst [vmem:[#allocation51_spill] sm:$0xff] %v4530_v46  ;;  %v1015_v42 = vadd.f32 %v1014_v16, %v860_v19  ;;  %v866_v17 = vmul.f32 %v4530_v46, %v4530_v46  ;;  %v1018_v16 = vsel %vm330_vm0, %v863_v15, 0.0  ;;  %v871_v0 = vmul.f32 %v4550_v62, %v4550_v62 }
  0xd9   : > { %v4510_v58 = vpop.xlane.xlu2 %461  ;;  %v4543_v47 = vsub.f32 %v4066_v24, %v639_v52  ;;  %8361 = vst [vmem:[#allocation54_spill] sm:$0xff] %v4550_v62  ;;  %v4559_v24 = vsub.f32 %v4072_v26, %v637_v60  ;;  %v4567_v25 = vsub.f32 %v4075_v27, %v639_v52  ;;  %v4575_v26 = vsub.f32 %v4085_v31, %v637_v60 }
  0xda   : > { %v4519_v22 = vpop.xlane.xlu1 %457  ;;  %v1027_v1 = vadd.f32 %v1026_v57, %v866_v17  ;;  %v641_v27 = vmul.f32 0.0051020407, %v4376_v45  ;;  %v640_v52 = vmul.f32 0.0051020407, %v4378_v8  ;;  %v1034_v8 = vsel %vm330_vm0, %v871_v0, 0.0 }
  0xdb   : > { %v4521_v34 = vpop.xlane.xlu0 %453  ;;  %8360 = vst [vmem:[#allocation53_spill] sm:$0xff] %v4543_v47  ;;  %v869_v29 = vmul.f32 %v4559_v24, %v4559_v24  ;;  %v872_v31 = vmul.f32 %v4567_v25, %v4567_v25  ;;  %v868_v15 = vmul.f32 %v4575_v26, %v4575_v26 }
  0xdc   : > { %8362 = vst [vmem:[#allocation55_spill] sm:$0xff] %v4559_v24  ;;  %v4598_v17 = vsub.f32 %v4096_v37, %v641_v27  ;;  %v4614_v37 = vsub.f32 %v4107_v41, %v641_v27 }
  0xdd   : > { %8363 = vst [vmem:[#allocation56_spill] sm:$0xff] %v4567_v25 }
  0xde   : > { %1016 = vadd.xlane.f32.xlu2 %v1015_v42  ;;  %8365 = vst [vmem:[#allocation58_spill] sm:$0xff] %v4575_v26  ;;  %v642_v42 = vmul.f32 0.0051020407, %v4374_v44  ;;  %v870_v44 = vmul.f32 %v4570_v11, %v4570_v11  ;;  %v876_v27 = vmul.f32 %v4614_v37, %v4614_v37  ;;  %v8392_v26 = vld [vmem:[#allocation7_spill] sm:$0xff] }
  0xdf   : > { %1012 = vadd.xlane.f32.xlu1 %v1011_v3  ;;  %v1022_v3 = vsel %vm330_vm0, %v865_v21, 0.0  ;;  %v873_v21 = vmul.f32 %v4543_v47, %v4543_v47  ;;  %8367 = vst [vmem:[#allocation60_spill] sm:$0xff] %v4598_v17 }
  0xe0   : > { %1008 = vadd.xlane.f32.xlu0 %v1007_v13  ;;  %v1023_v61 = vadd.f32 %v1022_v3, %v864_v54  ;;  %v1019_v13 = vadd.f32 %v1018_v16, %v862_v2  ;;  %v4590_v60 = vsub.f32 %v4093_v36, %v642_v42  ;;  %v4601_v54 = vsub.f32 %v4099_v38, %v640_v52 }
  0xe1   : > { %v4552_v12 = vpop.xlane.xlu2 %473  ;;  %v1038_v63 = vsel %vm330_vm0, %v873_v21, 0.0  ;;  %v1030_v36 = vsel %vm330_vm0, %v869_v29, 0.0  ;;  %v4609_v16 = vsub.f32 %v4102_v39, %v642_v42  ;;  %v1035_v21 = vadd.f32 %v1034_v8, %v870_v44  ;;  %8370 = vst [vmem:[#allocation63_spill] sm:$0xff] %v4614_v37 }
  0xe2   : > { %v4561_v19 = vpop.xlane.xlu1 %469  ;;  %8366 = vst [vmem:[#allocation59_spill] sm:$0xff] %v4590_v60  ;;  %v1039_v3 = vadd.f32 %v1038_v63, %v872_v31  ;;  %v4617_v38 = vsub.f32 %v4112_v43, %v640_v52  ;;  %v879_v0 = vmul.f32 %v4590_v60, %v4590_v60  ;;  %v643_v29 = vmul.f32 0.0051020407, %v4393_v35 }
  0xe3   : > { %v4563_v18 = vpop.xlane.xlu0 %465  ;;  %8368 = vst [vmem:[#allocation61_spill] sm:$0xff] %v4601_v54  ;;  %v877_v39 = vmul.f32 %v4598_v17, %v4598_v17 }
  0xe4   : > { %8369 = vst [vmem:[#allocation62_spill] sm:$0xff] %v4609_v16  ;;  %v1050_v35 = vsel %vm330_vm0, %v879_v0, 0.0  ;;  %v874_v52 = vmul.f32 %v4617_v38, %v4617_v38  ;;  %v4642_v31 = vsub.f32 %v4126_v50, %v643_v29  ;;  %v8378_v0 = vld [vmem:[#allocation30_spill] sm:$0xff] }
  0xe5   : > { %8371 = vst [vmem:[#allocation64_spill] sm:$0xff] %v4617_v38  ;;  %v1046_v63 = vsel %vm330_vm0, %v877_v39, 0.0  ;;  %v647_v39 = vmul.f32 0.0051020407, %v8378_v0 }
  0xe6   : > { %1028 = vadd.xlane.f32.xlu2 %v1027_v1  ;;  %v645_v1 = vmul.f32 0.0051020407, %v4389_v23  ;;  %v875_v23 = vmul.f32 %v4601_v54, %v4601_v54  ;;  %8374 = vst [vmem:[#allocation67_spill] sm:$0xff] %v4642_v31 }
  0xe7   : > { %1024 = vadd.xlane.f32.xlu1 %v1023_v61  ;;  %v644_v61 = vmul.f32 0.0051020407, %v4391_v30  ;;  %v878_v30 = vmul.f32 %v4609_v16, %v4609_v16 }
  0xe8   : > { %1020 = vadd.xlane.f32.xlu0 %v1019_v13  ;;  %v1031_v13 = vadd.f32 %v1030_v36, %v868_v15  ;;  %v4627_v41 = vsub.f32 %v4120_v48, %v645_v1  ;;  %v1042_v44 = vsel %vm330_vm0, %v875_v23, 0.0  ;;  %v4651_v8 = vsub.f32 %v4129_v51, %v645_v1  ;;  %v8379_v1 = vld [vmem:[#allocation31_spill] sm:$0xff] }
  0xe9   : > { %v4592_v45 = vpop.xlane.xlu2 %485  ;;  %v4630_v43 = vsub.f32 %v4123_v49, %v644_v61  ;;  %v4654_v15 = vsub.f32 %v4134_v53, %v644_v61  ;;  %v648_v36 = vmul.f32 0.0051020407, %v4404_v20  ;;  %v1047_v23 = vadd.f32 %v1046_v63, %v876_v27  ;;  %v8382_v27 = vld [vmem:[#allocation3_spill] sm:$0xff] }
  0xea   : > { %v4603_v57 = vpop.xlane.xlu1 %481  ;;  %8372 = vst [vmem:[#allocation65_spill] sm:$0xff] %v4627_v41  ;;  %v885_v50 = vmul.f32 %v4627_v41, %v4627_v41  ;;  %v1043_v51 = vadd.f32 %v1042_v44, %v874_v52  ;;  %v646_v54 = vmul.f32 0.0051020407, %v8379_v1  ;;  %v881_v53 = vmul.f32 %v4642_v31, %v4642_v31  ;;  %v8388_v31 = vld [vmem:[#allocation6_spill] sm:$0xff] }
  0xeb   : > { %v4605_v2 = vpop.xlane.xlu0 %477  ;;  %8373 = vst [vmem:[#allocation66_spill] sm:$0xff] %v4630_v43  ;;  %v884_v20 = vmul.f32 %v4651_v8, %v4651_v8  ;;  %v882_v61 = vmul.f32 %v4654_v15, %v4654_v15  ;;  %v4678_v52 = vsub.f32 %v8382_v27, %v647_v39  ;;  %v4696_v38 = vsub.f32 %v8388_v31, %v647_v39 }
  0xec   : > { %8375 = vst [vmem:[#allocation68_spill] sm:$0xff] %v4651_v8  ;;  %v1054_v1 = vsel %vm330_vm0, %v881_v53, 0.0  ;;  %v4703_v41 = vsub.f32 %v8392_v26, %v646_v54  ;;  %v8394_v8 = vld [vmem:[#allocation34_spill] sm:$0xff]  ;;  %v8397_v26 = vld [vmem:[#allocation9_spill] sm:$0xff] }
  0xed   : > { %8376 = vst [vmem:[#allocation69_spill] sm:$0xff] %v4654_v15  ;;  %v649_v53 = vmul.f32 0.0051020407, %v8394_v8 }
  0xee   : > { %1040 = vadd.xlane.f32.xlu2 %v1039_v3  ;;  %v1051_v3 = vadd.f32 %v1050_v35, %v878_v30  ;;  %v1062_v30 = vsel %vm330_vm0, %v885_v50, 0.0  ;;  %8383 = vst [vmem:[#allocation31_spill] sm:$0xff] %v4678_v52  ;;  %v8386_v50 = vld [vmem:[#allocation5_spill] sm:$0xff] }
  0xef   : > { %1036 = vadd.xlane.f32.xlu1 %v1035_v21  ;;  %v883_v21 = vmul.f32 %v4630_v43, %v4630_v43  ;;  %v8390_v43 = vld [vmem:[#allocation32_spill] sm:$0xff]  ;;  %8393 = vst [vmem:[#allocation5_spill] sm:$0xff] %v4703_v41 }
  0xf0   : > { %1032 = vadd.xlane.f32.xlu0 %v1031_v13  ;;  %v4662_v13 = vsub.f32 %v4139_v55, %v643_v29  ;;  %v8380_v55 = vld [vmem:[#allocation2_spill] sm:$0xff]  ;;  %v651_v15 = vmul.f32 0.0051020407, %v8390_v43 }
  0xf1   : > { %v4634_v42 = vpop.xlane.xlu2 %497  ;;  %v4673_v29 = vsub.f32 %v8380_v55, %v648_v36  ;;  %v1058_v35 = vsel %vm330_vm0, %v883_v21, 0.0  ;;  %v4693_v55 = vsub.f32 %v8386_v50, %v648_v36  ;;  %v1063_v21 = vadd.f32 %v1062_v30, %v884_v20 }
  0xf2   : > { %v4644_v48 = vpop.xlane.xlu1 %493  ;;  %8377 = vst [vmem:[#allocation70_spill] sm:$0xff] %v4662_v13  ;;  %v880_v44 = vmul.f32 %v4662_v13, %v4662_v13  ;;  %v1059_v27 = vadd.f32 %v1058_v35, %v882_v61  ;;  %v8391_v13 = vld [vmem:[#allocation33_spill] sm:$0xff]  ;;  %v889_v36 = vmul.f32 %v4678_v52, %v4678_v52  ;;  %v888_v20 = vmul.f32 %v4696_v38, %v4696_v38  ;;  %v8399_v61 = vld [vmem:[#allocation10_spill] sm:$0xff] }
  0xf3   : > { %v4646_v49 = vpop.xlane.xlu0 %489  ;;  %8381 = vst [vmem:[#allocation30_spill] sm:$0xff] %v4673_v29  ;;  %v650_v24 = vmul.f32 0.0051020407, %v8391_v13  ;;  %v890_v43 = vmul.f32 %v4693_v55, %v4693_v55  ;;  %v8395_v13 = vld [vmem:[#allocation8_spill] sm:$0xff]  ;;  %v4722_v30 = vsub.f32 %v8399_v61, %v649_v53 }
  0xf4   : > { %8387 = vst [vmem:[#allocation3_spill] sm:$0xff] %v4693_v55  ;;  %v1055_v17 = vadd.f32 %v1054_v1, %v880_v44  ;;  %v4713_v39 = vsub.f32 %v8395_v13, %v651_v15  ;;  %v886_v44 = vmul.f32 %v4703_v41, %v4703_v41  ;;  %v8403_v13 = vld [vmem:[#allocation12_spill] sm:$0xff] }
  0xf5   : > { %8400 = vst [vmem:[#allocation33_spill] sm:$0xff] %v4722_v30 }
  0xf6   : > { %1052 = vadd.xlane.f32.xlu2 %v1051_v3  ;;  %v8384_v3 = vld [vmem:[#allocation4_spill] sm:$0xff]  ;;  %8396 = vst [vmem:[#allocation6_spill] sm:$0xff] %v4713_v39  ;;  %v897_v41 = vmul.f32 %v4713_v39, %v4713_v39 }
  0xf7   : > { %1048 = vadd.xlane.f32.xlu1 %v1047_v23  ;;  %v4685_v0 = vsub.f32 %v8384_v3, %v646_v54  ;;  %8389 = vst [vmem:[#allocation4_spill] sm:$0xff] %v4696_v38  ;;  %v891_v3 = vmul.f32 %v4673_v29, %v4673_v29  ;;  %v4716_v54 = vsub.f32 %v8397_v26, %v650_v24  ;;  %v8407_v29 = vld [vmem:[#allocation35_spill] sm:$0xff] }
  0xf8   : > { %1044 = vadd.xlane.f32.xlu0 %v1043_v51  ;;  %v4738_v26 = vsub.f32 %v8403_v13, %v650_v24  ;;  %v654_v55 = vmul.f32 0.0051020407, %v8407_v29  ;;  %v893_v24 = vmul.f32 %v4722_v30, %v4722_v30 }
  0xf9   : > { %v4680_v63 = vpop.xlane.xlu2 %509  ;;  %8385 = vst [vmem:[#allocation2_spill] sm:$0xff] %v4685_v0  ;;  %v887_v31 = vmul.f32 %v4685_v0, %v4685_v0  ;;  %v1074_v8 = vsel %vm330_vm0, %v891_v3, 0.0  ;;  %v8405_v0 = vld [vmem:[#allocation13_spill] sm:$0xff]  ;;  %v895_v38 = vmul.f32 %v4716_v54, %v4716_v54 }
  0xfa   : > { %v4687_v23 = vpop.xlane.xlu1 %505  ;;  %8398 = vst [vmem:[#allocation32_spill] sm:$0xff] %v4716_v54  ;;  %v1075_v61 = vadd.f32 %v1074_v8, %v890_v43  ;;  %v4741_v52 = vsub.f32 %v8405_v0, %v649_v53  ;;  %v894_v53 = vmul.f32 %v4738_v26, %v4738_v26  ;;  %v1086_v8 = vsel %vm330_vm0, %v897_v41, 0.0 }
  0xfb   : > { %v4689_v51 = vpop.xlane.xlu0 %501  ;;  %8404 = vst [vmem:[#allocation34_spill] sm:$0xff] %v4738_v26  ;;  %v1082_v29 = vsel %vm330_vm0, %v895_v38, 0.0 }
  0xfc   : > { %8406 = vst [vmem:[#allocation8_spill] sm:$0xff] %v4741_v52  ;;  %v1083_v30 = vadd.f32 %v1082_v29, %v894_v53  ;;  %v8424_v53 = vld [vmem:[#allocation40_spill] sm:$0xff]  ;;  %v8427_v29 = vld [vmem:[#allocation21_spill] sm:$0xff] }
  0xfe   : > { %1064 = vadd.xlane.f32.xlu2 %v1063_v21  ;;  %v1066_v21 = vsel %vm330_vm0, %v887_v31, 0.0  ;;  %v8408_v31 = vld [vmem:[#allocation36_spill] sm:$0xff] }
  0xff   : > { %1060 = vadd.xlane.f32.xlu1 %v1059_v27  ;;  %v8401_v27 = vld [vmem:[#allocation11_spill] sm:$0xff]  ;;  %v653_v37 = vmul.f32 0.0051020407, %v8408_v31  ;;  %v8414_v31 = vld [vmem:[#allocation16_spill] sm:$0xff] }
 0x100   : > { %1056 = vadd.xlane.f32.xlu0 %v1055_v17  ;;  %v1070_v17 = vsel %vm330_vm0, %v889_v36, 0.0  ;;  %v4735_v3 = vsub.f32 %v8401_v27, %v651_v15  ;;  %v1067_v15 = vadd.f32 %v1066_v21, %v886_v44  ;;  %v8409_v27 = vld [vmem:[#allocation37_spill] sm:$0xff]  ;;  %v8412_v21 = vld [vmem:[#allocation15_spill] sm:$0xff] }
 0x101   : > { %v4724_v35 = vpop.xlane.xlu2 %521  ;;  %v1071_v36 = vadd.f32 %v1070_v17, %v888_v20  ;;  %v652_v43 = vmul.f32 0.0051020407, %v8409_v27  ;;  %v892_v20 = vmul.f32 %v4741_v52, %v4741_v52  ;;  %v8410_v17 = vld [vmem:[#allocation14_spill] sm:$0xff]  ;;  %v4764_v13 = vsub.f32 %v8412_v21, %v653_v37  ;;  %v8416_v52 = vld [vmem:[#allocation17_spill] sm:$0xff] }
 0x102   : > { %v4729_v1 = vpop.xlane.xlu1 %517  ;;  %8402 = vst [vmem:[#allocation7_spill] sm:$0xff] %v4735_v3  ;;  %v896_v0 = vmul.f32 %v4735_v3, %v4735_v3  ;;  %v4761_v44 = vsub.f32 %v8410_v17, %v654_v55  ;;  %v4777_v54 = vsub.f32 %v8416_v52, %v654_v55  ;;  %v8418_v17 = vld [vmem:[#allocation18_spill] sm:$0xff]  ;;  %v655_v52 = vmul.f32 0.0051020407, %v8424_v53  ;;  %v8425_v55 = vld [vmem:[#allocation20_spill] sm:$0xff] }
 0x103   : > { %v4731_v50 = vpop.xlane.xlu0 %513  ;;  %8413 = vst [vmem:[#allocation10_spill] sm:$0xff] %v4764_v13  ;;  %v4780_v26 = vsub.f32 %v8418_v17, %v653_v37  ;;  %v8420_v21 = vld [vmem:[#allocation38_spill] sm:$0xff] }
 0x104   : > { %8411 = vst [vmem:[#allocation9_spill] sm:$0xff] %v4761_v44  ;;  %v1087_v38 = vadd.f32 %v1086_v8, %v896_v0  ;;  %v657_v39 = vmul.f32 0.0051020407, %v8420_v21  ;;  %v903_v60 = vmul.f32 %v4761_v44, %v4761_v44  ;;  %v901_v0 = vmul.f32 %v4764_v13, %v4764_v13  ;;  %v8433_v13 = vld [vmem:[#allocation24_spill] sm:$0xff]  ;;  %v8435_v44 = vld [vmem:[#allocation25_spill] sm:$0xff] }
 0x105   : > { %8417 = vst [vmem:[#allocation12_spill] sm:$0xff] %v4777_v54 }
 0x106   : > { %1076 = vadd.xlane.f32.xlu2 %v1075_v61  ;;  %8419 = vst [vmem:[#allocation13_spill] sm:$0xff] %v4780_v26  ;;  %v4795_v8 = vsub.f32 %v8425_v55, %v657_v39  ;;  %v1094_v17 = vsel %vm330_vm0, %v901_v0, 0.0 }
 0x107   : > { %1072 = vadd.xlane.f32.xlu1 %v1071_v36  ;;  %v1078_v36 = vsel %vm330_vm0, %v893_v24, 0.0  ;;  %v4784_v24 = vsub.f32 %v8421_v9, %v652_v43  ;;  %v902_v9 = vmul.f32 %v4777_v54, %v4777_v54  ;;  %v660_v54 = vmul.f32 0.0051020407, %v4473_v28 }
 0x108   : > { %1068 = vadd.xlane.f32.xlu0 %v1067_v15  ;;  %v4770_v15 = vsub.f32 %v8414_v31, %v652_v43  ;;  %v1079_v3 = vadd.f32 %v1078_v36, %v892_v20  ;;  %v8423_v31 = vld [vmem:[#allocation39_spill] sm:$0xff]  ;;  %8426 = vst [vmem:[#allocation36_spill] sm:$0xff] %v4795_v8  ;;  %v900_v43 = vmul.f32 %v4780_v26, %v4780_v26 }
 0x109   : > { %v4766_v61 = vpop.xlane.xlu2 %533  ;;  %8422 = vst [vmem:[#allocation35_spill] sm:$0xff] %v4784_v24  ;;  %v656_v32 = vmul.f32 0.0051020407, %v8423_v31 }
 0x10a   : > { %8415 = vst [vmem:[#allocation11_spill] sm:$0xff] %v4770_v15  ;;  %v4772_v27 = vpop.xlane.xlu1 %529  ;;  %v899_v37 = vmul.f32 %v4770_v15, %v4770_v15  ;;  %v1095_v0 = vadd.f32 %v1094_v17, %v900_v43  ;;  %v8439_v43 = vld [vmem:[#allocation27_spill] sm:$0xff]  ;;  %v8441_v17 = vld [vmem:[#allocation28_spill] sm:$0xff] }
 0x10b   : > { %v4774_v41 = vpop.xlane.xlu0 %525  ;;  %v4802_v20 = vsub.f32 %v8427_v29, %v656_v32  ;;  %v8431_v29 = vld [vmem:[#allocation23_spill] sm:$0xff]  ;;  %v4822_v26 = vsub.f32 %v8433_v13, %v656_v32 }
 0x10c   : > { %v1090_v55 = vsel %vm330_vm0, %v899_v37, 0.0  ;;  %v4819_v15 = vsub.f32 %v8431_v29, %v657_v39  ;;  %v659_v39 = vmul.f32 0.0051020407, %v4478_v33  ;;  %v658_v29 = vmul.f32 0.0051020407, %v4480_v40 }
 0x10d   : > { %8428 = vst [vmem:[#allocation37_spill] sm:$0xff] %v4802_v20  ;;  %v907_v37 = vmul.f32 %v4802_v20, %v4802_v20  ;;  %v906_v28 = vmul.f32 %v4822_v26, %v4822_v26  ;;  %v3870_v20 = vld [vmem:[%s4009_s18 + $0x1c0] sm:$0xff] }
 0x10e   : > { %1088 = vadd.xlane.f32.xlu2 %v1087_v38  ;;  %v1098_v38 = vsel %vm330_vm0, %v903_v60, 0.0  ;;  %8432 = vst [vmem:[#allocation15_spill] sm:$0xff] %v4819_v15 }
 0x10f   : > { %1084 = vadd.xlane.f32.xlu1 %v1083_v30  ;;  %v898_v30 = vmul.f32 %v4784_v24, %v4784_v24  ;;  %8434 = vst [vmem:[#allocation16_spill] sm:$0xff] %v4822_v26  ;;  %v1099_v60 = vadd.f32 %v1098_v38, %v902_v9  ;;  %v909_v24 = vmul.f32 %v4795_v8, %v4795_v8  ;;  %v1106_v40 = vsel %vm330_vm0, %v907_v37, 0.0  ;;  %v3871_v26 = vld [vmem:[%s4009_s18 + $0x1b0] sm:$0xff] }
 0x110   : > { %1080 = vadd.xlane.f32.xlu0 %v1079_v3  ;;  %v8429_v3 = vld [vmem:[#allocation22_spill] sm:$0xff]  ;;  %v4850_v38 = vsub.f32 %v8439_v43, %v659_v39  ;;  %v663_v37 = vmul.f32 0.0051020407, %v4510_v58  ;;  %v1107_v43 = vadd.f32 %v1106_v40, %v906_v28  ;;  %v4869_v8 = vsub.f32 %v3871_v26, %v658_v29  ;;  %v3874_v40 = vld [vmem:[%s4009_s18 + $0x1e8] sm:$0xff] }
 0x111   : > { %v4804_v36 = vpop.xlane.xlu2 %545  ;;  %v4811_v21 = vsub.f32 %v8429_v3, %v655_v52  ;;  %v4827_v3 = vsub.f32 %v8435_v44, %v655_v52  ;;  %v1091_v16 = vadd.f32 %v1090_v55, %v898_v30  ;;  %v908_v44 = vmul.f32 %v4819_v15, %v4819_v15  ;;  %v8437_v52 = vld [vmem:[#allocation26_spill] sm:$0xff] }
 0x112   : > { %v4813_v31 = vpop.xlane.xlu1 %541  ;;  %v1110_v13 = vsel %vm330_vm0, %v909_v24, 0.0  ;;  %v4842_v9 = vsub.f32 %v8437_v52, %v660_v54  ;;  %8440 = vst [vmem:[#allocation38_spill] sm:$0xff] %v4850_v38  ;;  %v4853_v24 = vsub.f32 %v8441_v17, %v658_v29  ;;  %v8443_v52 = vld [vmem:[#allocation29_spill] sm:$0xff]  ;;  %v4866_v17 = vsub.f32 %v3870_v20, %v659_v39  ;;  %v3872_v20 = vld [vmem:[%s4009_s18 + $0x208] sm:$0xff] }
 0x113   : > { %8430 = vst [vmem:[#allocation14_spill] sm:$0xff] %v4811_v21  ;;  %v4815_v53 = vpop.xlane.xlu0 %537  ;;  %v905_v32 = vmul.f32 %v4811_v21, %v4811_v21  ;;  %v4861_v21 = vsub.f32 %v8443_v52, %v660_v54  ;;  %v661_v54 = vmul.f32 0.0051020407, %v4521_v34  ;;  %v913_v58 = vmul.f32 %v4850_v38, %v4850_v38  ;;  %v3873_v39 = vld [vmem:[%s4009_s18 + $0x1f8] sm:$0xff] }
 0x114   : > { %8436 = vst [vmem:[#allocation17_spill] sm:$0xff] %v4827_v3  ;;  %v4879_v26 = vsub.f32 %v3872_v20, %v663_v37  ;;  %v912_v28 = vmul.f32 %v4866_v17, %v4866_v17  ;;  %v3875_v20 = vld [vmem:[%s4009_s18 + $0x200] sm:$0xff]  ;;  %v666_v38 = vmul.f32 0.0051020407, %v4552_v12 }
 0x115   : > { %8438 = vst [vmem:[#allocation18_spill] sm:$0xff] %v4842_v9  ;;  %v914_v34 = vmul.f32 %v4861_v21, %v4861_v21  ;;  %v1118_v52 = vsel %vm330_vm0, %v913_v58, 0.0 }
 0x116   : > { %1100 = vadd.xlane.f32.xlu2 %v1099_v60  ;;  %8442 = vst [vmem:[#allocation19_spill] sm:$0xff] %v4853_v24  ;;  %v1102_v60 = vsel %vm330_vm0, %v905_v32, 0.0  ;;  %v915_v32 = vmul.f32 %v4842_v9, %v4842_v9  ;;  %v3877_v9 = vld [vmem:[%s4009_s18 + $0x1e0] sm:$0xff] }
 0x117   : > { %1096 = vadd.xlane.f32.xlu1 %v1095_v0  ;;  %v1111_v0 = vadd.f32 %v1110_v13, %v908_v44  ;;  %8444 = vst [vmem:[#allocation39_spill] sm:$0xff] %v4861_v21  ;;  %v4914_v58 = vsub.f32 %v3877_v9, %v661_v54 }
 0x118   : > { %1092 = vadd.xlane.f32.xlu0 %v1091_v16  ;;  %v904_v16 = vmul.f32 %v4827_v3, %v4827_v3  ;;  %v662_v3 = vmul.f32 0.0051020407, %v4519_v22  ;;  %8445 = vst [vmem:[#allocation40_spill] sm:$0xff] %v4866_v17  ;;  %v911_v22 = vmul.f32 %v4853_v24, %v4853_v24  ;;  %v1122_v13 = vsel %vm330_vm0, %v915_v32, 0.0 }
 0x119   : > { %v4844_v33 = vpop.xlane.xlu2 %557  ;;  %8446 = vst [vmem:[#allocation20_spill] sm:$0xff] %v4869_v8  ;;  %v4903_v32 = vsub.f32 %v3875_v20, %v663_v37  ;;  %v665_v37 = vmul.f32 0.0051020407, %v4561_v19 }
 0x11a   : > { %v4855_v30 = vpop.xlane.xlu1 %553  ;;  %v1103_v15 = vadd.f32 %v1102_v60, %v904_v16  ;;  %8447 = vst [vmem:[#allocation21_spill] sm:$0xff] %v4879_v26  ;;  %v4882_v29 = vsub.f32 %v3873_v39, %v662_v3  ;;  %v4894_v16 = vsub.f32 %v3874_v40, %v661_v54  ;;  %v3876_v39 = vld [vmem:[%s4009_s18 + $0x1f0] sm:$0xff]  ;;  %v921_v40 = vmul.f32 %v4879_v26, %v4879_v26  ;;  %v3878_v54 = vld [vmem:[%s4009_s18 + $0x238] sm:$0xff] }
 0x11b   : > { %v4857_v55 = vpop.xlane.xlu0 %549  ;;  %8450 = vst [vmem:[#allocation24_spill] sm:$0xff] %v4903_v32  ;;  %v4906_v24 = vsub.f32 %v3876_v39, %v662_v3  ;;  %v664_v3 = vmul.f32 0.0051020407, %v4563_v18  ;;  %v4925_v19 = vsub.f32 %v3878_v54, %v666_v38  ;;  %v3881_v54 = vld [vmem:[%s4009_s18 + $0x230] sm:$0xff] }
 0x11c   : > { %8448 = vst [vmem:[#allocation22_spill] sm:$0xff] %v4882_v29  ;;  %v919_v17 = vmul.f32 %v4882_v29, %v4882_v29  ;;  %v917_v12 = vmul.f32 %v4894_v16, %v4894_v16  ;;  %v3882_v29 = vld [vmem:[%s4009_s18 + $0x220] sm:$0xff] }
 0x11d   : > { %8449 = vst [vmem:[#allocation23_spill] sm:$0xff] %v4894_v16  ;;  %v918_v9 = vmul.f32 %v4906_v24, %v4906_v24  ;;  %v927_v26 = vmul.f32 %v4925_v19, %v4925_v19 }
 0x11e   : > { %1112 = vadd.xlane.f32.xlu2 %v1111_v0  ;;  %8451 = vst [vmem:[#allocation25_spill] sm:$0xff] %v4906_v24  ;;  %v1130_v18 = vsel %vm330_vm0, %v919_v17, 0.0  ;;  %v4945_v17 = vsub.f32 %v3881_v54, %v666_v38  ;;  %v4948_v24 = vsub.f32 %v3882_v29, %v665_v37  ;;  %v667_v38 = vmul.f32 0.0051020407, %v4605_v2 }
 0x11f   : > { %1108 = vadd.xlane.f32.xlu1 %v1107_v43  ;;  %v1114_v43 = vsel %vm330_vm0, %v911_v22, 0.0  ;;  %8452 = vst [vmem:[#allocation26_spill] sm:$0xff] %v4914_v58  ;;  %v1119_v22 = vadd.f32 %v1118_v52, %v912_v28  ;;  %v916_v52 = vmul.f32 %v4914_v58, %v4914_v58  ;;  %v1131_v16 = vadd.f32 %v1130_v18, %v918_v9  ;;  %v3886_v18 = vld [vmem:[%s4009_s18 + $0x248] sm:$0xff] }
 0x120   : > { %1104 = vadd.xlane.f32.xlu0 %v1103_v15  ;;  %v910_v15 = vmul.f32 %v4869_v8, %v4869_v8  ;;  %v1123_v8 = vadd.f32 %v1122_v13, %v914_v34  ;;  %v920_v34 = vmul.f32 %v4903_v32, %v4903_v32  ;;  %8453 = vst [vmem:[#allocation27_spill] sm:$0xff] %v4925_v19  ;;  %v1134_v13 = vsel %vm330_vm0, %v921_v40, 0.0  ;;  %v3883_v32 = vld [vmem:[%s4009_s18 + $0x210] sm:$0xff] }
 0x121   : > { %v4886_v44 = vpop.xlane.xlu2 %569  ;;  %v1126_v40 = vsel %vm330_vm0, %v917_v12, 0.0  ;;  %8456 = vst [vmem:[#allocation71_spill] sm:$0xff] %v4945_v17  ;;  %v669_v58 = vmul.f32 0.0051020407, %v4592_v45  ;;  %v4955_v12 = vsub.f32 %v3883_v32, %v664_v3  ;;  %v926_v45 = vmul.f32 %v4945_v17, %v4945_v17 }
 0x122   : > { %v4896_v60 = vpop.xlane.xlu1 %565  ;;  %v1115_v20 = vadd.f32 %v1114_v43, %v910_v15  ;;  %v3880_v43 = vld [vmem:[%s4009_s18 + $0x218] sm:$0xff]  ;;  %8457 = vst [vmem:[#allocation72_spill] sm:$0xff] %v4948_v24 }
 0x123   : > { %v4898_v0 = vpop.xlane.xlu0 %561  ;;  %v4937_v39 = vsub.f32 %v3880_v43, %v664_v3  ;;  %v668_v43 = vmul.f32 0.0051020407, %v4603_v57  ;;  %8458 = vst [vmem:[#allocation73_spill] sm:$0xff] %v4955_v12  ;;  %v3884_v57 = vld [vmem:[%s4009_s18 + $0x268] sm:$0xff]  ;;  %v1146_v3 = vsel %vm330_vm0, %v927_v26, 0.0  ;;  %v922_v54 = vmul.f32 %v4955_v12, %v4955_v12  ;;  %v3887_v26 = vld [vmem:[%s4009_s18 + $0x260] sm:$0xff] }
 0x124   : > { %v4965_v32 = vsub.f32 %v3884_v57, %v669_v58 }
 0x125   : > { %8455 = vst [vmem:[#allocation29_spill] sm:$0xff] %v4937_v39  ;;  %v923_v29 = vmul.f32 %v4937_v39, %v4937_v39  ;;  %v3888_v39 = vld [vmem:[%s4009_s18 + $0x250] sm:$0xff] }
 0x126   : > { %1124 = vadd.xlane.f32.xlu2 %v1123_v8  ;;  %v3879_v8 = vld [vmem:[%s4009_s18 + $0x228] sm:$0xff]  ;;  %8459 = vst [vmem:[#allocation74_spill] sm:$0xff] %v4965_v32  ;;  %v933_v12 = vmul.f32 %v4965_v32, %v4965_v32 }
 0x127   : > { %1120 = vadd.xlane.f32.xlu1 %v1119_v22  ;;  %v4930_v28 = vsub.f32 %v3879_v8, %v665_v37  ;;  %v1135_v8 = vadd.f32 %v1134_v13, %v920_v34  ;;  %v1127_v34 = vadd.f32 %v1126_v40, %v916_v52  ;;  %v3885_v37 = vld [vmem:[%s4009_s18 + $0x258] sm:$0xff]  ;;  %v924_v13 = vmul.f32 %v4948_v24, %v4948_v24  ;;  %v3889_v24 = vld [vmem:[%s4009_s18 + $0x240] sm:$0xff] }
 0x128   : > { %1116 = vadd.xlane.f32.xlu0 %v1115_v20  ;;  %v4968_v2 = vsub.f32 %v3885_v37, %v668_v43  ;;  %v1138_v57 = vsel %vm330_vm0, %v923_v29, 0.0  ;;  %v4987_v37 = vsub.f32 %v3887_v26, %v669_v58  ;;  %v4993_v19 = vsub.f32 %v3889_v24, %v667_v38 }
 0x129   : > { %8454 = vst [vmem:[#allocation28_spill] sm:$0xff] %v4930_v28  ;;  %v4932_v15 = vpop.xlane.xlu2 %581  ;;  %v925_v9 = vmul.f32 %v4930_v28, %v4930_v28  ;;  %v4990_v28 = vsub.f32 %v3888_v39, %v668_v43  ;;  %v672_v29 = vmul.f32 0.0051020407, %v4634_v42  ;;  %v671_v58 = vmul.f32 0.0051020407, %v4644_v48 }
 0x12a   : > { %v4939_v22 = vpop.xlane.xlu1 %577  ;;  %8460 = vst [vmem:[#allocation75_spill] sm:$0xff] %v4968_v2  ;;  %v931_v17 = vmul.f32 %v4968_v2, %v4968_v2  ;;  %v1139_v26 = vadd.f32 %v1138_v57, %v922_v54  ;;  %v670_v24 = vmul.f32 0.0051020407, %v4646_v49  ;;  %v932_v43 = vmul.f32 %v4987_v37, %v4987_v37 }
 0x12b   : > { %v4941_v20 = vpop.xlane.xlu0 %573  ;;  %v1142_v40 = vsel %vm330_vm0, %v925_v9, 0.0  ;;  %8462 = vst [vmem:[#allocation77_spill] sm:$0xff] %v4987_v37  ;;  %v1158_v42 = vsel %vm330_vm0, %v933_v12, 0.0  ;;  %v674_v37 = vmul.f32 0.0051020407, %v4687_v23 }
 0x12c   : > { %8463 = vst [vmem:[#allocation78_spill] sm:$0xff] %v4990_v28  ;;  %v1143_v9 = vadd.f32 %v1142_v40, %v924_v13  ;;  %v1154_v48 = vsel %vm330_vm0, %v931_v17, 0.0  ;;  %v3891_v13 = vld [vmem:[%s4009_s18 + $0x288] sm:$0xff] }
 0x12d   : > { %8464 = vst [vmem:[#allocation79_spill] sm:$0xff] %v4993_v19  ;;  %v5016_v40 = vsub.f32 %v3891_v13, %v671_v58  ;;  %v3895_v13 = vld [vmem:[%s4009_s18 + $0x270] sm:$0xff] }
 0x12e   : > { %1136 = vadd.xlane.f32.xlu2 %v1135_v8  ;;  %v5035_v32 = vsub.f32 %v3895_v13, %v670_v24 }
 0x12f   : > { %1132 = vadd.xlane.f32.xlu1 %v1131_v16  ;;  %v4974_v16 = vsub.f32 %v3886_v18, %v667_v38  ;;  %v1147_v18 = vadd.f32 %v1146_v3, %v926_v45  ;;  %v930_v38 = vmul.f32 %v4990_v28, %v4990_v28  ;;  %v928_v45 = vmul.f32 %v4993_v19, %v4993_v19  ;;  %v3890_v3 = vld [vmem:[%s4009_s18 + $0x298] sm:$0xff]  ;;  %v3893_v19 = vld [vmem:[%s4009_s18 + $0x290] sm:$0xff] }
 0x130   : > { %1128 = vadd.xlane.f32.xlu0 %v1127_v34  ;;  %v5013_v49 = vsub.f32 %v3890_v3, %v672_v29  ;;  %8466 = vst [vmem:[#allocation81_spill] sm:$0xff] %v5016_v40  ;;  %v5029_v2 = vsub.f32 %v3893_v19, %v672_v29  ;;  %v3894_v3 = vld [vmem:[%s4009_s18 + $0x280] sm:$0xff]  ;;  %v937_v19 = vmul.f32 %v5016_v40, %v5016_v40 }
 0x131   : > { %8461 = vst [vmem:[#allocation76_spill] sm:$0xff] %v4974_v16  ;;  %v4976_v52 = vpop.xlane.xlu2 %593  ;;  %v929_v39 = vmul.f32 %v4974_v16, %v4974_v16  ;;  %v1155_v16 = vadd.f32 %v1154_v48, %v930_v38  ;;  %v5032_v28 = vsub.f32 %v3894_v3, %v671_v58  ;;  %v673_v58 = vmul.f32 0.0051020407, %v4689_v51  ;;  %v3896_v38 = vld [vmem:[%s4009_s18 + $0x2c8] sm:$0xff]  ;;  %v3897_v48 = vld [vmem:[%s4009_s18 + $0x2b8] sm:$0xff] }
 0x132   : > { %v4981_v8 = vpop.xlane.xlu1 %589  ;;  %8465 = vst [vmem:[#allocation80_spill] sm:$0xff] %v5013_v49 }
 0x133   : > { %v4983_v34 = vpop.xlane.xlu0 %585  ;;  %v1150_v57 = vsel %vm330_vm0, %v929_v39, 0.0  ;;  %8468 = vst [vmem:[#allocation83_spill] sm:$0xff] %v5029_v2  ;;  %v936_v23 = vmul.f32 %v5032_v28, %v5032_v28 }
 0x134   : > { %8469 = vst [vmem:[#allocation84_spill] sm:$0xff] %v5032_v28  ;;  %v1151_v39 = vadd.f32 %v1150_v57, %v928_v45  ;;  %v5056_v45 = vsub.f32 %v3897_v48, %v674_v37  ;;  %v1166_v57 = vsel %vm330_vm0, %v937_v19, 0.0  ;;  %v3900_v48 = vld [vmem:[%s4009_s18 + $0x2b0] sm:$0xff]  ;;  %v678_v19 = vmul.f32 0.0051020407, %v4724_v35 }
 0x135   : > { %8470 = vst [vmem:[#allocation85_spill] sm:$0xff] %v5035_v32  ;;  %v5074_v40 = vsub.f32 %v3900_v48, %v674_v37  ;;  %v676_v37 = vmul.f32 0.0051020407, %v4731_v50  ;;  %v3904_v48 = vld [vmem:[%s4009_s18 + $0x2d8] sm:$0xff] }
 0x136   : > { %1148 = vadd.xlane.f32.xlu2 %v1147_v18  ;;  %v3892_v18 = vld [vmem:[%s4009_s18 + $0x278] sm:$0xff]  ;;  %8472 = vst [vmem:[#allocation87_spill] sm:$0xff] %v5056_v45 }
 0x137   : > { %1144 = vadd.xlane.f32.xlu1 %v1143_v9  ;;  %v5022_v9 = vsub.f32 %v3892_v18, %v670_v24  ;;  %v675_v18 = vmul.f32 0.0051020407, %v4680_v63  ;;  %v938_v63 = vmul.f32 %v5029_v2, %v5029_v2  ;;  %v934_v24 = vmul.f32 %v5035_v32, %v5035_v32  ;;  %8475 = vst [vmem:[#allocation90_spill] sm:$0xff] %v5074_v40 }
 0x138   : > { %1140 = vadd.xlane.f32.xlu0 %v1139_v26  ;;  %v1159_v26 = vadd.f32 %v1158_v42, %v932_v43  ;;  %v939_v43 = vmul.f32 %v5013_v49, %v5013_v49 }
 0x139   : > { %v5018_v54 = vpop.xlane.xlu2 %605  ;;  %8467 = vst [vmem:[#allocation82_spill] sm:$0xff] %v5022_v9  ;;  %v935_v29 = vmul.f32 %v5022_v9, %v5022_v9  ;;  %v5053_v42 = vsub.f32 %v3896_v38, %v675_v18  ;;  %v3899_v38 = vld [vmem:[%s4009_s18 + $0x2c0] sm:$0xff] }
 0x13a   : > { %v5024_v12 = vpop.xlane.xlu1 %601  ;;  %v5071_v32 = vsub.f32 %v3899_v38, %v675_v18  ;;  %v677_v18 = vmul.f32 0.0051020407, %v4729_v1 }
 0x13b   : > { %v5026_v17 = vpop.xlane.xlu0 %597  ;;  %8471 = vst [vmem:[#allocation86_spill] sm:$0xff] %v5053_v42  ;;  %v1162_v13 = vsel %vm330_vm0, %v935_v29, 0.0  ;;  %v945_v2 = vmul.f32 %v5053_v42, %v5053_v42  ;;  %v943_v29 = vmul.f32 %v5056_v45, %v5056_v45  ;;  %v680_v42 = vmul.f32 0.0051020407, %v4772_v27 }
 0x13c   : > { %8474 = vst [vmem:[#allocation89_spill] sm:$0xff] %v5071_v32  ;;  %v1163_v49 = vadd.f32 %v1162_v13, %v934_v24 }
 0x13d   : > { %v1182_v50 = vsel %vm330_vm0, %v945_v2, 0.0 }
 0x13e   : > { %1160 = vadd.xlane.f32.xlu2 %v1159_v26 }
 0x13f   : > { %1156 = vadd.xlane.f32.xlu1 %v1155_v16  ;;  %v1170_v16 = vsel %vm330_vm0, %v939_v43, 0.0  ;;  %v1167_v43 = vadd.f32 %v1166_v57, %v936_v23  ;;  %v942_v23 = vmul.f32 %v5074_v40, %v5074_v40  ;;  %v681_v40 = vmul.f32 0.0051020407, %v4766_v61 }
 0x140   : > { %1152 = vadd.xlane.f32.xlu0 %v1151_v39  ;;  %v3898_v39 = vld [vmem:[%s4009_s18 + $0x2a8] sm:$0xff]  ;;  %v1171_v28 = vadd.f32 %v1170_v16, %v938_v63  ;;  %v944_v63 = vmul.f32 %v5071_v32, %v5071_v32 }
 0x141   : > { %v5058_v51 = vpop.xlane.xlu2 %617  ;;  %v5068_v9 = vsub.f32 %v3898_v39, %v673_v58  ;;  %v3901_v39 = vld [vmem:[%s4009_s18 + $0x2a0] sm:$0xff] }
 0x142   : > { %v5062_v26 = vpop.xlane.xlu1 %613  ;;  %v5082_v21 = vsub.f32 %v3901_v39, %v673_v58  ;;  %v3902_v58 = vld [vmem:[%s4009_s18 + $0x2f8] sm:$0xff] }
 0x143   : > { %v5064_v3 = vpop.xlane.xlu0 %609  ;;  %8473 = vst [vmem:[#allocation88_spill] sm:$0xff] %v5068_v9  ;;  %v941_v35 = vmul.f32 %v5068_v9, %v5068_v9  ;;  %v5093_v24 = vsub.f32 %v3902_v58, %v678_v19  ;;  %v3905_v58 = vld [vmem:[%s4009_s18 + $0x2f0] sm:$0xff] }
 0x144   : > { %8476 = vst [vmem:[#allocation91_spill] sm:$0xff] %v5082_v21  ;;  %v940_v38 = vmul.f32 %v5082_v21, %v5082_v21  ;;  %v5113_v2 = vsub.f32 %v3905_v58, %v678_v19  ;;  %v3907_v21 = vld [vmem:[%s4009_s18 + $0x2d0] sm:$0xff] }
 0x145   : > { %8477 = vst [vmem:[#allocation92_spill] sm:$0xff] %v5093_v24  ;;  %v1174_v39 = vsel %vm330_vm0, %v941_v35, 0.0  ;;  %v5123_v32 = vsub.f32 %v3907_v21, %v676_v37 }
 0x146   : > { %1172 = vadd.xlane.f32.xlu2 %v1171_v28  ;;  %v1178_v28 = vsel %vm330_vm0, %v943_v29, 0.0  ;;  %8480 = vst [vmem:[#allocation95_spill] sm:$0xff] %v5113_v2  ;;  %v1183_v29 = vadd.f32 %v1182_v50, %v944_v63  ;;  %v1175_v19 = vadd.f32 %v1174_v39, %v940_v38  ;;  %v679_v63 = vmul.f32 0.0051020407, %v4774_v41 }
 0x147   : > { %1168 = vadd.xlane.f32.xlu1 %v1167_v43  ;;  %v5109_v43 = vsub.f32 %v3904_v48, %v676_v37  ;;  %v1179_v9 = vadd.f32 %v1178_v28, %v942_v23  ;;  %v951_v48 = vmul.f32 %v5093_v24, %v5093_v24  ;;  %8482 = vst [vmem:[#allocation97_spill] sm:$0xff] %v5123_v32  ;;  %v3909_v37 = vld [vmem:[%s4009_s18 + $0x318] sm:$0xff] }
 0x148   : > { %1164 = vadd.xlane.f32.xlu0 %v1163_v49  ;;  %v3903_v49 = vld [vmem:[%s4009_s18 + $0x2e8] sm:$0xff]  ;;  %v950_v27 = vmul.f32 %v5113_v2, %v5113_v2  ;;  %v5136_v23 = vsub.f32 %v3909_v37, %v680_v42  ;;  %v946_v58 = vmul.f32 %v5123_v32, %v5123_v32  ;;  %v3912_v37 = vld [vmem:[%s4009_s18 + $0x310] sm:$0xff]  ;;  %v3913_v32 = vld [vmem:[%s4009_s18 + $0x300] sm:$0xff] }
 0x149   : > { %v5095_v1 = vpop.xlane.xlu2 %629  ;;  %v5100_v16 = vsub.f32 %v3903_v49, %v677_v18  ;;  %8479 = vst [vmem:[#allocation94_spill] sm:$0xff] %v5109_v43  ;;  %v3906_v49 = vld [vmem:[%s4009_s18 + $0x2e0] sm:$0xff]  ;;  %v947_v61 = vmul.f32 %v5109_v43, %v5109_v43  ;;  %v1194_v41 = vsel %vm330_vm0, %v951_v48, 0.0  ;;  %v5158_v43 = vsub.f32 %v3912_v37, %v680_v42  ;;  %v3916_v37 = vld [vmem:[%s4009_s18 + $0x338] sm:$0xff] }
 0x14a   : > { %v5102_v57 = vpop.xlane.xlu1 %625  ;;  %v5116_v45 = vsub.f32 %v3906_v49, %v677_v18  ;;  %v3908_v18 = vld [vmem:[%s4009_s18 + $0x328] sm:$0xff]  ;;  %8484 = vst [vmem:[#allocation99_spill] sm:$0xff] %v5136_v23 }
 0x14b   : > { %8478 = vst [vmem:[#allocation93_spill] sm:$0xff] %v5100_v16  ;;  %v5104_v13 = vpop.xlane.xlu0 %621  ;;  %v949_v35 = vmul.f32 %v5100_v16, %v5100_v16  ;;  %v5133_v21 = vsub.f32 %v3908_v18, %v681_v40  ;;  %v3911_v18 = vld [vmem:[%s4009_s18 + $0x320] sm:$0xff]  ;;  %v1195_v16 = vadd.f32 %v1194_v41, %v950_v27  ;;  %v682_v27 = vmul.f32 0.0051020407, %v4815_v53 }
 0x14c   : > { %8481 = vst [vmem:[#allocation96_spill] sm:$0xff] %v5116_v45  ;;  %v5155_v48 = vsub.f32 %v3911_v18, %v681_v40  ;;  %v683_v40 = vmul.f32 0.0051020407, %v4813_v31 }
 0x14d   : > { %8483 = vst [vmem:[#allocation98_spill] sm:$0xff] %v5133_v21  ;;  %v1190_v39 = vsel %vm330_vm0, %v949_v35, 0.0  ;;  %v957_v35 = vmul.f32 %v5133_v21, %v5133_v21  ;;  %v687_v21 = vmul.f32 0.0051020407, %v4844_v33 }
 0x14e   : > { %1184 = vadd.xlane.f32.xlu2 %v1183_v29  ;;  %v3910_v29 = vld [vmem:[%s4009_s18 + $0x308] sm:$0xff]  ;;  %8486 = vst [vmem:[#allocation101_spill] sm:$0xff] %v5155_v48  ;;  %v956_v41 = vmul.f32 %v5155_v48, %v5155_v48  ;;  %v686_v48 = vmul.f32 0.0051020407, %v4855_v30 }
 0x14f   : > { %1180 = vadd.xlane.f32.xlu1 %v1179_v9  ;;  %v948_v9 = vmul.f32 %v5116_v45, %v5116_v45  ;;  %v5151_v49 = vsub.f32 %v3910_v29, %v679_v63  ;;  %8487 = vst [vmem:[#allocation102_spill] sm:$0xff] %v5158_v43  ;;  %v684_v45 = vmul.f32 0.0051020407, %v4804_v36  ;;  %v955_v29 = vmul.f32 %v5136_v23, %v5136_v23 }
 0x150   : > { %1176 = vadd.xlane.f32.xlu0 %v1175_v19  ;;  %v1186_v19 = vsel %vm330_vm0, %v947_v61, 0.0  ;;  %v5166_v61 = vsub.f32 %v3913_v32, %v679_v63  ;;  %v954_v32 = vmul.f32 %v5158_v43, %v5158_v43  ;;  %v3914_v63 = vld [vmem:[%s4009_s18 + $0x358] sm:$0xff]  ;;  %v1206_v53 = vsel %vm330_vm0, %v957_v35, 0.0 }
 0x151   : > { %v5138_v50 = vpop.xlane.xlu2 %1016  ;;  %8485 = vst [vmem:[#allocation100_spill] sm:$0xff] %v5151_v49  ;;  %v1191_v24 = vadd.f32 %v1190_v39, %v948_v9  ;;  %v1187_v42 = vadd.f32 %v1186_v19, %v946_v58  ;;  %v953_v36 = vmul.f32 %v5151_v49, %v5151_v49  ;;  %v5177_v9 = vsub.f32 %v3914_v63, %v684_v45  ;;  %v3917_v49 = vld [vmem:[%s4009_s18 + $0x350] sm:$0xff] }
 0x152   : > { %v5143_v28 = vpop.xlane.xlu1 %1012  ;;  %8488 = vst [vmem:[#allocation103_spill] sm:$0xff] %v5166_v61  ;;  %v952_v18 = vmul.f32 %v5166_v61, %v5166_v61  ;;  %v5197_v35 = vsub.f32 %v3917_v49, %v684_v45  ;;  %v3919_v61 = vld [vmem:[%s4009_s18 + $0x330] sm:$0xff] }
 0x153   : > { %v5145_v38 = vpop.xlane.xlu0 %1008  ;;  %8489 = vst [vmem:[#allocation104_spill] sm:$0xff] %v5177_v9  ;;  %v1198_v63 = vsel %vm330_vm0, %v953_v36, 0.0  ;;  %v5207_v2 = vsub.f32 %v3919_v61, %v682_v27  ;;  %v685_v36 = vmul.f32 0.0051020407, %v4857_v55 }
 0x154   : > { %8492 = vst [vmem:[#allocation107_spill] sm:$0xff] %v5197_v35  ;;  %v1199_v45 = vadd.f32 %v1198_v63, %v952_v18  ;;  %v962_v30 = vmul.f32 %v5197_v35, %v5197_v35 }
 0x155   : > { %8494 = vst [vmem:[#allocation109_spill] sm:$0xff] %v5207_v2  ;;  %v958_v63 = vmul.f32 %v5207_v2, %v5207_v2  ;;  %v3925_v2 = vld [vmem:[%s4009_s18 + $0x360] sm:$0xff] }
 0x156   : > { %1196 = vadd.xlane.f32.xlu2 %v1195_v16  ;;  %v3915_v16 = vld [vmem:[%s4009_s18 + $0x348] sm:$0xff] }
 0x157   : > { %1192 = vadd.xlane.f32.xlu1 %v1191_v24  ;;  %v1202_v24 = vsel %vm330_vm0, %v955_v29, 0.0  ;;  %v5184_v39 = vsub.f32 %v3915_v16, %v683_v40  ;;  %v1207_v29 = vadd.f32 %v1206_v53, %v956_v41  ;;  %v3918_v16 = vld [vmem:[%s4009_s18 + $0x340] sm:$0xff] }
 0x158   : > { %1188 = vadd.xlane.f32.xlu0 %v1187_v42  ;;  %v5193_v42 = vsub.f32 %v3916_v37, %v682_v27  ;;  %v1203_v23 = vadd.f32 %v1202_v24, %v954_v32  ;;  %v5200_v43 = vsub.f32 %v3918_v16, %v683_v40  ;;  %v963_v37 = vmul.f32 %v5177_v9, %v5177_v9  ;;  %v3920_v40 = vld [vmem:[%s4009_s18 + $0x388] sm:$0xff]  ;;  %v3921_v27 = vld [vmem:[%s4009_s18 + $0x378] sm:$0xff] }
 0x159   : > { %v5179_v31 = vpop.xlane.xlu2 %1028  ;;  %8490 = vst [vmem:[#allocation105_spill] sm:$0xff] %v5184_v39  ;;  %v961_v49 = vmul.f32 %v5184_v39, %v5184_v39  ;;  %v5217_v61 = vsub.f32 %v3920_v40, %v687_v21  ;;  %v5220_v41 = vsub.f32 %v3921_v27, %v686_v48  ;;  %v3923_v40 = vld [vmem:[%s4009_s18 + $0x380] sm:$0xff]  ;;  %v3924_v27 = vld [vmem:[%s4009_s18 + $0x370] sm:$0xff] }
 0x15a   : > { %v5186_v58 = vpop.xlane.xlu1 %1024  ;;  %8491 = vst [vmem:[#allocation106_spill] sm:$0xff] %v5193_v42  ;;  %v959_v33 = vmul.f32 %v5193_v42, %v5193_v42  ;;  %v1218_v55 = vsel %vm330_vm0, %v963_v37, 0.0  ;;  %v5239_v37 = vsub.f32 %v3923_v40, %v687_v21  ;;  %v5242_v42 = vsub.f32 %v3924_v27, %v686_v48  ;;  %v3928_v27 = vld [vmem:[%s4009_s18 + $0x398] sm:$0xff] }
 0x15b   : > { %v5188_v19 = vpop.xlane.xlu0 %1020  ;;  %8493 = vst [vmem:[#allocation108_spill] sm:$0xff] %v5200_v43  ;;  %v1214_v18 = vsel %vm330_vm0, %v961_v49, 0.0  ;;  %v1219_v39 = vadd.f32 %v1218_v55, %v962_v30  ;;  %v969_v49 = vmul.f32 %v5217_v61, %v5217_v61  ;;  %v689_v21 = vmul.f32 0.0051020407, %v4896_v60 }
 0x15c   : > { %8495 = vst [vmem:[#allocation110_spill] sm:$0xff] %v5217_v61  ;;  %v688_v30 = vmul.f32 0.0051020407, %v4898_v0  ;;  %v968_v55 = vmul.f32 %v5239_v37, %v5239_v37  ;;  %v693_v61 = vmul.f32 0.0051020407, %v4932_v15 }
 0x15d   : > { %8496 = vst [vmem:[#allocation111_spill] sm:$0xff] %v5220_v41  ;;  %v1230_v0 = vsel %vm330_vm0, %v969_v49, 0.0 }
 0x15e   : > { %1208 = vadd.xlane.f32.xlu2 %v1207_v29  ;;  %v3922_v29 = vld [vmem:[%s4009_s18 + $0x368] sm:$0xff]  ;;  %8498 = vst [vmem:[#allocation113_spill] sm:$0xff] %v5239_v37  ;;  %v692_v37 = vmul.f32 0.0051020407, %v4939_v22 }
 0x15f   : > { %1204 = vadd.xlane.f32.xlu1 %v1203_v23  ;;  %v960_v23 = vmul.f32 %v5200_v43, %v5200_v43  ;;  %v5235_v16 = vsub.f32 %v3922_v29, %v685_v36  ;;  %8499 = vst [vmem:[#allocation114_spill] sm:$0xff] %v5242_v42  ;;  %v690_v43 = vmul.f32 0.0051020407, %v4886_v44  ;;  %v967_v29 = vmul.f32 %v5220_v41, %v5220_v41 }
 0x160   : > { %1200 = vadd.xlane.f32.xlu0 %v1199_v45  ;;  %v1210_v45 = vsel %vm330_vm0, %v959_v33, 0.0  ;;  %v5250_v33 = vsub.f32 %v3925_v2, %v685_v36  ;;  %v966_v2 = vmul.f32 %v5242_v42, %v5242_v42  ;;  %v3926_v36 = vld [vmem:[%s4009_s18 + $0x3b8] sm:$0xff] }
 0x161   : > { %v5222_v32 = vpop.xlane.xlu2 %1040  ;;  %8497 = vst [vmem:[#allocation112_spill] sm:$0xff] %v5235_v16  ;;  %v1215_v9 = vadd.f32 %v1214_v18, %v960_v23  ;;  %v1211_v48 = vadd.f32 %v1210_v45, %v958_v63  ;;  %v965_v44 = vmul.f32 %v5235_v16, %v5235_v16  ;;  %v5261_v23 = vsub.f32 %v3926_v36, %v690_v43  ;;  %v3929_v16 = vld [vmem:[%s4009_s18 + $0x3b0] sm:$0xff] }
 0x162   : > { %v5227_v53 = vpop.xlane.xlu1 %1036  ;;  %8500 = vst [vmem:[#allocation115_spill] sm:$0xff] %v5250_v33  ;;  %v964_v40 = vmul.f32 %v5250_v33, %v5250_v33  ;;  %v5281_v49 = vsub.f32 %v3929_v16, %v690_v43  ;;  %v3931_v33 = vld [vmem:[%s4009_s18 + $0x390] sm:$0xff] }
 0x163   : > { %v5229_v24 = vpop.xlane.xlu0 %1032  ;;  %8501 = vst [vmem:[#allocation116_spill] sm:$0xff] %v5261_v23  ;;  %v1222_v36 = vsel %vm330_vm0, %v965_v44, 0.0  ;;  %v5291_v35 = vsub.f32 %v3931_v33, %v688_v30  ;;  %v691_v44 = vmul.f32 0.0051020407, %v4941_v20 }
 0x164   : > { %8504 = vst [vmem:[#allocation119_spill] sm:$0xff] %v5281_v49  ;;  %v1223_v43 = vadd.f32 %v1222_v36, %v964_v40  ;;  %v974_v22 = vmul.f32 %v5281_v49, %v5281_v49 }
 0x165   : > { %8506 = vst [vmem:[#allocation121_spill] sm:$0xff] %v5291_v35  ;;  %v970_v36 = vmul.f32 %v5291_v35, %v5291_v35  ;;  %v3937_v35 = vld [vmem:[%s4009_s18 + $0x3c0] sm:$0xff] }
 0x166   : > { %1220 = vadd.xlane.f32.xlu2 %v1219_v39  ;;  %v3927_v39 = vld [vmem:[%s4009_s18 + $0x3a8] sm:$0xff] }
 0x167   : > { %1216 = vadd.xlane.f32.xlu1 %v1215_v9  ;;  %v1226_v9 = vsel %vm330_vm0, %v967_v29, 0.0  ;;  %v5268_v18 = vsub.f32 %v3927_v39, %v689_v21  ;;  %v1231_v29 = vadd.f32 %v1230_v0, %v968_v55  ;;  %v3930_v39 = vld [vmem:[%s4009_s18 + $0x3a0] sm:$0xff] }
 0x168   : > { %1212 = vadd.xlane.f32.xlu0 %v1211_v48  ;;  %v5277_v48 = vsub.f32 %v3928_v27, %v688_v30  ;;  %v1227_v41 = vadd.f32 %v1226_v9, %v966_v2  ;;  %v5284_v42 = vsub.f32 %v3930_v39, %v689_v21  ;;  %v975_v27 = vmul.f32 %v5261_v23, %v5261_v23  ;;  %v3932_v21 = vld [vmem:[%s4009_s18 + $0x3e8] sm:$0xff]  ;;  %v3933_v30 = vld [vmem:[%s4009_s18 + $0x3d8] sm:$0xff] }
 0x169   : > { %v5263_v60 = vpop.xlane.xlu2 %1052  ;;  %8502 = vst [vmem:[#allocation117_spill] sm:$0xff] %v5268_v18  ;;  %v973_v16 = vmul.f32 %v5268_v18, %v5268_v18  ;;  %v5301_v33 = vsub.f32 %v3932_v21, %v693_v61  ;;  %v5304_v55 = vsub.f32 %v3933_v30, %v692_v37  ;;  %v3935_v21 = vld [vmem:[%s4009_s18 + $0x3e0] sm:$0xff]  ;;  %v3936_v30 = vld [vmem:[%s4009_s18 + $0x3d0] sm:$0xff] }
 0x16a   : > { %v5270_v63 = vpop.xlane.xlu1 %1048  ;;  %8503 = vst [vmem:[#allocation118_spill] sm:$0xff] %v5277_v48  ;;  %v971_v15 = vmul.f32 %v5277_v48, %v5277_v48  ;;  %v1242_v20 = vsel %vm330_vm0, %v975_v27, 0.0  ;;  %v5323_v27 = vsub.f32 %v3935_v21, %v693_v61  ;;  %v5326_v48 = vsub.f32 %v3936_v30, %v692_v37  ;;  %v3940_v30 = vld [vmem:[%s4009_s18 + $0x3f8] sm:$0xff] }
 0x16b   : > { %v5272_v45 = vpop.xlane.xlu0 %1044  ;;  %8505 = vst [vmem:[#allocation120_spill] sm:$0xff] %v5284_v42  ;;  %v1238_v40 = vsel %vm330_vm0, %v973_v16, 0.0  ;;  %v1243_v18 = vadd.f32 %v1242_v20, %v974_v22  ;;  %v981_v16 = vmul.f32 %v5301_v33, %v5301_v33  ;;  %v695_v61 = vmul.f32 0.0051020407, %v4981_v8 }
 0x16c   : > { %8507 = vst [vmem:[#allocation122_spill] sm:$0xff] %v5301_v33  ;;  %v694_v22 = vmul.f32 0.0051020407, %v4983_v34  ;;  %v980_v20 = vmul.f32 %v5323_v27, %v5323_v27  ;;  %v699_v33 = vmul.f32 0.0051020407, %v5018_v54 }
 0x16d   : > { %8508 = vst [vmem:[#allocation123_spill] sm:$0xff] %v5304_v55  ;;  %v1254_v34 = vsel %vm330_vm0, %v981_v16, 0.0  ;;  %v1317_v46 = vmul.f32 0.0051020407, %v5263_v60 }
 0x16e   : > { %1232 = vadd.xlane.f32.xlu2 %v1231_v29  ;;  %v3934_v29 = vld [vmem:[%s4009_s18 + $0x3c8] sm:$0xff]  ;;  %8510 = vst [vmem:[#allocation125_spill] sm:$0xff] %v5323_v27  ;;  %v698_v27 = vmul.f32 0.0051020407, %v5024_v12 }
 0x16f   : > { %1228 = vadd.xlane.f32.xlu1 %v1227_v41  ;;  %v972_v41 = vmul.f32 %v5284_v42, %v5284_v42  ;;  %v5319_v39 = vsub.f32 %v3934_v29, %v691_v44  ;;  %8511 = vst [vmem:[#allocation126_spill] sm:$0xff] %v5326_v48  ;;  %v696_v42 = vmul.f32 0.0051020407, %v4976_v52  ;;  %v979_v29 = vmul.f32 %v5304_v55, %v5304_v55 }
 0x170   : > { %1224 = vadd.xlane.f32.xlu0 %v1223_v43  ;;  %v1234_v43 = vsel %vm330_vm0, %v971_v15, 0.0  ;;  %v5334_v15 = vsub.f32 %v3937_v35, %v691_v44  ;;  %v978_v35 = vmul.f32 %v5326_v48, %v5326_v48  ;;  %v3938_v44 = vld [vmem:[%s4009_s18 + $0x418] sm:$0xff]  ;;  %v5674_v14 = vadd.f32 0.001, %v1317_v46 }
 0x171   : > { %v5306_v2 = vpop.xlane.xlu2 %1064  ;;  %8509 = vst [vmem:[#allocation124_spill] sm:$0xff] %v5319_v39  ;;  %v1239_v23 = vadd.f32 %v1238_v40, %v972_v41  ;;  %v1235_v37 = vadd.f32 %v1234_v43, %v970_v36  ;;  %v977_v52 = vmul.f32 %v5319_v39, %v5319_v39  ;;  %v5345_v41 = vsub.f32 %v3938_v44, %v696_v42  ;;  %v3941_v39 = vld [vmem:[%s4009_s18 + $0x410] sm:$0xff] }
 0x172   : > { %v5311_v0 = vpop.xlane.xlu1 %1060  ;;  %8512 = vst [vmem:[#allocation127_spill] sm:$0xff] %v5334_v15  ;;  %v976_v21 = vmul.f32 %v5334_v15, %v5334_v15  ;;  %v5365_v16 = vsub.f32 %v3941_v39, %v696_v42  ;;  %v3943_v15 = vld [vmem:[%s4009_s18 + $0x3f0] sm:$0xff] }
 0x173   : > { %v5313_v9 = vpop.xlane.xlu0 %1056  ;;  %8513 = vst [vmem:[#allocation128_spill] sm:$0xff] %v5345_v41  ;;  %v1246_v44 = vsel %vm330_vm0, %v977_v52, 0.0  ;;  %v5375_v49 = vsub.f32 %v3943_v15, %v694_v22  ;;  %v697_v52 = vmul.f32 0.0051020407, %v5026_v17 }
 0x174   : > { %8516 = vst [vmem:[#allocation131_spill] sm:$0xff] %v5365_v16  ;;  %v1247_v42 = vadd.f32 %v1246_v44, %v976_v21  ;;  %v986_v12 = vmul.f32 %v5365_v16, %v5365_v16 }
 0x175   : > { %8518 = vst [vmem:[#allocation133_spill] sm:$0xff] %v5375_v49  ;;  %v982_v44 = vmul.f32 %v5375_v49, %v5375_v49  ;;  %v3949_v49 = vld [vmem:[%s4009_s18 + $0x420] sm:$0xff] }
 0x176   : > { %1244 = vadd.xlane.f32.xlu2 %v1243_v18  ;;  %v3939_v18 = vld [vmem:[%s4009_s18 + $0x408] sm:$0xff] }
 0x177   : > { %1240 = vadd.xlane.f32.xlu1 %v1239_v23  ;;  %v1250_v23 = vsel %vm330_vm0, %v979_v29, 0.0  ;;  %v5352_v40 = vsub.f32 %v3939_v18, %v695_v61  ;;  %v1255_v29 = vadd.f32 %v1254_v34, %v980_v20  ;;  %v3942_v18 = vld [vmem:[%s4009_s18 + $0x400] sm:$0xff] }
 0x178   : > { %1236 = vadd.xlane.f32.xlu0 %v1235_v37  ;;  %v5361_v37 = vsub.f32 %v3940_v30, %v694_v22  ;;  %v1251_v55 = vadd.f32 %v1250_v23, %v978_v35  ;;  %v5368_v48 = vsub.f32 %v3942_v18, %v695_v61  ;;  %v987_v30 = vmul.f32 %v5345_v41, %v5345_v41  ;;  %v3944_v61 = vld [vmem:[%s4009_s18 + $0x448] sm:$0xff]  ;;  %v3945_v22 = vld [vmem:[%s4009_s18 + $0x438] sm:$0xff] }
 0x179   : > { %v5347_v8 = vpop.xlane.xlu2 %1076  ;;  %8514 = vst [vmem:[#allocation129_spill] sm:$0xff] %v5352_v40  ;;  %v985_v39 = vmul.f32 %v5352_v40, %v5352_v40  ;;  %v5385_v15 = vsub.f32 %v3944_v61, %v699_v33  ;;  %v5388_v20 = vsub.f32 %v3945_v22, %v698_v27  ;;  %v3947_v61 = vld [vmem:[%s4009_s18 + $0x440] sm:$0xff]  ;;  %v3948_v22 = vld [vmem:[%s4009_s18 + $0x430] sm:$0xff] }
 0x17a   : > { %v5354_v36 = vpop.xlane.xlu1 %1072  ;;  %8515 = vst [vmem:[#allocation130_spill] sm:$0xff] %v5361_v37  ;;  %v983_v54 = vmul.f32 %v5361_v37, %v5361_v37  ;;  %v1266_v17 = vsel %vm330_vm0, %v987_v30, 0.0  ;;  %v5407_v30 = vsub.f32 %v3947_v61, %v699_v33  ;;  %v5410_v37 = vsub.f32 %v3948_v22, %v698_v27 }
 0x17b   : > { %v5356_v43 = vpop.xlane.xlu0 %1068  ;;  %8517 = vst [vmem:[#allocation132_spill] sm:$0xff] %v5368_v48  ;;  %v1262_v21 = vsel %vm330_vm0, %v985_v39, 0.0  ;;  %v1267_v40 = vadd.f32 %v1266_v17, %v986_v12  ;;  %v993_v39 = vmul.f32 %v5385_v15, %v5385_v15  ;;  %v701_v33 = vmul.f32 0.0051020407, %v5062_v26 }
 0x17c   : > { %8519 = vst [vmem:[#allocation134_spill] sm:$0xff] %v5385_v15  ;;  %v700_v12 = vmul.f32 0.0051020407, %v5064_v3  ;;  %v992_v17 = vmul.f32 %v5407_v30, %v5407_v30 }
 0x17d   : > { %8520 = vst [vmem:[#allocation135_spill] sm:$0xff] %v5388_v20  ;;  %v1278_v3 = vsel %vm330_vm0, %v993_v39, 0.0  ;;  %v1308_v39 = vmul.f32 0.0051020407, %v5138_v50 }
 0x17e   : > { %1256 = vadd.xlane.f32.xlu2 %v1255_v29  ;;  %v3946_v29 = vld [vmem:[%s4009_s18 + $0x428] sm:$0xff]  ;;  %8522 = vst [vmem:[#allocation137_spill] sm:$0xff] %v5407_v30  ;;  %v3955_v30 = vld [vmem:[%s4009_s18 + $0x450] sm:$0xff] }
 0x17f   : > { %1252 = vadd.xlane.f32.xlu1 %v1251_v55  ;;  %v984_v55 = vmul.f32 %v5368_v48, %v5368_v48  ;;  %v5403_v18 = vsub.f32 %v3946_v29, %v697_v52  ;;  %8523 = vst [vmem:[#allocation138_spill] sm:$0xff] %v5410_v37  ;;  %v702_v48 = vmul.f32 0.0051020407, %v5058_v51  ;;  %v991_v29 = vmul.f32 %v5388_v20, %v5388_v20 }
 0x180   : > { %1248 = vadd.xlane.f32.xlu0 %v1247_v42  ;;  %v1258_v42 = vsel %vm330_vm0, %v983_v54, 0.0  ;;  %v5418_v54 = vsub.f32 %v3949_v49, %v697_v52  ;;  %v3950_v49 = vld [vmem:[%s4009_s18 + $0x478] sm:$0xff]  ;;  %v5457_v16 = vsub.f32 %v3955_v30, %v700_v12  ;;  %v703_v30 = vmul.f32 0.0051020407, %v5104_v13 }
 0x181   : > { %v5390_v35 = vpop.xlane.xlu2 %1088  ;;  %8521 = vst [vmem:[#allocation136_spill] sm:$0xff] %v5403_v18  ;;  %v1263_v41 = vadd.f32 %v1262_v21, %v984_v55  ;;  %v1259_v27 = vadd.f32 %v1258_v42, %v982_v44  ;;  %v989_v51 = vmul.f32 %v5403_v18, %v5403_v18  ;;  %v990_v55 = vmul.f32 %v5410_v37, %v5410_v37  ;;  %v3953_v18 = vld [vmem:[%s4009_s18 + $0x470] sm:$0xff] }
 0x182   : > { %v5395_v34 = vpop.xlane.xlu1 %1084  ;;  %8524 = vst [vmem:[#allocation139_spill] sm:$0xff] %v5418_v54  ;;  %v5429_v52 = vsub.f32 %v3950_v49, %v702_v48  ;;  %v1306_v44 = vmul.f32 0.0051020407, %v5145_v38  ;;  %v988_v22 = vmul.f32 %v5418_v54, %v5418_v54  ;;  %v5451_v20 = vsub.f32 %v3953_v18, %v702_v48 }
 0x183   : > { %v5397_v23 = vpop.xlane.xlu0 %1080  ;;  %v1279_v38 = vadd.f32 %v1278_v3, %v992_v17  ;;  %8530 = vst [vmem:[#allocation145_spill] sm:$0xff] %v5457_v16  ;;  %v705_v54 = vmul.f32 0.0051020407, %v5095_v1  ;;  %v3956_v17 = vld [vmem:[%s4009_s18 + $0x4a8] sm:$0xff] }
 0x184   : > { %8525 = vst [vmem:[#allocation140_spill] sm:$0xff] %v5429_v52  ;;  %v999_v50 = vmul.f32 %v5429_v52, %v5429_v52  ;;  %v5464_v48 = vadd.f32 0.001, %v1306_v44  ;;  %v3957_v44 = vld [vmem:[%s4009_s18 + $0x498] sm:$0xff]  ;;  %v3961_v52 = vld [vmem:[%s4009_s18 + $0x480] sm:$0xff] }
 0x185   : > { %8528 = vst [vmem:[#allocation143_spill] sm:$0xff] %v5451_v20 }
 0x186   : > { %1268 = vadd.xlane.f32.xlu2 %v1267_v40  ;;  %v3951_v40 = vld [vmem:[%s4009_s18 + $0x468] sm:$0xff]  ;;  %3720 = vrsqrt.f32 %v5464_v48  ;;  %vm1462_vm3 = vweird.f32 %v5464_v48 }
 0x187   : > { %1264 = vadd.xlane.f32.xlu1 %v1263_v41  ;;  %v1274_v41 = vsel %vm330_vm0, %v991_v29, 0.0  ;;  %v5436_v21 = vsub.f32 %v3951_v40, %v701_v33  ;;  %v1270_v29 = vsel %vm330_vm0, %v989_v51, 0.0  ;;  %v3954_v40 = vld [vmem:[%s4009_s18 + $0x460] sm:$0xff]  ;;  %v704_v51 = vmul.f32 0.0051020407, %v5102_v57 }
 0x188   : > { %1260 = vadd.xlane.f32.xlu0 %v1259_v27  ;;  %v3952_v27 = vld [vmem:[%s4009_s18 + $0x458] sm:$0xff]  ;;  %v5454_v37 = vsub.f32 %v3954_v40, %v701_v33  ;;  %v1275_v15 = vadd.f32 %v1274_v41, %v990_v55  ;;  %v1271_v18 = vadd.f32 %v1270_v29, %v988_v22  ;;  %v998_v57 = vmul.f32 %v5451_v20, %v5451_v20 }
 0x189   : > { %v5431_v26 = vpop.xlane.xlu2 %1100  ;;  %8526 = vst [vmem:[#allocation141_spill] sm:$0xff] %v5436_v21  ;;  %v5446_v49 = vsub.f32 %v3952_v27, %v700_v12  ;;  %v1307_v27 = vmul.f32 0.0051020407, %v5143_v28  ;;  %v997_v33 = vmul.f32 %v5436_v21, %v5436_v21  ;;  %v5469_v12 = vadd.f32 0.001, %v1308_v39 }
 0x18a   : > { %v5439_v42 = vpop.xlane.xlu1 %1096  ;;  %8529 = vst [vmem:[#allocation144_spill] sm:$0xff] %v5454_v37  ;;  %v996_v28 = vmul.f32 %v5454_v37, %v5454_v37  ;;  %v5478_v55 = vsub.f32 %v3956_v17, %v705_v54  ;;  %v994_v41 = vmul.f32 %v5457_v16, %v5457_v16  ;;  %v5488_v22 = vsub.f32 %v3957_v44, %v704_v51  ;;  %v3959_v44 = vld [vmem:[%s4009_s18 + $0x4a0] sm:$0xff] }
 0x18b   : > { %v5441_v61 = vpop.xlane.xlu0 %1092  ;;  %8527 = vst [vmem:[#allocation142_spill] sm:$0xff] %v5446_v49  ;;  %v995_v1 = vmul.f32 %v5446_v49, %v5446_v49  ;;  %v5480_v3 = vadd.f32 0.001, %v1307_v27  ;;  %v1313_v39 = vmul.f32 0.0051020407, %v5227_v53  ;;  %v3958_v27 = vld [vmem:[%s4009_s18 + $0x488] sm:$0xff]  ;;  %3722 = vrsqrt.f32 %v5469_v12 }
 0x18c   : > { %8531 = vst [vmem:[#allocation146_spill] sm:$0xff] %v5478_v55  ;;  %v5504_v49 = vsub.f32 %v3959_v44, %v705_v54  ;;  %v1309_v53 = vmul.f32 0.0051020407, %v5188_v19  ;;  %v1005_v21 = vmul.f32 %v5478_v55, %v5478_v55  ;;  %v5525_v44 = vpop.eup %3720  ;;  %vm1482_vm1 = vweird.f32 %v5469_v12 }
 0x18d   : > { %8532 = vst [vmem:[#allocation147_spill] sm:$0xff] %v5488_v22  ;;  %v1282_v17 = vsel %vm330_vm0, %v995_v1, 0.0  ;;  %3724 = vrsqrt.f32 %v5480_v3  ;;  %v5516_v1 = vsub.f32 %v3961_v52, %v703_v30  ;;  %v5518_v54 = vadd.f32 0.001, %v1313_v39 }
 0x18e   : > { %1280 = vadd.xlane.f32.xlu2 %v1279_v38  ;;  %v1286_v38 = vsel %vm330_vm0, %v997_v33, 0.0  ;;  %8534 = vst [vmem:[#allocation149_spill] sm:$0xff] %v5504_v49  ;;  %v3960_v33 = vld [vmem:[%s4009_s18 + $0x490] sm:$0xff]  ;;  %v1283_v19 = vadd.f32 %v1282_v17, %v994_v41  ;;  %v3970_v52 = vmov 0   ;;  %vm1463_vm4 = vweird.f32 %v5525_v44 }
 0x18f   : > { %1276 = vadd.xlane.f32.xlu1 %v1275_v15  ;;  %v1290_v15 = vsel %vm330_vm0, %v999_v50, 0.0  ;;  %v5498_v50 = vsub.f32 %v3958_v27, %v703_v30  ;;  %v5510_v37 = vsub.f32 %v3960_v33, %v704_v51  ;;  %v1287_v27 = vadd.f32 %v1286_v38, %v996_v28  ;;  %8536 = vst [vmem:[#allocation151_spill] sm:$0xff] %v5516_v1  ;;  %vm5649_vm7 = vmor %vm1462_vm3, %vm1463_vm4 }
 0x190   : > { %1272 = vadd.xlane.f32.xlu0 %v1271_v18  ;;  %v1310_v18 = vmul.f32 0.0051020407, %v5186_v58  ;;  %v1291_v16 = vadd.f32 %v1290_v15, %v998_v57  ;;  %v1003_v58 = vmul.f32 %v5488_v22, %v5488_v22  ;;  %v1311_v15 = vmul.f32 0.0051020407, %v5179_v31  ;;  %3719 = vset.pattern.permute.xlu2 %v3970_v52 }
 0x191   : > { %v5482_v13 = vpop.xlane.xlu2 %1112  ;;  %8533 = vst [vmem:[#allocation148_spill] sm:$0xff] %v5498_v50  ;;  %v1001_v57 = vmul.f32 %v5498_v50, %v5498_v50  ;;  %v1004_v28 = vmul.f32 %v5504_v49, %v5504_v49  ;;  %v5529_v38 = vadd.f32 0.001, %v1309_v53  ;;  %v1002_v30 = vmul.f32 %v5510_v37, %v5510_v37  ;;  %3717 = vset.pattern.permute.xlu0 %v3970_v52 }
 0x192   : > { %v5492_v29 = vpop.xlane.xlu1 %1108  ;;  %8535 = vst [vmem:[#allocation150_spill] sm:$0xff] %v5510_v37  ;;  %v5523_v51 = vadd.f32 0.001, %v1310_v18  ;;  %v1302_v31 = vsel %vm330_vm0, %v1005_v21, 0.0  ;;  %3718 = vset.pattern.permute.xlu1 %v3970_v52  ;;  %v1000_v39 = vmul.f32 %v5516_v1, %v5516_v1  ;;  %3726 = vrsqrt.f32 %v5518_v54 }
 0x193   : > { %v5494_v40 = vpop.xlane.xlu0 %1104  ;;  %v1316_v18 = vmul.f32 0.0051020407, %v5270_v63  ;;  %v1298_v33 = vsel %vm330_vm0, %v1003_v58, 0.0  ;;  %v1457_v21 = vmul.f32 %v5525_v44, %v5464_v48  ;;  %v1294_v52 = vsel %vm330_vm0, %v1001_v57, 0.0 }
 0x194   : > { %3728 = vrsqrt.f32 %v5523_v51  ;;  %v1312_v50 = vmul.f32 0.0051020407, %v5229_v24  ;;  %v1303_v1 = vadd.f32 %v1302_v31, %v1004_v28  ;;  %v1299_v58 = vadd.f32 %v1298_v33, %v1002_v30 }
 0x195   : > { %3730 = vrsqrt.f32 %v5529_v38  ;;  %v5561_v37 = vadd.f32 0.001, %v1316_v18  ;;  %v1458_v55 = vmul.f32 %v5525_v44, %v1457_v21  ;;  %v1319_v31 = vmul.f32 0.0051020407, %v5311_v0 }
 0x196   : > { %1292 = vadd.xlane.f32.xlu2 %v1291_v16  ;;  %v5531_v16 = vpop.eup %3722  ;;  %v5568_v20 = vadd.f32 0.001, %v1312_v50  ;;  %v1314_v50 = vmul.f32 0.0051020407, %v5222_v32  ;;  %vm1472_vm5 = vweird.f32 %v5480_v3  ;;  %vm1492_vm9 = vweird.f32 %v5529_v38 }
 0x197   : > { %1288 = vadd.xlane.f32.xlu1 %v1287_v27  ;;  %v5547_v27 = vpop.eup %3724  ;;  %v1477_v63 = vmul.f32 %v5531_v16, %v5469_v12  ;;  %v1459_v33 = vmul.f32 0.5, %v1458_v55  ;;  %vm1483_vm2 = vweird.f32 %v5531_v16  ;;  %vm1532_vm13 = vweird.f32 %v5518_v54 }
 0x198   : > { %1284 = vadd.xlane.f32.xlu0 %v1283_v19  ;;  %v5551_v19 = vadd.f32 0.001, %v1311_v15  ;;  %v1467_v22 = vmul.f32 %v5547_v27, %v5480_v3  ;;  %v1295_v15 = vadd.f32 %v1294_v52, %v1000_v39  ;;  %v5565_v57 = vpop.eup %3726  ;;  %v5596_v62 = vadd.f32 0.001, %v1314_v50  ;;  %vm5659_vm8 = vmor %vm1482_vm1, %vm1483_vm2 }
 0x199   : > { %v5535_v41 = vpop.xlane.xlu2 %1124  ;;  %v1478_v49 = vmul.f32 %v5531_v16, %v1477_v63  ;;  %v1527_v21 = vmul.f32 %v5565_v57, %v5518_v54  ;;  %v1460_v32 = vsub.f32 1.5, %v1459_v33  ;;  %vm1473_vm6 = vweird.f32 %v5547_v27 }
 0x19a   : > { %v5542_v17 = vpop.xlane.xlu1 %1120  ;;  %3732 = vrsqrt.f32 %v5551_v19  ;;  %v5570_v24 = vpop.eup %3728  ;;  %vm5685_vm11 = vmor %vm1472_vm5, %vm1473_vm6  ;;  %vm1533_vm12 = vweird.f32 %v5565_v57  ;;  %vm1512_vm1 = vweird.f32 %v5551_v19  ;;  %vm1502_vm2 = vweird.f32 %v5523_v51 }
 0x19b   : > { %v5544_v53 = vpop.xlane.xlu0 %1116  ;;  %v5574_v30 = vpop.eup %3730  ;;  %3734 = vrsqrt.f32 %v5561_v37  ;;  %v1479_v52 = vmul.f32 0.5, %v1478_v49  ;;  %v1497_v63 = vmul.f32 %v5570_v24, %v5523_v51  ;;  %v1528_v49 = vmul.f32 %v5565_v57, %v1527_v21  ;;  %vm5721_vm15 = vmor %vm1532_vm13, %vm1533_vm12 }
 0x19c   : > { %3736 = vrsqrt.f32 %v5568_v20  ;;  %v1487_v0 = vmul.f32 %v5574_v30, %v5529_v38  ;;  %v1322_v21 = vmul.f32 0.0051020407, %v5354_v36  ;;  %vm1493_vm10 = vweird.f32 %v5574_v30  ;;  %v2217_v38 = vld [vmem:[%s5636_s22 + $0x50] sm:$0xff] }
 0x19d   : > { %v1480_v6 = vsub.f32 1.5, %v1479_v52  ;;  %v1498_v25 = vmul.f32 %v5570_v24, %v1497_v63  ;;  %vm1503_vm14 = vweird.f32 %v5570_v24  ;;  %vm5744_vm3 = vmor %vm1492_vm9, %vm1493_vm10  ;;  %vm1522_vm13 = vweird.f32 %v5568_v20 }
 0x19e   : > { %1304 = vadd.xlane.f32.xlu2 %v1303_v1  ;;  %v1468_v1 = vmul.f32 %v5547_v27, %v1467_v22  ;;  %vm5760_vm4 = vmor %vm1502_vm2, %vm1503_vm14 }
 0x19f   : > { %1300 = vadd.xlane.f32.xlu1 %v1299_v58  ;;  %v1315_v58 = vmul.f32 0.0051020407, %v5272_v45  ;;  %v1488_v45 = vmul.f32 %v5574_v30, %v1487_v0  ;;  %v1461_v0 = vmul.f32 %v5525_v44, %v1460_v32  ;;  %v1499_v7 = vmul.f32 0.5, %v1498_v25 }
 0x1a0   : > { %1296 = vadd.xlane.f32.xlu0 %v1295_v15  ;;  %v5589_v22 = vpop.eup %3732  ;;  %v1469_v55 = vmul.f32 0.5, %v1468_v1  ;;  %v5594_v15 = vadd.f32 0.001, %v1319_v31  ;;  %v5653_v25 = vadd.f32 0.001, %v1322_v21 }
 0x1a1   : > { %v5572_v28 = vpop.xlane.xlu2 %1136  ;;  %v5599_v11 = vpop.eup %3734  ;;  %v1507_v47 = vmul.f32 %v5589_v22, %v5551_v19  ;;  %v5612_v1 = vadd.f32 0.001, %v1315_v58  ;;  %v1529_v58 = vmul.f32 0.5, %v1528_v49  ;;  %v1489_v36 = vmul.f32 0.5, %v1488_v45 }
 0x1a2   : > { %v5579_v39 = vpop.xlane.xlu1 %1132  ;;  %v5616_v33 = vpop.eup %3736  ;;  %v1470_v50 = vsub.f32 1.5, %v1469_v55  ;;  %3738 = vrsqrt.f32 %v5594_v15  ;;  %v1557_v5 = vmul.f32 %v5599_v11, %v5561_v37  ;;  %v1481_v55 = vmul.f32 %v5531_v16, %v1480_v6 }
 0x1a3   : > { %v5581_v18 = vpop.xlane.xlu0 %1128  ;;  %3740 = vrsqrt.f32 %v5596_v62  ;;  %v1508_v10 = vmul.f32 %v5589_v22, %v1507_v47  ;;  %v1517_v32 = vmul.f32 %v5616_v33, %v5568_v20  ;;  %v1318_v49 = vmul.f32 0.0051020407, %v5313_v9 }
 0x1a4   : > { %3742 = vrsqrt.f32 %v5612_v1  ;;  %v1471_v6 = vmul.f32 %v5547_v27, %v1470_v50  ;;  %v1530_v9 = vsub.f32 1.5, %v1529_v58  ;;  %v1558_v48 = vmul.f32 %v5599_v11, %v1557_v5  ;;  %v2207_v50 = vld [vmem:[%s5636_s22] sm:$0xff] }
 0x1a5   : > { %v1465_v45 = vsel %vm5649_vm7, %v5525_v44, %v1461_v0  ;;  %v5672_v12 = vmul.f32 0.5, %v1508_v10  ;;  %v1500_v56 = vsub.f32 1.5, %v1499_v7  ;;  %v1485_v59 = vsel %vm5659_vm8, %v5531_v16, %v1481_v55  ;;  %v2209_v16 = vld [vmem:[%s5636_s22 + $0x10] sm:$0xff] }
 0x1a6   : > { %v1490_v44 = vsub.f32 1.5, %v1489_v36  ;;  %v1518_v10 = vmul.f32 %v5616_v33, %v1517_v32  ;;  %v1320_v7 = vmul.f32 0.0051020407, %v5306_v2  ;;  %v5691_v46 = vadd.f32 0.001, %v1318_v49 }
 0x1a7   : > { %3744 = vrsqrt.f32 %v5653_v25  ;;  %v1325_v55 = vmul.f32 0.0051020407, %v5395_v34  ;;  %v2358_v60 = vmul.f32 %v2207_v50, %v1465_v45  ;;  %v1475_v36 = vsel %vm5685_vm11, %v5547_v27, %v1471_v6  ;;  %v2208_v34 = vld [vmem:[%s5636_s22 + $0x8] sm:$0xff] }
 0x1a8   : > { %v5670_v21 = vpop.eup %3738  ;;  %v1531_v2 = vmul.f32 %v5565_v57, %v1530_v9  ;;  %v1559_v49 = vmul.f32 0.5, %v1558_v48  ;;  %3746 = vrsqrt.f32 %v5674_v14  ;;  %v2360_v27 = vmul.f32 %v2209_v16, %v1485_v59  ;;  %v2214_v16 = vld [vmem:[%s5636_s22 + $0x38] sm:$0xff] }
 0x1a9   : > { %v5614_v31 = vpop.xlane.xlu2 %1148  ;;  %v5679_v58 = vpop.eup %3740  ;;  %v1587_v4 = vmul.f32 %v5670_v21, %v5594_v15  ;;  %v1491_v6 = vmul.f32 %v5574_v30, %v1490_v44  ;;  %v1519_v9 = vmul.f32 0.5, %v1518_v10  ;;  %v5717_v45 = vadd.f32 0.001, %v1320_v7 }
 0x1aa   : > { %v5621_v52 = vpop.xlane.xlu1 %1144  ;;  %v5705_v32 = vpop.eup %3742  ;;  %3748 = vrsqrt.f32 %v5691_v46  ;;  %v5727_v50 = vadd.f32 0.001, %v1325_v55  ;;  %v2359_v59 = vmul.f32 %v2208_v34, %v1475_v36  ;;  %v1501_v5 = vmul.f32 %v5570_v24, %v1500_v56 }
 0x1ab   : > { %v5623_v63 = vpop.xlane.xlu0 %1140  ;;  %v1547_v54 = vmul.f32 %v5705_v32, %v5612_v1  ;;  %v1560_v44 = vsub.f32 1.5, %v1559_v49  ;;  %v1588_v10 = vmul.f32 %v5670_v21, %v1587_v4  ;;  %v1535_v7 = vsel %vm5721_vm15, %v5565_v57, %v1531_v2 }
 0x1ac   : > { %v1520_v57 = vsub.f32 1.5, %v1519_v9  ;;  %3750 = vrsqrt.f32 %v5717_v45  ;;  %v1495_v51 = vsel %vm5744_vm3, %v5574_v30, %v1491_v6  ;;  %vm1563_vm5 = vweird.f32 %v5599_v11 }
 0x1ad   : > { %3752 = vrsqrt.f32 %v5727_v50  ;;  %v2365_v30 = vmul.f32 %v2214_v16, %v1535_v7  ;;  %v1589_v6 = vmul.f32 0.5, %v1588_v10  ;;  %v1505_v48 = vsel %vm5760_vm4, %v5570_v24, %v1501_v5 }
 0x1ae   : > { %vm1513_vm6 = vweird.f32 %v5589_v22  ;;  %v1321_v56 = vmul.f32 0.0051020407, %v5356_v43  ;;  %vm1562_vm7 = vweird.f32 %v5561_v37  ;;  %v1328_v10 = vmul.f32 0.0051020407, %v5439_v42 }
 0x1af   : > { %vm1523_vm8 = vweird.f32 %v5616_v33  ;;  %vm5790_vm9 = vmor %vm1562_vm7, %vm1563_vm5  ;;  %v1521_v37 = vmul.f32 %v5616_v33, %v1520_v57  ;;  %vm1542_vm11 = vweird.f32 %v5596_v62  ;;  %vm1543_vm12 = vweird.f32 %v5679_v58 }
 0x1b0   : > { %vm5810_vm10 = vmor %vm1512_vm1, %vm1513_vm6  ;;  %v5817_v57 = vadd.f32 0.001, %v1321_v56  ;;  %vm1593_vm15 = vweird.f32 %v5670_v21  ;;  %vm1592_vm1 = vweird.f32 %v5594_v15  ;;  %vm1553_vm2 = vweird.f32 %v5705_v32 }
 0x1b1   : > { %v5693_v0 = vpop.xlane.xlu2 %1160  ;;  %vm5830_vm14 = vmor %vm1522_vm13, %vm1523_vm8  ;;  %vm1572_vm5 = vweird.f32 %v5674_v14  ;;  %vm1552_vm6 = vweird.f32 %v5612_v1 }
 0x1b2   : > { %8543 = vst [vmem:[#allocation152_spill] sm:$0xff] %v5693_v0  ;;  %v5698_v3 = vpop.xlane.xlu1 %1156  ;;  %v1537_v0 = vmul.f32 %v5679_v58, %v5596_v62  ;;  %v1525_v24 = vsel %vm5830_vm14, %v5616_v33, %v1521_v37  ;;  %3754 = vrsqrt.f32 %v5817_v57  ;;  %vm5857_vm3 = vmor %vm1592_vm1, %vm1593_vm15  ;;  %v1324_v37 = vmul.f32 0.0051020407, %v5397_v23 }
 0x1b3   : > { %v5700_v47 = vpop.xlane.xlu0 %1152  ;;  %vm5872_vm4 = vmor %vm1542_vm11, %vm1543_vm12  ;;  %vm1622_vm11 = vweird.f32 %v5653_v25  ;;  %vm1582_vm14 = vweird.f32 %v5691_v46 }
 0x1b4   : > { %8544 = vst [vmem:[#allocation153_spill] sm:$0xff] %v5700_v47  ;;  %2435 = vperm.xlu0 %3717, %v2358_v60   ;;  %v5735_v60 = vpop.eup %3744  ;;  %v1510_v47 = vsub.f32 1.5, %v5672_v12  ;;  %v1538_v4 = vmul.f32 %v5679_v58, %v1537_v0  ;;  %v2210_v12 = vld [vmem:[%s5636_s22 + $0x18] sm:$0xff]  ;;  %v1548_v0 = vmul.f32 %v5705_v32, %v1547_v54  ;;  %v2211_v54 = vld [vmem:[%s5636_s22 + $0x20] sm:$0xff]  ;;  %vm5893_vm8 = vmor %vm1552_vm6, %vm1553_vm2  ;;  %v5897_v1 = vadd.f32 0.001, %v1324_v37 }
 0x1b5   : > { %v5756_v36 = vpop.eup %3746  ;;  %v1617_v9 = vmul.f32 %v5735_v60, %v5653_v25  ;;  %v2361_v7 = vmul.f32 %v2210_v12, %v1495_v51  ;;  %v2362_v5 = vmul.f32 %v2211_v54, %v1505_v48  ;;  %v1590_v51 = vsub.f32 1.5, %v1589_v6  ;;  %v2212_v48 = vld [vmem:[%s5636_s22 + $0x28] sm:$0xff] }
 0x1b6   : > { %2445 = vperm.xlu2 %3719, %v2360_v27   ;;  %v5771_v34 = vpop.eup %3748  ;;  %v1561_v27 = vmul.f32 %v5599_v11, %v1560_v44  ;;  %v1539_v16 = vmul.f32 0.5, %v1538_v4  ;;  %v1567_v44 = vmul.f32 %v5756_v36, %v5674_v14  ;;  %v1549_v43 = vmul.f32 0.5, %v1548_v0 }
 0x1b7   : > { %v5796_v4 = vpop.eup %3750  ;;  %v1618_v42 = vmul.f32 %v5735_v60, %v1617_v9  ;;  %v5820_v6 = vadd.f32 0.001, %v1328_v10  ;;  %vm1573_vm7 = vweird.f32 %v5756_v36 }
 0x1b8   : > { %2440 = vperm.xlu1 %3718, %v2359_v59   ;;  %v1511_v59 = vmul.f32 %v5589_v22, %v1510_v47  ;;  %v1577_v47 = vmul.f32 %v5771_v34, %v5691_v46  ;;  %v1565_v12 = vsel %vm5790_vm9, %v5599_v11, %v1561_v27  ;;  %v1540_v11 = vsub.f32 1.5, %v1539_v16  ;;  %vm5939_vm13 = vmor %vm1572_vm5, %vm1573_vm7 }
 0x1b9   : > { %v5750_v55 = vpop.xlane.xlu2 %1172  ;;  %v1568_v27 = vmul.f32 %v5756_v36, %v1567_v44  ;;  %v1550_v54 = vsub.f32 1.5, %v1549_v43  ;;  %v2368_v16 = vmul.f32 %v2217_v38, %v1565_v12  ;;  %v1591_v44 = vmul.f32 %v5670_v21, %v1590_v51  ;;  %v2213_v43 = vld [vmem:[%s5636_s22 + $0x30] sm:$0xff] }
 0x1ba   : > { %v5767_v2 = vpop.xlane.xlu1 %1168  ;;  %v1515_v9 = vsel %vm5810_vm10, %v5589_v22, %v1511_v59  ;;  %v1578_v56 = vmul.f32 %v5771_v34, %v1577_v47  ;;  %v1619_v10 = vmul.f32 0.5, %v1618_v42  ;;  %v1323_v47 = vmul.f32 0.0051020407, %v5347_v8 }
 0x1bb   : > { %v5769_v49 = vpop.xlane.xlu0 %1164  ;;  %v2363_v51 = vmul.f32 %v2212_v48, %v1515_v9  ;;  %v1541_v42 = vmul.f32 %v5679_v58, %v1540_v11  ;;  %v1569_v12 = vmul.f32 0.5, %v1568_v27  ;;  %3756 = vrsqrt.f32 %v5820_v6  ;;  %v2220_v9 = vld [vmem:[%s5636_s22 + $0x68] sm:$0xff]  ;;  %v2223_v48 = vld [vmem:[%s5636_s22 + $0x80] sm:$0xff] }
 0x1bc   : > { %2470 = vperm.xlu0 %3717, %v2365_v30   ;;  %v5804_v30 = vpop.eup %3752  ;;  %v1579_v8 = vmul.f32 0.5, %v1578_v56  ;;  %v2364_v38 = vmul.f32 %v2213_v43, %v1525_v24  ;;  %v1551_v0 = vmul.f32 %v5705_v32, %v1550_v54  ;;  %v1620_v11 = vsub.f32 1.5, %v1619_v10 }
 0x1bd   : > { %v1647_v22 = vmul.f32 %v5804_v30, %v5727_v50  ;;  %v1595_v27 = vsel %vm5857_vm3, %v5670_v21, %v1591_v44  ;;  %v5877_v20 = vadd.f32 0.001, %v1323_v47  ;;  %v1326_v54 = vmul.f32 0.0051020407, %v5390_v35  ;;  %v5888_v44 = vpop.eup %3754 }
 0x1be   : > { %2450 = vperm.xlu2 %3719, %v2361_v7   ;;  %v1570_v56 = vsub.f32 1.5, %v1569_v12  ;;  %v1545_v62 = vsel %vm5872_vm4, %v5679_v58, %v1541_v42  ;;  %v1580_v10 = vsub.f32 1.5, %v1579_v8  ;;  %v2371_v24 = vmul.f32 %v2220_v9, %v1595_v27  ;;  %v2216_v42 = vld [vmem:[%s5636_s22 + $0x48] sm:$0xff] }
 0x1bf   : > { %v1648_v15 = vmul.f32 %v5804_v30, %v1647_v22  ;;  %v1621_v58 = vmul.f32 %v5735_v60, %v1620_v11  ;;  %vm1623_vm9 = vweird.f32 %v5735_v60  ;;  %3758 = vrsqrt.f32 %v5877_v20 }
 0x1c0   : > { %2455 = vperm.xlu1 %3718, %v2362_v5   ;;  %v1597_v5 = vmul.f32 %v5796_v4, %v5717_v45  ;;  %v5912_v33 = vadd.f32 0.001, %v1326_v54  ;;  %v1571_v37 = vmul.f32 %v5756_v36, %v1570_v56  ;;  %vm1583_vm10 = vweird.f32 %v5771_v34  ;;  %vm5921_vm12 = vmor %vm1622_vm11, %vm1623_vm9 }
 0x1c1   : > { %v5822_v19 = vpop.xlane.xlu2 %1184  ;;  %v5901_v43 = vpop.eup %3756  ;;  %v1581_v11 = vmul.f32 %v5771_v34, %v1580_v10  ;;  %3760 = vrsqrt.f32 %v5897_v1  ;;  %v1625_v9 = vsel %vm5921_vm12, %v5735_v60, %v1621_v58  ;;  %v1327_v56 = vmul.f32 0.0051020407, %v5441_v61  ;;  %vm5958_vm15 = vmor %vm1582_vm14, %vm1583_vm10 }
 0x1c2   : > { %v5836_v7 = vpop.xlane.xlu1 %1180  ;;  %v1598_v23 = vmul.f32 %v5796_v4, %v1597_v5  ;;  %v1649_v5 = vmul.f32 0.5, %v1648_v15  ;;  %v1677_v15 = vmul.f32 %v5901_v43, %v5820_v6  ;;  %3762 = vrsqrt.f32 %v5912_v33 }
 0x1c3   : > { %v5841_v59 = vpop.xlane.xlu0 %1176  ;;  %v1575_v14 = vsel %vm5939_vm13, %v5756_v36, %v1571_v37  ;;  %vm1653_vm1 = vweird.f32 %v5804_v30  ;;  %vm1603_vm2 = vweird.f32 %v5796_v4  ;;  %vm1652_vm3 = vweird.f32 %v5727_v50  ;;  %v2226_v50 = vld [vmem:[%s5636_s22 + $0x98] sm:$0xff] }
 0x1c4   : > { %2485 = vperm.xlu0 %3717, %v2368_v16   ;;  %v2215_v16 = vld [vmem:[%s5636_s22 + $0x40] sm:$0xff]  ;;  %v1599_v12 = vmul.f32 0.5, %v1598_v23  ;;  %v1650_v25 = vsub.f32 1.5, %v1649_v5  ;;  %v1678_v46 = vmul.f32 %v5901_v43, %v1677_v15  ;;  %vm5991_vm4 = vmor %vm1652_vm3, %vm1653_vm1  ;;  %vm1602_vm5 = vweird.f32 %v5717_v45 }
 0x1c5   : > { %v2366_v8 = vmul.f32 %v2215_v16, %v1545_v62  ;;  %v2218_v62 = vld [vmem:[%s5636_s22 + $0x58] sm:$0xff]  ;;  %v5954_v16 = vpop.eup %3758  ;;  %vm6004_vm6 = vmor %vm1602_vm5, %vm1603_vm2  ;;  %vm1613_vm7 = vweird.f32 %v5888_v44  ;;  %vm1612_vm9 = vweird.f32 %v5817_v57  ;;  %vm1682_vm10 = vweird.f32 %v5820_v6 }
 0x1c6   : > { %2460 = vperm.xlu2 %3719, %v2363_v51   ;;  %v1555_v51 = vsel %vm5893_vm8, %v5705_v32, %v1551_v0  ;;  %v1607_v0 = vmul.f32 %v5888_v44, %v5817_v57  ;;  %v1600_v54 = vsub.f32 1.5, %v1599_v12  ;;  %v1651_v58 = vmul.f32 %v5804_v30, %v1650_v25  ;;  %vm6048_vm11 = vmor %vm1612_vm9, %vm1613_vm7 }
 0x1c7   : > { %v2367_v27 = vmul.f32 %v2216_v42, %v1555_v51  ;;  %v1585_v51 = vsel %vm5958_vm15, %v5771_v34, %v1581_v11  ;;  %v2219_v42 = vld [vmem:[%s5636_s22 + $0x60] sm:$0xff]  ;;  %v2369_v37 = vmul.f32 %v2218_v62, %v1575_v14  ;;  %v1627_v32 = vmul.f32 %v5954_v16, %v5877_v20 }
 0x1c8   : > { %2465 = vperm.xlu1 %3718, %v2364_v38   ;;  %v1329_v38 = vmul.f32 0.0051020407, %v5431_v26  ;;  %v1331_v26 = vmul.f32 0.0051020407, %v5492_v29  ;;  %v1608_v61 = vmul.f32 %v5888_v44, %v1607_v0  ;;  %v1601_v12 = vmul.f32 %v5796_v4, %v1600_v54 }
 0x1c9   : > { %v5882_v21 = vpop.xlane.xlu2 %1196  ;;  %v1330_v34 = vmul.f32 0.0051020407, %v5494_v40  ;;  %v1334_v25 = vmul.f32 0.0051020407, %v5542_v17  ;;  %v1655_v40 = vsel %vm5991_vm4, %v5804_v30, %v1651_v58  ;;  %v1628_v45 = vmul.f32 %v5954_v16, %v1627_v32 }
 0x1ca   : > { %v5899_v22 = vpop.xlane.xlu1 %1192  ;;  %v5946_v29 = vadd.f32 0.001, %v1329_v38  ;;  %v5968_v36 = vadd.f32 0.001, %v1331_v26  ;;  %v5980_v38 = vpop.eup %3760  ;;  %v1609_v0 = vmul.f32 0.5, %v1608_v61  ;;  %v2370_v26 = vmul.f32 %v2219_v42, %v1585_v51 }
 0x1cb   : > { %v5905_v47 = vpop.xlane.xlu0 %1188  ;;  %v5987_v11 = vpop.eup %3762  ;;  %v1637_v17 = vmul.f32 %v5980_v38, %v5897_v1  ;;  %v6014_v23 = vadd.f32 0.001, %v1330_v34  ;;  %v1605_v54 = vsel %vm6004_vm6, %v5796_v4, %v1601_v12  ;;  %v6022_v35 = vadd.f32 0.001, %v1334_v25 }
 0x1cc   : > { %2500 = vperm.xlu0 %3717, %v2371_v24   ;;  %v2374_v24 = vmul.f32 %v2223_v48, %v1625_v9  ;;  %3764 = vrsqrt.f32 %v5946_v29  ;;  %v1657_v48 = vmul.f32 %v5987_v11, %v5912_v33  ;;  %v1610_v14 = vsub.f32 1.5, %v1609_v0  ;;  %v2222_v9 = vld [vmem:[%s5636_s22 + $0x78] sm:$0xff] }
 0x1cd   : > { %3766 = vrsqrt.f32 %v5968_v36  ;;  %v2377_v61 = vmul.f32 %v2226_v50, %v1655_v40  ;;  %v1638_v58 = vmul.f32 %v5980_v38, %v1637_v17  ;;  %v1332_v51 = vmul.f32 0.0051020407, %v5482_v13 }
 0x1ce   : > { %2475 = vperm.xlu2 %3719, %v2366_v8   ;;  %v5978_v8 = vadd.f32 0.001, %v1327_v56  ;;  %v2221_v56 = vld [vmem:[%s5636_s22 + $0x70] sm:$0xff]  ;;  %v1629_v4 = vmul.f32 0.5, %v1628_v45  ;;  %v1658_v12 = vmul.f32 %v5987_v11, %v1657_v48  ;;  %v1611_v0 = vmul.f32 %v5888_v44, %v1610_v14 }
 0x1cf   : > { %vm1683_vm8 = vweird.f32 %v5901_v43  ;;  %v6052_v40 = vadd.f32 0.001, %v1332_v51  ;;  %v1335_v57 = vmul.f32 0.0051020407, %v5535_v41  ;;  %v2229_v14 = vld [vmem:[%s5636_s22 + $0xb0] sm:$0xff]  ;;  %vm1632_vm13 = vweird.f32 %v5877_v20 }
 0x1d0   : > { %2480 = vperm.xlu1 %3718, %v2367_v27   ;;  %v1679_v27 = vmul.f32 0.5, %v1678_v46  ;;  %3768 = vrsqrt.f32 %v5978_v8  ;;  %v1659_v17 = vmul.f32 0.5, %v1658_v12  ;;  %vm6058_vm12 = vmor %vm1682_vm10, %vm1683_vm8  ;;  %v1630_v48 = vsub.f32 1.5, %v1629_v4 }
 0x1d1   : > { %v5948_v60 = vpop.xlane.xlu2 %1208  ;;  %3770 = vrsqrt.f32 %v6014_v23  ;;  %vm1633_vm14 = vweird.f32 %v5954_v16  ;;  %vm1643_vm15 = vweird.f32 %v5980_v38  ;;  %v1336_v25 = vmul.f32 0.0051020407, %v5581_v18 }
 0x1d2   : > { %v5964_v10 = vpop.xlane.xlu1 %1204  ;;  %v1680_v62 = vsub.f32 1.5, %v1679_v27  ;;  %v6024_v46 = vpop.eup %3764  ;;  %3772 = vrsqrt.f32 %v6022_v35  ;;  %v1337_v27 = vmul.f32 0.0051020407, %v5579_v39  ;;  %v1660_v12 = vsub.f32 1.5, %v1659_v17  ;;  %vm1634_vm4 = vmor %vm1632_vm13, %vm1633_vm14 }
 0x1d3   : > { %v5970_v5 = vpop.xlane.xlu0 %1200  ;;  %v6032_v32 = vpop.eup %3766  ;;  %v1687_v15 = vmul.f32 %v6024_v46, %v5946_v29  ;;  %3774 = vrsqrt.f32 %v6052_v40  ;;  %v1340_v18 = vmul.f32 0.0051020407, %v5621_v52  ;;  %vm1662_vm1 = vweird.f32 %v5912_v33 }
 0x1d4   : > { %2515 = vperm.xlu0 %3717, %v2374_v24   ;;  %v1681_v13 = vmul.f32 %v5901_v43, %v1680_v62  ;;  %v1707_v50 = vmul.f32 %v6032_v32, %v5968_v36  ;;  %vm1663_vm2 = vweird.f32 %v5987_v11  ;;  %vm1642_vm3 = vweird.f32 %v5897_v1 }
 0x1d5   : > { %vm1712_vm5 = vweird.f32 %v5968_v36  ;;  %v1338_v52 = vmul.f32 0.0051020407, %v5572_v28  ;;  %vm6127_vm6 = vmor %vm1642_vm3, %vm1643_vm15  ;;  %vm1672_vm7 = vweird.f32 %v5978_v8  ;;  %v6136_v28 = vadd.f32 0.001, %v1340_v18 }
 0x1d6   : > { %2490 = vperm.xlu2 %3719, %v2369_v37   ;;  %v2372_v37 = vmul.f32 %v2221_v56, %v1605_v54  ;;  %v6037_v34 = vpop.eup %3768  ;;  %v1333_v54 = vmul.f32 0.0051020407, %v5544_v53  ;;  %v1615_v56 = vsel %vm6048_vm11, %v5888_v44, %v1611_v0  ;;  %v1685_v41 = vsel %vm6058_vm12, %v5901_v43, %v1681_v13  ;;  %vm6182_vm12 = vmor %vm1662_vm1, %vm1663_vm2 }
 0x1d7   : > { %v1667_v39 = vmul.f32 %v6037_v34, %v5978_v8  ;;  %v6074_v62 = vpop.eup %3770  ;;  %v2373_v51 = vmul.f32 %v2222_v9, %v1615_v56  ;;  %v1708_v44 = vmul.f32 %v6032_v32, %v1707_v50  ;;  %v6086_v43 = vadd.f32 0.001, %v1335_v57 }
 0x1d8   : > { %2495 = vperm.xlu1 %3718, %v2370_v26   ;;  %v1639_v26 = vmul.f32 0.5, %v1638_v58  ;;  %v6078_v58 = vadd.f32 0.001, %v1337_v27  ;;  %v6082_v53 = vpop.eup %3772  ;;  %v2380_v13 = vmul.f32 %v2229_v14, %v1685_v41  ;;  %v6092_v27 = vadd.f32 0.001, %v1333_v54  ;;  %v2224_v54 = vld [vmem:[%s5636_s22 + $0x88] sm:$0xff] }
 0x1d9   : > { %v6016_v30 = vpop.xlane.xlu2 %1220  ;;  %v1668_v0 = vmul.f32 %v6037_v34, %v1667_v39  ;;  %v1697_v57 = vmul.f32 %v6074_v62, %v6014_v23  ;;  %v1737_v9 = vmul.f32 %v6082_v53, %v6022_v35  ;;  %v1709_v45 = vmul.f32 0.5, %v1708_v44  ;;  %v6114_v41 = vpop.eup %3774  ;;  %v2225_v44 = vld [vmem:[%s5636_s22 + $0x90] sm:$0xff] }
 0x1da   : > { %v6030_v42 = vpop.xlane.xlu1 %1216  ;;  %v1640_v4 = vsub.f32 1.5, %v1639_v26  ;;  %3776 = vrsqrt.f32 %v6078_v58  ;;  %v6106_v39 = vmul.f32 %v5987_v11, %v1660_v12  ;;  %v6123_v14 = vadd.f32 0.001, %v1336_v25 }
 0x1db   : > { %v6026_v24 = vpop.xlane.xlu0 %1212  ;;  %3778 = vrsqrt.f32 %v6086_v43  ;;  %v1738_v20 = vmul.f32 %v6082_v53, %v1737_v9  ;;  %v1710_v12 = vsub.f32 1.5, %v1709_v45  ;;  %vm1673_vm8 = vweird.f32 %v6037_v34 }
 0x1dc   : > { %2530 = vperm.xlu0 %3717, %v2377_v61   ;;  %v1688_v61 = vmul.f32 %v6024_v46, %v1687_v15  ;;  %v1631_v15 = vmul.f32 %v5954_v16, %v1630_v48  ;;  %v1641_v17 = vmul.f32 %v5980_v38, %v1640_v4  ;;  %v1669_v48 = vmul.f32 0.5, %v1668_v0  ;;  %vm1674_vm1 = vmor %vm1672_vm7, %vm1673_vm8 }
 0x1dd   : > { %3780 = vrsqrt.f32 %v6092_v27  ;;  %vm1693_vm9 = vweird.f32 %v6024_v46  ;;  %v6152_v45 = vadd.f32 0.001, %v1338_v52  ;;  %vm1713_vm10 = vweird.f32 %v6032_v32 }
 0x1de   : > { %2505 = vperm.xlu2 %3719, %v2372_v37   ;;  %v1689_v50 = vmul.f32 0.5, %v1688_v61  ;;  %v1635_v4 = vsel %vm1634_vm4, %v5954_v16, %v1631_v15  ;;  %v1717_v16 = vmul.f32 %v6114_v41, %v6052_v40  ;;  %v1343_v15 = vmul.f32 0.0051020407, %v5698_v3  ;;  %vm6196_vm15 = vmor %vm1712_vm5, %vm1713_vm10 }
 0x1df   : > { %v2375_v0 = vmul.f32 %v2224_v54, %v1635_v4  ;;  %3782 = vrsqrt.f32 %v6123_v14  ;;  %v1739_v54 = vmul.f32 0.5, %v1738_v20  ;;  %vm1692_vm11 = vweird.f32 %v5946_v29 }
 0x1e0   : > { %2510 = vperm.xlu1 %3718, %v2373_v51   ;;  %v1690_v61 = vsub.f32 1.5, %v1689_v50  ;;  %v1698_v51 = vmul.f32 %v6074_v62, %v1697_v57  ;;  %v6143_v50 = vpop.eup %3776  ;;  %v1670_v57 = vsub.f32 1.5, %v1669_v48  ;;  %v1711_v52 = vmul.f32 %v6032_v32, %v1710_v12  ;;  %vm6245_vm2 = vmor %vm1692_vm11, %vm1693_vm9 }
 0x1e1   : > { %v6064_v6 = vpop.xlane.xlu2 %1232  ;;  %v6149_v9 = vpop.eup %3778  ;;  %v1767_v1 = vmul.f32 %v6143_v50, %v6078_v58  ;;  %3784 = vrsqrt.f32 %v6136_v28  ;;  %v1718_v20 = vmul.f32 %v6114_v41, %v1717_v16  ;;  %vm1703_vm13 = vweird.f32 %v6074_v62 }
 0x1e2   : > { %v6095_v26 = vpop.xlane.xlu1 %1228  ;;  %v6157_v18 = vmul.f32 %v6024_v46, %v1690_v61  ;;  %v1699_v48 = vmul.f32 0.5, %v1698_v51  ;;  %v1671_v51 = vmul.f32 %v6037_v34, %v1670_v57  ;;  %v1747_v4 = vmul.f32 %v6149_v9, %v6086_v43 }
 0x1e3   : > { %v6080_v37 = vpop.xlane.xlu0 %1224  ;;  %v6160_v3 = vpop.eup %3780  ;;  %vm1743_vm14 = vweird.f32 %v6082_v53  ;;  %3786 = vrsqrt.f32 %v6152_v45  ;;  %v1740_v16 = vsub.f32 1.5, %v1739_v54  ;;  %v1715_v36 = vsel %vm6196_vm15, %v6032_v32, %v1711_v52  ;;  %v2228_v54 = vld [vmem:[%s5636_s22 + $0xa8] sm:$0xff] }
 0x1e4   : > { %8577 = vst [vmem:[#allocation154_spill] sm:$0xff] %v6080_v37  ;;  %2545 = vperm.xlu0 %3717, %v2380_v13   ;;  %v1645_v13 = vsel %vm6127_vm6, %v5980_v38, %v1641_v17  ;;  %v1341_v38 = vmul.f32 0.0051020407, %v5614_v31  ;;  %v1339_v31 = vmul.f32 0.0051020407, %v5623_v63  ;;  %v1700_v57 = vsub.f32 1.5, %v1699_v48 }
 0x1e5   : > { %v2376_v17 = vmul.f32 %v2225_v44, %v1645_v13  ;;  %v6174_v44 = vadd.f32 0.001, %v1343_v15  ;;  %v2232_v13 = vld [vmem:[%s5636_s22 + $0xc8] sm:$0xff]  ;;  %v1727_v15 = vmul.f32 %v6160_v3, %v6092_v27  ;;  %v1665_v48 = vsel %vm6182_vm12, %v5987_v11, %v6106_v39 }
 0x1e6   : > { %2520 = vperm.xlu2 %3719, %v2375_v0   ;;  %v6189_v0 = vadd.f32 0.001, %v1341_v38  ;;  %v1768_v38 = vmul.f32 %v6143_v50, %v1767_v1  ;;  %v6207_v37 = vadd.f32 0.001, %v1339_v31  ;;  %v8589_v1 = vld [vmem:[#allocation153_spill] sm:$0xff]  ;;  %v1675_v39 = vsel %vm1674_vm1, %v6037_v34, %v1671_v51 }
 0x1e7   : > { %3788 = vrsqrt.f32 %v6174_v44  ;;  %v1342_v31 = vmul.f32 0.0051020407, %v8589_v1  ;;  %v1346_v32 = vmul.f32 0.0051020407, %v5767_v2  ;;  %v1728_v8 = vmul.f32 %v6160_v3, %v1727_v15  ;;  %v2235_v15 = vld [vmem:[%s5636_s22 + $0xe0] sm:$0xff] }
 0x1e8   : > { %2525 = vperm.xlu1 %3718, %v2376_v17   ;;  %v8588_v17 = vld [vmem:[#allocation152_spill] sm:$0xff]  ;;  %3790 = vrsqrt.f32 %v6189_v0  ;;  %v1701_v1 = vmul.f32 %v6074_v62, %v1700_v57  ;;  %v1741_v2 = vmul.f32 %v6082_v53, %v1740_v16  ;;  %vm1702_vm3 = vweird.f32 %v6014_v23 }
 0x1e9   : > { %v6112_v56 = vpop.xlane.xlu2 %1244  ;;  %3792 = vrsqrt.f32 %v6207_v37  ;;  %vm6258_vm4 = vmor %vm1702_vm3, %vm1703_vm13  ;;  %vm1742_vm5 = vweird.f32 %v6022_v35  ;;  %vm1723_vm6 = vweird.f32 %v6114_v41  ;;  %vm1722_vm8 = vweird.f32 %v6052_v40 }
 0x1ea   : > { %8578 = vst [vmem:[#allocation155_spill] sm:$0xff] %v6112_v56  ;;  %v6168_v61 = vpop.xlane.xlu1 %1240  ;;  %v2227_v56 = vld [vmem:[%s5636_s22 + $0xa0] sm:$0xff]  ;;  %vm6273_vm7 = vmor %vm1742_vm5, %vm1743_vm14  ;;  %vm1732_vm9 = vweird.f32 %v6092_v27  ;;  %vm1773_vm10 = vweird.f32 %v6143_v50  ;;  %v1349_v29 = vmul.f32 0.0051020407, %v5836_v7  ;;  %vm1753_vm11 = vweird.f32 %v6149_v9 }
 0x1eb   : > { %v6141_v25 = vpop.xlane.xlu0 %1236  ;;  %8582 = vst [vmem:[#allocation157_spill] sm:$0xff] %v6168_v61  ;;  %v2383_v61 = vmul.f32 %v2232_v13, %v1715_v36  ;;  %v2378_v11 = vmul.f32 %v2227_v56, %v1665_v48  ;;  %v2379_v13 = vmul.f32 %v2228_v54, %v1675_v39  ;;  %v1769_v56 = vmul.f32 0.5, %v1768_v38 }
 0x1ec   : > { %8581 = vst [vmem:[#allocation156_spill] sm:$0xff] %v6141_v25  ;;  %v6204_v25 = vpop.eup %3782  ;;  %v1729_v54 = vmul.f32 0.5, %v1728_v8  ;;  %v1745_v39 = vsel %vm6273_vm7, %v6082_v53, %v1741_v2  ;;  %v1695_v8 = vsel %vm6245_vm2, %v6024_v46, %v6157_v18  ;;  %vm1733_vm12 = vweird.f32 %v6160_v3  ;;  %vm1724_vm2 = vmor %vm1722_vm8, %vm1723_vm6 }
 0x1ed   : > { %v6224_v33 = vpop.eup %3784  ;;  %2560 = vperm.xlu0 %3717, %v2383_v61   ;;  %v1719_v61 = vmul.f32 0.5, %v1718_v20  ;;  %v6263_v20 = vadd.f32 0.001, %v1346_v32  ;;  %vm1772_vm13 = vweird.f32 %v6078_v58  ;;  %vm1752_vm15 = vweird.f32 %v6086_v43  ;;  %vm1734_vm3 = vmor %vm1732_vm9, %vm1733_vm12 }
 0x1ee   : > { %v6236_v36 = vpop.eup %3786  ;;  %2535 = vperm.xlu2 %3719, %v2378_v11   ;;  %v1797_v51 = vmul.f32 %v6224_v33, %v6136_v28  ;;  %v1770_v11 = vsub.f32 1.5, %v1769_v56  ;;  %v2386_v56 = vmul.f32 %v2235_v15, %v1745_v39  ;;  %v1730_v18 = vsub.f32 1.5, %v1729_v54  ;;  %vm6337_vm14 = vmor %vm1772_vm13, %vm1773_vm10 }
 0x1ef   : > { %v6268_v38 = vpop.eup %3788  ;;  %v1777_v35 = vmul.f32 %v6236_v36, %v6152_v45  ;;  %v1347_v39 = vmul.f32 0.0051020407, %v5750_v55  ;;  %vm1803_vm1 = vweird.f32 %v6224_v33  ;;  %vm1783_vm5 = vweird.f32 %v6236_v36  ;;  %vm6416_vm10 = vmor %vm1752_vm15, %vm1753_vm11 }
 0x1f0   : > { %2540 = vperm.xlu1 %3718, %v2379_v13   ;;  %v6282_v32 = vpop.eup %3790  ;;  %v1705_v13 = vsel %vm6258_vm4, %v6074_v62, %v1701_v1  ;;  %v1827_v46 = vmul.f32 %v6268_v38, %v6174_v44  ;;  %v1731_v55 = vmul.f32 %v6160_v3, %v1730_v18  ;;  %vm1762_vm4 = vweird.f32 %v6123_v14 }
 0x1f1   : > { %v6176_v12 = vpop.xlane.xlu2 %1256  ;;  %v6298_v48 = vpop.eup %3792  ;;  %v1778_v1 = vmul.f32 %v6236_v36, %v1777_v35  ;;  %v1807_v2 = vmul.f32 %v6282_v32, %v6189_v0  ;;  %vm1802_vm6 = vweird.f32 %v6136_v28  ;;  %vm1782_vm7 = vweird.f32 %v6152_v45 }
 0x1f2   : > { %8583 = vst [vmem:[#allocation158_spill] sm:$0xff] %v6176_v12  ;;  %v1344_v12 = vmul.f32 0.0051020407, %v8588_v17  ;;  %v1748_v17 = vmul.f32 %v6149_v9, %v1747_v4  ;;  %v1757_v4 = vmul.f32 %v6204_v25, %v6123_v14  ;;  %v6265_v23 = vpop.xlane.xlu1 %1252  ;;  %v1828_v7 = vmul.f32 %v6268_v38, %v1827_v46  ;;  %vm6406_vm9 = vmor %vm1802_vm6, %vm1803_vm1 }
 0x1f3   : > { %v6229_v52 = vpop.xlane.xlu0 %1248  ;;  %8596 = vst [vmem:[#allocation159_spill] sm:$0xff] %v6265_v23  ;;  %v1808_v58 = vmul.f32 %v6282_v32, %v1807_v2  ;;  %vm1763_vm8 = vweird.f32 %v6204_v25  ;;  %vm1833_vm12 = vweird.f32 %v6268_v38  ;;  %v1353_v43 = vmul.f32 0.0051020407, %v5882_v21  ;;  %v2237_v21 = vld [vmem:[%s5636_s22 + $0xf0] sm:$0xff] }
 0x1f4   : > { %8590 = vst [vmem:[#allocation152_spill] sm:$0xff] %v6229_v52  ;;  %v6234_v63 = vadd.f32 0.001, %v1344_v12  ;;  %v6252_v12 = vadd.f32 0.001, %v1342_v31  ;;  %v1749_v16 = vmul.f32 0.5, %v1748_v17  ;;  %v1758_v17 = vmul.f32 %v6204_v25, %v1757_v4  ;;  %vm1764_vm13 = vmor %vm1762_vm4, %vm1763_vm8 }
 0x1f5   : > { %v2230_v31 = vld [vmem:[%s5636_s22 + $0xb8] sm:$0xff]  ;;  %v2231_v4 = vld [vmem:[%s5636_s22 + $0xc0] sm:$0xff]  ;;  %v1798_v52 = vmul.f32 %v6224_v33, %v1797_v51  ;;  %2575 = vperm.xlu0 %3717, %v2386_v56   ;;  %v6347_v56 = vadd.f32 0.001, %v1349_v29  ;;  %v1829_v29 = vmul.f32 0.5, %v1828_v7  ;;  %vm1792_vm11 = vweird.f32 %v6207_v37 }
 0x1f6   : > { %3794 = vrsqrt.f32 %v6234_v63  ;;  %v1750_v53 = vsub.f32 1.5, %v1749_v16  ;;  %v2381_v62 = vmul.f32 %v2230_v31, %v1695_v8  ;;  %v2382_v34 = vmul.f32 %v2231_v4, %v1705_v13 }
 0x1f7   : > { %3796 = vrsqrt.f32 %v6252_v12  ;;  %v6309_v51 = vmul.f32 0.5, %v1758_v17  ;;  %v1799_v35 = vmul.f32 0.5, %v1798_v52  ;;  %v1787_v31 = vmul.f32 %v6298_v48, %v6207_v37 }
 0x1f8   : > { %3798 = vrsqrt.f32 %v6263_v20  ;;  %2550 = vperm.xlu2 %3719, %v2381_v62   ;;  %2555 = vperm.xlu1 %3718, %v2382_v34   ;;  %v6330_v17 = vmul.f32 %v6149_v9, %v1750_v53  ;;  %v6333_v8 = vmul.f32 0.5, %v1778_v1  ;;  %v2238_v62 = vld [vmem:[%s5636_s22 + $0xf8] sm:$0xff]  ;;  %v6358_v34 = vadd.f32 0.001, %v1347_v39 }
 0x1f9   : > { %v6254_v57 = vpop.xlane.xlu2 %1268  ;;  %v1800_v18 = vsub.f32 1.5, %v1799_v35  ;;  %v1788_v1 = vmul.f32 %v6298_v48, %v1787_v31  ;;  %v2234_v35 = vld [vmem:[%s5636_s22 + $0xd8] sm:$0xff]  ;;  %v1348_v31 = vmul.f32 0.0051020407, %v5841_v59  ;;  %3800 = vrsqrt.f32 %v6347_v56 }
 0x1fa   : > { %8593 = vst [vmem:[#allocation153_spill] sm:$0xff] %v6254_v57  ;;  %v1720_v57 = vsub.f32 1.5, %v1719_v61  ;;  %v1771_v61 = vmul.f32 %v6143_v50, %v1770_v11  ;;  %v6349_v53 = vpop.xlane.xlu1 %1264  ;;  %3802 = vrsqrt.f32 %v6358_v34  ;;  %vm1832_vm15 = vweird.f32 %v6174_v44 }
 0x1fb   : > { %v6312_v16 = vpop.xlane.xlu0 %1260  ;;  %8603 = vst [vmem:[#allocation162_spill] sm:$0xff] %v6349_v53  ;;  %v1801_v27 = vmul.f32 %v6224_v33, %v1800_v18  ;;  %v6421_v18 = vmul.f32 0.5, %v1808_v58  ;;  %v2236_v58 = vld [vmem:[%s5636_s22 + $0xe8] sm:$0xff]  ;;  %vm6480_vm1 = vmor %vm1832_vm15, %vm1833_vm12 }
 0x1fc   : > { %8599 = vst [vmem:[#allocation160_spill] sm:$0xff] %v6312_v16  ;;  %v6314_v15 = vpop.eup %3794  ;;  %v1721_v54 = vmul.f32 %v6114_v41, %v1720_v57  ;;  %v1345_v57 = vmul.f32 0.0051020407, %v5769_v49  ;;  %v1760_v49 = vsub.f32 1.5, %v6309_v51  ;;  %v1775_v46 = vsel %vm6337_vm14, %v6143_v50, %v1771_v61  ;;  %v2233_v51 = vld [vmem:[%s5636_s22 + $0xd0] sm:$0xff] }
 0x1fd   : > { %v6327_v52 = vpop.eup %3796  ;;  %v1837_v2 = vmul.f32 %v6314_v15, %v6234_v63  ;;  %v1352_v61 = vmul.f32 0.0051020407, %v5899_v22  ;;  %v2389_v39 = vmul.f32 %v2238_v62, %v1775_v46  ;;  %v6384_v16 = vmul.f32 0.5, %v1788_v1 }
 0x1fe   : > { %v6342_v4 = vpop.eup %3798  ;;  %v1817_v13 = vmul.f32 %v6327_v52, %v6252_v12  ;;  %v6367_v50 = vadd.f32 0.001, %v1345_v57  ;;  %v1725_v7 = vsel %vm1724_vm2, %v6114_v41, %v1721_v54  ;;  %v1350_v57 = vmul.f32 0.0051020407, %v5822_v19  ;;  %vm6494_vm2 = vmor %vm1782_vm7, %vm1783_vm5 }
 0x1ff   : > { %v1857_v40 = vmul.f32 %v6342_v4, %v6263_v20  ;;  %v2384_v22 = vmul.f32 %v2233_v51, %v1725_v7  ;;  %2590 = vperm.xlu0 %3717, %v2389_v39   ;;  %v6392_v19 = vadd.f32 0.001, %v1352_v61  ;;  %v1838_v41 = vmul.f32 %v6314_v15, %v1837_v2  ;;  %v2241_v51 = vld [vmem:[%s5636_s22 + $0x110] sm:$0xff] }
 0x200   : > { %3804 = vrsqrt.f32 %v6367_v50  ;;  %v1830_v46 = vsub.f32 1.5, %v1829_v29  ;;  %v6410_v62 = vadd.f32 0.001, %v1350_v57  ;;  %v1790_v1 = vsub.f32 1.5, %v6384_v16  ;;  %v6428_v29 = vpop.eup %3800 }
 0x201   : > { %v6320_v11 = vpop.xlane.xlu2 %1280  ;;  %2565 = vperm.xlu2 %3719, %v2384_v22   ;;  %v1858_v54 = vmul.f32 %v6342_v4, %v1857_v40  ;;  %v1805_v2 = vsel %vm6406_vm9, %v6224_v33, %v1801_v27  ;;  %3806 = vrsqrt.f32 %v6392_v19  ;;  %v1755_v16 = vsel %vm6416_vm10, %v6149_v9, %v6330_v17 }
 0x202   : > { %8600 = vst [vmem:[#allocation161_spill] sm:$0xff] %v6320_v11  ;;  %v1735_v11 = vsel %vm1734_vm3, %v6160_v3, %v1731_v55  ;;  %v1818_v3 = vmul.f32 %v6327_v52, %v1817_v13  ;;  %v1780_v55 = vsub.f32 1.5, %v6333_v8  ;;  %v6433_v13 = vpop.xlane.xlu1 %1276  ;;  %v6443_v33 = vmul.f32 0.5, %v1838_v41 }
 0x203   : > { %v2385_v53 = vmul.f32 %v2234_v35, %v1735_v11  ;;  %v6394_v59 = vpop.xlane.xlu0 %1272  ;;  %v6399_v11 = vadd.f32 0.001, %v1348_v31  ;;  %v1859_v35 = vmul.f32 0.5, %v1858_v54  ;;  %v1831_v9 = vmul.f32 %v6268_v38, %v1830_v46 }
 0x204   : > { %v6445_v61 = vmul.f32 0.5, %v1818_v3  ;;  %v1355_v17 = vmul.f32 0.0051020407, %v5964_v10  ;;  %v2392_v31 = vmul.f32 %v2241_v51, %v1805_v2  ;;  %v1887_v39 = vmul.f32 %v6428_v29, %v6347_v56 }
 0x205   : > { %2570 = vperm.xlu1 %3718, %v2385_v53   ;;  %v1761_v53 = vmul.f32 %v6204_v25, %v1760_v49  ;;  %v6440_v49 = vpop.eup %3802  ;;  %3808 = vrsqrt.f32 %v6399_v11  ;;  %v1351_v7 = vmul.f32 0.0051020407, %v5905_v47  ;;  %v2387_v57 = vmul.f32 %v2236_v58, %v1755_v16  ;;  %v2244_v58 = vld [vmem:[%s5636_s22 + $0x128] sm:$0xff] }
 0x206   : > { %v6449_v40 = vpop.eup %3804  ;;  %3810 = vrsqrt.f32 %v6410_v62  ;;  %v1781_v14 = vmul.f32 %v6236_v36, %v1780_v55  ;;  %v1867_v41 = vmul.f32 %v6440_v49, %v6358_v34  ;;  %v6467_v3 = vadd.f32 0.001, %v1353_v43 }
 0x207   : > { %v1765_v22 = vsel %vm1764_vm13, %v6204_v25, %v1761_v53  ;;  %2605 = vperm.xlu0 %3717, %v2392_v31   ;;  %vm1793_vm14 = vweird.f32 %v6298_v48  ;;  %v1860_v54 = vsub.f32 1.5, %v1859_v35  ;;  %v1847_v47 = vmul.f32 %v6449_v40, %v6367_v50  ;;  %v6473_v25 = vpop.eup %3806  ;;  %v2239_v35 = vld [vmem:[%s5636_s22 + $0x100] sm:$0xff]  ;;  %v2240_v31 = vld [vmem:[%s5636_s22 + $0x108] sm:$0xff] }
 0x208   : > { %v2388_v10 = vmul.f32 %v2237_v21, %v1765_v22  ;;  %v1810_v55 = vsub.f32 1.5, %v6421_v18  ;;  %v1791_v28 = vmul.f32 %v6298_v48, %v1790_v1  ;;  %v1840_v46 = vsub.f32 1.5, %v6443_v33  ;;  %vm6527_vm6 = vmor %vm1792_vm11, %vm1793_vm14 }
 0x209   : > { %v6387_v23 = vpop.xlane.xlu2 %1292  ;;  %2580 = vperm.xlu2 %3719, %v2387_v57   ;;  %v6484_v44 = vadd.f32 0.001, %v1355_v17  ;;  %vm1813_vm3 = vweird.f32 %v6282_v32  ;;  %v1820_v1 = vsub.f32 1.5, %v6445_v61  ;;  %v1888_v51 = vmul.f32 %v6428_v29, %v1887_v39 }
 0x20a   : > { %v6501_v43 = vadd.f32 0.001, %v1351_v7  ;;  %v1835_v16 = vsel %vm6480_vm1, %v6268_v38, %v1831_v9  ;;  %v1868_v45 = vmul.f32 %v6440_v49, %v1867_v41  ;;  %vm1863_vm4 = vweird.f32 %v6342_v4  ;;  %v6536_v57 = vpop.xlane.xlu1 %1288 }
 0x20b   : > { %v6486_v53 = vpop.xlane.xlu0 %1284  ;;  %v6488_v2 = vpop.eup %3808  ;;  %3812 = vrsqrt.f32 %v6467_v3  ;;  %v1785_v61 = vsel %vm6494_vm2, %v6236_v36, %v1781_v14  ;;  %vm1812_vm5 = vweird.f32 %v6189_v0  ;;  %v1861_v21 = vmul.f32 %v6342_v4, %v1860_v54 }
 0x20c   : > { %v6507_v33 = vpop.eup %3810  ;;  %v1848_v38 = vmul.f32 %v6449_v40, %v1847_v47  ;;  %v1917_v9 = vmul.f32 %v6473_v25, %v6392_v19  ;;  %v1356_v17 = vmul.f32 0.0051020407, %v5948_v60  ;;  %vm1822_vm7 = vweird.f32 %v6252_v12  ;;  %vm6593_vm15 = vmor %vm1812_vm5, %vm1813_vm3 }
 0x20d   : > { %2585 = vperm.xlu1 %3718, %v2388_v10   ;;  %v1877_v36 = vmul.f32 %v6488_v2, %v6399_v11  ;;  %3814 = vrsqrt.f32 %v6484_v44  ;;  %v1358_v7 = vmul.f32 0.0051020407, %v6030_v42  ;;  %v2395_v60 = vmul.f32 %v2244_v58, %v1835_v16 }
 0x20e   : > { %v1889_v22 = vmul.f32 0.5, %v1888_v51  ;;  %3816 = vrsqrt.f32 %v6501_v43  ;;  %v2390_v37 = vmul.f32 %v2239_v35, %v1785_v61  ;;  %v1795_v14 = vsel %vm6527_vm6, %v6298_v48, %v1791_v28  ;;  %v2247_v35 = vld [vmem:[%s5636_s22 + $0x140] sm:$0xff] }
 0x20f   : > { %v1869_v10 = vmul.f32 0.5, %v1868_v45  ;;  %v1897_v54 = vmul.f32 %v6507_v33, %v6410_v62  ;;  %v1354_v47 = vmul.f32 0.0051020407, %v5970_v5  ;;  %2620 = vperm.xlu0 %3717, %v2395_v60   ;;  %v2391_v42 = vmul.f32 %v2240_v31, %v1795_v14 }
 0x210   : > { %vm1843_vm8 = vweird.f32 %v6314_v15  ;;  %vm1862_vm9 = vweird.f32 %v6263_v20  ;;  %v1849_v8 = vmul.f32 0.5, %v1848_v38  ;;  %v1918_v18 = vmul.f32 %v6473_v25, %v1917_v9 }
 0x211   : > { %v6462_v27 = vpop.xlane.xlu2 %1304  ;;  %v6550_v51 = vadd.f32 0.001, %v1356_v17  ;;  %2595 = vperm.xlu2 %3719, %v2390_v37   ;;  %v6552_v48 = vpop.eup %3812  ;;  %v1811_v28 = vmul.f32 %v6282_v32, %v1810_v55  ;;  %vm1823_vm10 = vweird.f32 %v6327_v52  ;;  %vm6558_vm12 = vmor %vm1862_vm9, %vm1863_vm4  ;;  %v1878_v20 = vmul.f32 %v6488_v2, %v1877_v36  ;;  %v2242_v36 = vld [vmem:[%s5636_s22 + $0x118] sm:$0xff] }
 0x212   : > { %v6563_v16 = vadd.f32 0.001, %v1358_v7  ;;  %v6566_v58 = vmul.f32 %v6314_v15, %v1840_v46  ;;  %vm1842_vm11 = vweird.f32 %v6234_v63  ;;  %v1821_v55 = vmul.f32 %v6327_v52, %v1820_v1  ;;  %vm6605_vm1 = vmor %vm1822_vm7, %vm1823_vm10 }
 0x213   : > { %v1890_v45 = vsub.f32 1.5, %v1889_v22  ;;  %v1865_v61 = vsel %vm6558_vm12, %v6342_v4, %v1861_v21  ;;  %v6574_v38 = vpop.eup %3814  ;;  %v1870_v9 = vsub.f32 1.5, %v1869_v10  ;;  %v1898_v17 = vmul.f32 %v6507_v33, %v1897_v54  ;;  %v6580_v31 = vpop.xlane.xlu0 %1296  ;;  %vm6661_vm7 = vmor %vm1842_vm11, %vm1843_vm8 }
 0x214   : > { %vm1893_vm13 = vweird.f32 %v6428_v29  ;;  %v6578_v46 = vadd.f32 0.001, %v1354_v47  ;;  %v6582_v39 = vpop.eup %3816  ;;  %v1850_v1 = vsub.f32 1.5, %v1849_v8  ;;  %vm1852_vm14 = vweird.f32 %v6367_v50  ;;  %v2243_v47 = vld [vmem:[%s5636_s22 + $0x120] sm:$0xff]  ;;  %v6622_v8 = vpop.xlane.xlu1 %1300 }
 0x215   : > { %2600 = vperm.xlu1 %3718, %v2391_v42   ;;  %v1927_v4 = vmul.f32 %v6552_v48, %v6467_v3  ;;  %v1919_v21 = vmul.f32 0.5, %v1918_v18  ;;  %3818 = vrsqrt.f32 %v6550_v51  ;;  %v6597_v60 = vmul.f32 0.5, %v1878_v20 }
 0x216   : > { %3820 = vrsqrt.f32 %v6563_v16  ;;  %v1361_v22 = vmul.f32 0.0051020407, %v6095_v26  ;;  %v2398_v37 = vmul.f32 %v2247_v35, %v1865_v61  ;;  %v1891_v0 = vmul.f32 %v6428_v29, %v1890_v45 }
 0x217   : > { %v1947_v10 = vmul.f32 %v6574_v38, %v6484_v44  ;;  %v1357_v54 = vmul.f32 0.0051020407, %v6026_v24  ;;  %v1815_v26 = vsel %vm6593_vm15, %v6282_v32, %v1811_v28  ;;  %v1907_v12 = vmul.f32 %v6582_v39, %v6501_v43 }
 0x218   : > { %3822 = vrsqrt.f32 %v6578_v46  ;;  %2635 = vperm.xlu0 %3717, %v2398_v37   ;;  %v2393_v18 = vmul.f32 %v2242_v36, %v1815_v26  ;;  %v1825_v24 = vsel %vm6605_vm1, %v6327_v52, %v1821_v55  ;;  %vm1873_vm2 = vweird.f32 %v6440_v49 }
 0x219   : > { %v6542_v41 = vpop.permute.xlu2 %2445  ;;  %vm1853_vm3 = vweird.f32 %v6449_v40  ;;  %vm1892_vm4 = vweird.f32 %v6347_v56  ;;  %v1928_v32 = vmul.f32 %v6552_v48, %v1927_v4  ;;  %v1920_v28 = vsub.f32 1.5, %v1919_v21  ;;  %v2250_v4 = vld [vmem:[%s5636_s22 + $0x158] sm:$0xff] }
 0x21a   : > { %v6632_v5 = vmul.f32 %v6440_v49, %v1870_v9  ;;  %v6634_v20 = vmul.f32 0.5, %v1898_v17  ;;  %vm6638_vm5 = vmor %vm1892_vm4, %vm1893_vm13  ;;  %v6642_v52 = vadd.f32 0.001, %v1361_v22  ;;  %2610 = vperm.xlu2 %3719, %v2393_v18   ;;  %v2394_v55 = vmul.f32 %v2243_v47, %v1825_v24 }
 0x21b   : > { %v6644_v61 = vpop.eup %3818  ;;  %vm1872_vm6 = vweird.f32 %v6358_v34  ;;  %v1851_v56 = vmul.f32 %v6449_v40, %v1850_v1  ;;  %v1948_v35 = vmul.f32 %v6574_v38, %v1947_v10  ;;  %v6649_v9 = vadd.f32 0.001, %v1357_v54  ;;  %vm6687_vm8 = vmor %vm1852_vm14, %vm1853_vm3 }
 0x21c   : > { %v1895_v17 = vsel %vm6638_vm5, %v6428_v29, %v1891_v0  ;;  %v6655_v21 = vpop.eup %3820  ;;  %v1880_v1 = vsub.f32 1.5, %v6597_v60  ;;  %vm1923_vm9 = vweird.f32 %v6473_v25  ;;  %v1908_v7 = vmul.f32 %v6582_v39, %v1907_v12  ;;  %v2245_v0 = vld [vmem:[%s5636_s22 + $0x130] sm:$0xff]  ;;  %v2246_v12 = vld [vmem:[%s5636_s22 + $0x138] sm:$0xff]  ;;  %vm6741_vm1 = vmor %vm1872_vm6, %vm1873_vm2 }
 0x21d   : > { %v1359_v22 = vmul.f32 0.0051020407, %v6016_v30  ;;  %2615 = vperm.xlu1 %3718, %v2394_v55   ;;  %vm1882_vm10 = vweird.f32 %v6399_v11  ;;  %v6672_v37 = vmul.f32 0.5, %v1928_v32  ;;  %v1921_v63 = vmul.f32 %v6473_v25, %v1920_v28  ;;  %v8627_v28 = vld [vmem:[#allocation154_spill] sm:$0xff] }
 0x21e   : > { %v1362_v14 = vmul.f32 0.0051020407, %v6064_v6  ;;  %v1845_v60 = vsel %vm6661_vm7, %v6314_v15, %v6566_v58  ;;  %v6681_v10 = vpop.eup %3822  ;;  %v1957_v54 = vmul.f32 %v6644_v61, %v6550_v51  ;;  %3824 = vrsqrt.f32 %v6642_v52  ;;  %v8626_v6 = vld [vmem:[#allocation157_spill] sm:$0xff] }
 0x21f   : > { %v1364_v26 = vmul.f32 0.0051020407, %v8626_v6  ;;  %v2401_v47 = vmul.f32 %v2250_v4, %v1895_v17  ;;  %v1949_v15 = vmul.f32 0.5, %v1948_v35  ;;  %v1977_v58 = vmul.f32 %v6655_v21, %v6563_v16  ;;  %v8635_v4 = vld [vmem:[#allocation156_spill] sm:$0xff] }
 0x220   : > { %3826 = vrsqrt.f32 %v6649_v9  ;;  %v1855_v50 = vsel %vm6687_vm8, %v6449_v40, %v1851_v56  ;;  %v6704_v24 = vmul.f32 0.5, %v1908_v7  ;;  %v6706_v32 = vadd.f32 0.001, %v1359_v22 }
 0x221   : > { %v6617_v42 = vpop.permute.xlu2 %2450  ;;  %v1360_v45 = vmul.f32 0.0051020407, %v8627_v28  ;;  %2650 = vperm.xlu0 %3717, %v2401_v47   ;;  %v2396_v55 = vmul.f32 %v2245_v0, %v1845_v60  ;;  %vm1903_vm12 = vweird.f32 %v6507_v33  ;;  %vm1883_vm11 = vweird.f32 %v6488_v2  ;;  %v2253_v0 = vld [vmem:[%s5636_s22 + $0x170] sm:$0xff]  ;;  %v2248_v47 = vld [vmem:[%s5636_s22 + $0x148] sm:$0xff] }
 0x222   : > { %vm1922_vm13 = vweird.f32 %v6392_v19  ;;  %v1937_v40 = vmul.f32 %v6681_v10, %v6578_v46  ;;  %v6716_v56 = vadd.f32 0.001, %v1362_v14  ;;  %v1900_v17 = vsub.f32 1.5, %v6634_v20  ;;  %vm6767_vm4 = vmor %vm1882_vm10, %vm1883_vm11 }
 0x223   : > { %vm6721_vm14 = vmor %vm1922_vm13, %vm1923_vm9  ;;  %v1958_v36 = vmul.f32 %v6644_v61, %v1957_v54  ;;  %v6726_v7 = vadd.f32 0.001, %v1364_v26  ;;  %2625 = vperm.xlu2 %3719, %v2396_v55   ;;  %v2397_v22 = vmul.f32 %v2246_v12, %v1855_v50  ;;  %vm1902_vm15 = vweird.f32 %v6410_v62  ;;  %v8634_v50 = vld [vmem:[#allocation159_spill] sm:$0xff] }
 0x224   : > { %v1881_v19 = vmul.f32 %v6488_v2, %v1880_v1  ;;  %v1950_v14 = vsub.f32 1.5, %v1949_v15  ;;  %v1978_v60 = vmul.f32 %v6655_v21, %v1977_v58  ;;  %v1925_v20 = vsel %vm6721_vm14, %v6473_v25, %v1921_v63  ;;  %v6735_v30 = vpop.eup %3824  ;;  %vm6820_vm8 = vmor %vm1902_vm15, %vm1903_vm12 }
 0x225   : > { %v1930_v1 = vsub.f32 1.5, %v6672_v37  ;;  %v1910_v6 = vsub.f32 1.5, %v6704_v24  ;;  %3828 = vrsqrt.f32 %v6706_v32  ;;  %v6748_v26 = vadd.f32 0.001, %v1360_v45  ;;  %2630 = vperm.xlu1 %3718, %v2397_v22  }
 0x226   : > { %v6669_v29 = vpop.permute.xlu0 %2435  ;;  %v6752_v63 = vpop.eup %3826  ;;  %vm1912_vm3 = vweird.f32 %v6501_v43  ;;  %vm1953_vm2 = vweird.f32 %v6574_v38  ;;  %v1938_v34 = vmul.f32 %v6681_v10, %v1937_v40  ;;  %3830 = vrsqrt.f32 %v6716_v56 }
 0x227   : > { %v1875_v37 = vsel %vm6741_vm1, %v6440_v49, %v6632_v5  ;;  %v6771_v58 = vmul.f32 0.5, %v1958_v36  ;;  %3832 = vrsqrt.f32 %v6726_v7  ;;  %v1367_v12 = vmul.f32 0.0051020407, %v8634_v50  ;;  %v2249_v5 = vld [vmem:[%s5636_s22 + $0x150] sm:$0xff] }
 0x228   : > { %v2404_v24 = vmul.f32 %v2253_v0, %v1925_v20  ;;  %v1951_v28 = vmul.f32 %v6574_v38, %v1950_v14  ;;  %v1979_v45 = vmul.f32 0.5, %v1978_v60  ;;  %v2007_v49 = vmul.f32 %v6735_v30, %v6642_v52  ;;  %v8638_v0 = vld [vmem:[#allocation155_spill] sm:$0xff] }
 0x229   : > { %v6702_v18 = vpop.permute.xlu2 %2460  ;;  %v1885_v11 = vsel %vm6767_vm4, %v6488_v2, %v1881_v19  ;;  %v1967_v40 = vmul.f32 %v6752_v63, %v6649_v9  ;;  %3834 = vrsqrt.f32 %v6748_v26  ;;  %v1363_v36 = vmul.f32 0.0051020407, %v8635_v4 }
 0x22a   : > { %v6709_v35 = vpop.permute.xlu1 %2440  ;;  %2665 = vperm.xlu0 %3717, %v2404_v24   ;;  %v2399_v22 = vmul.f32 %v2248_v47, %v1875_v37  ;;  %v1901_v60 = vmul.f32 %v6507_v33, %v1900_v17  ;;  %vm1933_vm5 = vweird.f32 %v6552_v48  ;;  %vm1952_vm6 = vweird.f32 %v6484_v44  ;;  %v2256_v24 = vld [vmem:[%s5636_s22 + $0x188] sm:$0xff] }
 0x22b   : > { %v1939_v2 = vmul.f32 0.5, %v1938_v34  ;;  %v6793_v19 = vpop.eup %3828  ;;  %vm1913_vm7 = vweird.f32 %v6582_v39  ;;  %vm6798_vm9 = vmor %vm1952_vm6, %vm1953_vm2  ;;  %v1365_v54 = vmul.f32 0.0051020407, %v8638_v0  ;;  %v6803_v37 = vadd.f32 0.001, %v1367_v12 }
 0x22c   : > { %2640 = vperm.xlu2 %3719, %v2399_v22   ;;  %v2400_v17 = vmul.f32 %v2249_v5, %v1885_v11  ;;  %v6805_v47 = vpop.eup %3830  ;;  %vm1932_vm10 = vweird.f32 %v6467_v3  ;;  %v1911_v44 = vmul.f32 %v6582_v39, %v1910_v6  ;;  %v1980_v34 = vsub.f32 1.5, %v1979_v45  ;;  %vm6847_vm13 = vmor %vm1912_vm3, %vm1913_vm7  ;;  %v8644_v22 = vld [vmem:[#allocation162_spill] sm:$0xff] }
 0x22d   : > { %v2008_v15 = vmul.f32 %v6735_v30, %v2007_v49  ;;  %v1955_v50 = vsel %vm6798_vm9, %v6574_v38, %v1951_v28  ;;  %v6814_v4 = vpop.eup %3832  ;;  %v6825_v6 = vmul.f32 %v6552_v48, %v1930_v1  ;;  %v1960_v45 = vsub.f32 1.5, %v6771_v58  ;;  %v2251_v28 = vld [vmem:[%s5636_s22 + $0x160] sm:$0xff]  ;;  %vm6902_vm4 = vmor %vm1932_vm10, %vm1933_vm5 }
 0x22e   : > { %v6750_v25 = vpop.permute.xlu0 %2470  ;;  %v1968_v49 = vmul.f32 %v6752_v63, %v1967_v40  ;;  %v6829_v11 = vadd.f32 0.001, %v1363_v36  ;;  %2645 = vperm.xlu1 %3718, %v2400_v17   ;;  %v1940_v38 = vsub.f32 1.5, %v1939_v2  ;;  %vm1942_vm11 = vweird.f32 %v6578_v46  ;;  %v2252_v17 = vld [vmem:[%s5636_s22 + $0x168] sm:$0xff] }
 0x22f   : > { %v1987_v62 = vmul.f32 %v6793_v19, %v6706_v32  ;;  %vm1983_vm12 = vweird.f32 %v6655_v21  ;;  %v1905_v1 = vsel %vm6820_vm8, %v6507_v33, %v1901_v60  ;;  %v6841_v5 = vpop.eup %3834  ;;  %v6851_v36 = vadd.f32 0.001, %v1365_v54 }
 0x230   : > { %3836 = vrsqrt.f32 %v6803_v37  ;;  %v1370_v2 = vmul.f32 0.0051020407, %v8644_v22  ;;  %v2407_v33 = vmul.f32 %v2256_v24, %v1955_v50  ;;  %v1981_v60 = vmul.f32 %v6655_v21, %v1980_v34  ;;  %v2259_v22 = vld [vmem:[%s5636_s22 + $0x1a0] sm:$0xff] }
 0x231   : > { %v6782_v55 = vpop.permute.xlu2 %2475  ;;  %v2009_v20 = vmul.f32 0.5, %v2008_v15  ;;  %v2037_v0 = vmul.f32 %v6814_v4, %v6726_v7  ;;  %v1915_v43 = vsel %vm6847_vm13, %v6582_v39, %v1911_v44  ;;  %v6864_v54 = vmul.f32 0.5, %v1968_v49  ;;  %v8646_v44 = vld [vmem:[#allocation152_spill] sm:$0xff] }
 0x232   : > { %v6788_v14 = vpop.permute.xlu1 %2455  ;;  %3838 = vrsqrt.f32 %v6829_v11  ;;  %2680 = vperm.xlu0 %3717, %v2407_v33   ;;  %v2402_v34 = vmul.f32 %v2251_v28, %v1905_v1  ;;  %vm1963_vm14 = vweird.f32 %v6644_v61  ;;  %vm1943_vm15 = vweird.f32 %v6681_v10  ;;  %v2255_v1 = vld [vmem:[%s5636_s22 + $0x180] sm:$0xff] }
 0x233   : > { %vm1982_vm1 = vweird.f32 %v6563_v16  ;;  %v1997_v39 = vmul.f32 %v6841_v5, %v6748_v26  ;;  %v1366_v50 = vmul.f32 0.0051020407, %v8646_v44  ;;  %v6878_v24 = vmul.f32 %v6644_v61, %v1960_v45  ;;  %vm6926_vm5 = vmor %vm1942_vm11, %vm1943_vm15 }
 0x234   : > { %v1941_v49 = vmul.f32 %v6681_v10, %v1940_v38  ;;  %vm6883_vm3 = vmor %vm1982_vm1, %vm1983_vm12  ;;  %v6887_v28 = vadd.f32 0.001, %v1370_v2  ;;  %2655 = vperm.xlu2 %3719, %v2402_v34   ;;  %v2403_v16 = vmul.f32 %v2252_v17, %v1915_v43  ;;  %vm1962_vm2 = vweird.f32 %v6550_v51 }
 0x235   : > { %v2010_v40 = vsub.f32 1.5, %v2009_v20  ;;  %3840 = vrsqrt.f32 %v6851_v36  ;;  %v2038_v45 = vmul.f32 %v6814_v4, %v2037_v0  ;;  %v1985_v38 = vsel %vm6883_vm3, %v6655_v21, %v1981_v60  ;;  %v8651_v60 = vld [vmem:[#allocation158_spill] sm:$0xff]  ;;  %vm6981_vm13 = vmor %vm1962_vm2, %vm1963_vm14 }
 0x236   : > { %v6839_v58 = vpop.permute.xlu0 %2485  ;;  %v6896_v33 = vpop.eup %3836  ;;  %v1988_v20 = vmul.f32 %v6793_v19, %v1987_v62  ;;  %v1970_v43 = vsub.f32 1.5, %v6864_v54  ;;  %vm2012_vm6 = vweird.f32 %v6642_v52  ;;  %2660 = vperm.xlu1 %3718, %v2403_v16   ;;  %vm1972_vm7 = vweird.f32 %v6649_v9  ;;  %v2254_v54 = vld [vmem:[%s5636_s22 + $0x178] sm:$0xff] }
 0x237   : > { %8641 = vst [vmem:[#allocation157_spill] sm:$0xff] %v6839_v58  ;;  %v2017_v58 = vmul.f32 %v6805_v47, %v6716_v56  ;;  %v1998_v21 = vmul.f32 %v6841_v5, %v1997_v39  ;;  %v1368_v3 = vmul.f32 0.0051020407, %v8651_v60  ;;  %v6913_v17 = vadd.f32 0.001, %v1366_v50 }
 0x238   : > { %v1935_v62 = vsel %vm6902_vm4, %v6552_v48, %v6825_v6  ;;  %v6920_v34 = vpop.eup %3838  ;;  %vm2013_vm9 = vweird.f32 %v6735_v30  ;;  %3842 = vrsqrt.f32 %v6887_v28  ;;  %v1373_v39 = vmul.f32 0.0051020407, %v6433_v13  ;;  %v8654_v13 = vld [vmem:[#allocation160_spill] sm:$0xff] }
 0x239   : > { %v6862_v12 = vpop.permute.xlu2 %2490  ;;  %v2018_v0 = vmul.f32 %v6805_v47, %v2017_v58  ;;  %v2410_v44 = vmul.f32 %v2259_v22, %v1985_v38  ;;  %v2011_v48 = vmul.f32 %v6735_v30, %v2010_v40  ;;  %v2039_v6 = vmul.f32 0.5, %v2038_v45  ;;  %vm6960_vm11 = vmor %vm2012_vm6, %vm2013_vm9 }
 0x23a   : > { %v6869_v15 = vpop.permute.xlu1 %2465  ;;  %v2067_v50 = vmul.f32 %v6896_v33, %v6803_v37  ;;  %v1945_v46 = vsel %vm6926_vm5, %v6681_v10, %v1941_v49  ;;  %v1989_v60 = vmul.f32 0.5, %v1988_v20  ;;  %v1369_v38 = vmul.f32 0.0051020407, %v8654_v13 }
 0x23b   : > { %8645 = vst [vmem:[#allocation154_spill] sm:$0xff] %v6869_v15  ;;  %v6944_v15 = vmul.f32 0.5, %v2018_v0  ;;  %2695 = vperm.xlu0 %3717, %v2410_v44   ;;  %v2405_v40 = vmul.f32 %v2254_v54, %v1935_v62  ;;  %v6947_v45 = vpop.eup %3840  ;;  %v1999_v22 = vmul.f32 0.5, %v1998_v21  ;;  %v2027_v58 = vmul.f32 %v6920_v34, %v6829_v11  ;;  %v2262_v44 = vld [vmem:[%s5636_s22 + $0x1b8] sm:$0xff] }
 0x23c   : > { %v6951_v10 = vadd.f32 0.001, %v1368_v3  ;;  %3844 = vrsqrt.f32 %v6913_v17  ;;  %vm1993_vm10 = vweird.f32 %v6793_v19  ;;  %vm1973_vm8 = vweird.f32 %v6752_v63 }
 0x23d   : > { %v6964_v20 = vadd.f32 0.001, %v1373_v39  ;;  %2670 = vperm.xlu2 %3719, %v2405_v40   ;;  %v2406_v0 = vmul.f32 %v2255_v1, %v1945_v46  ;;  %vm1992_vm12 = vweird.f32 %v6706_v32  ;;  %v1971_v3 = vmul.f32 %v6752_v63, %v1970_v43  ;;  %vm7002_vm14 = vmor %vm1972_vm7, %vm1973_vm8  ;;  %v8661_v39 = vld [vmem:[#allocation153_spill] sm:$0xff] }
 0x23e   : > { %v6940_v16 = vpop.permute.xlu0 %2500  ;;  %v2040_v62 = vsub.f32 1.5, %v2039_v6  ;;  %v2068_v54 = vmul.f32 %v6896_v33, %v2067_v50  ;;  %v2015_v52 = vsel %vm6960_vm11, %v6735_v30, %v2011_v48  ;;  %v6975_v13 = vpop.eup %3842  ;;  %v1990_v43 = vsub.f32 1.5, %v1989_v60  ;;  %vm7055_vm5 = vmor %vm1992_vm12, %vm1993_vm10 }
 0x23f   : > { %v2020_v6 = vsub.f32 1.5, %v6944_v15  ;;  %v2047_v50 = vmul.f32 %v6947_v45, %v6851_v36  ;;  %v6988_v46 = vadd.f32 0.001, %v1369_v38  ;;  %2675 = vperm.xlu1 %3718, %v2406_v0   ;;  %v2000_v30 = vsub.f32 1.5, %v1999_v22  ;;  %v2257_v15 = vld [vmem:[%s5636_s22 + $0x190] sm:$0xff] }
 0x240   : > { %vm2002_vm15 = vweird.f32 %v6748_v26  ;;  %v2028_v48 = vmul.f32 %v6920_v34, %v2027_v58  ;;  %3846 = vrsqrt.f32 %v6951_v10  ;;  %v1965_v51 = vsel %vm6981_vm13, %v6644_v61, %v6878_v24  ;;  %v2258_v58 = vld [vmem:[%s5636_s22 + $0x198] sm:$0xff] }
 0x241   : > { %v6942_v2 = vpop.permute.xlu2 %2505  ;;  %vm2043_vm1 = vweird.f32 %v6814_v4  ;;  %3848 = vrsqrt.f32 %v6964_v20  ;;  %v1376_v60 = vmul.f32 0.0051020407, %v6536_v57  ;;  %v2413_v38 = vmul.f32 %v2262_v44, %v2015_v52  ;;  %v2261_v44 = vld [vmem:[%s5636_s22 + $0x1b0] sm:$0xff] }
 0x242   : > { %v6966_v21 = vpop.permute.xlu1 %2480  ;;  %v7009_v40 = vpop.eup %3844  ;;  %v2041_v61 = vmul.f32 %v6814_v4, %v2040_v62  ;;  %v2069_v24 = vmul.f32 0.5, %v2068_v54  ;;  %v2097_v22 = vmul.f32 %v6975_v13, %v6887_v28  ;;  %v1975_v9 = vsel %vm7002_vm14, %v6752_v63, %v1971_v3 }
 0x243   : > { %v2048_v0 = vmul.f32 %v6947_v45, %v2047_v50  ;;  %v1371_v57 = vmul.f32 0.0051020407, %v8661_v39  ;;  %3850 = vrsqrt.f32 %v6988_v46  ;;  %2710 = vperm.xlu0 %3717, %v2413_v38   ;;  %v2408_v52 = vmul.f32 %v2257_v15, %v1965_v51  ;;  %v2265_v38 = vld [vmem:[%s5636_s22 + $0x1d0] sm:$0xff] }
 0x244   : > { %v1991_v62 = vmul.f32 %v6793_v19, %v1990_v43  ;;  %vm2023_vm3 = vweird.f32 %v6805_v47  ;;  %vm2042_vm2 = vweird.f32 %v6726_v7  ;;  %v2029_v54 = vmul.f32 0.5, %v2028_v48 }
 0x245   : > { %v1372_v63 = vmul.f32 0.0051020407, %v6394_v59  ;;  %vm2003_vm4 = vweird.f32 %v6841_v5  ;;  %vm7032_vm6 = vmor %vm2042_vm2, %vm2043_vm1  ;;  %v2057_v43 = vmul.f32 %v7009_v40, %v6913_v17  ;;  %v7038_v50 = vadd.f32 0.001, %v1376_v60  ;;  %2685 = vperm.xlu2 %3719, %v2408_v52  }
 0x246   : > { %v7027_v3 = vpop.permute.xlu0 %2515  ;;  %v2409_v7 = vmul.f32 %v2258_v58, %v1975_v9  ;;  %v7040_v48 = vpop.eup %3846  ;;  %vm2022_vm7 = vweird.f32 %v6716_v56  ;;  %v2001_v59 = vmul.f32 %v6841_v5, %v2000_v30  ;;  %v2070_v51 = vsub.f32 1.5, %v2069_v24  ;;  %vm7080_vm10 = vmor %vm2002_vm15, %vm2003_vm4 }
 0x247   : > { %v2098_v15 = vmul.f32 %v6975_v13, %v2097_v22  ;;  %v2045_v1 = vsel %vm7032_vm6, %v6814_v4, %v2041_v61  ;;  %v7049_v39 = vpop.eup %3848  ;;  %v7060_v30 = vmul.f32 %v6805_v47, %v2020_v6  ;;  %v2049_v24 = vmul.f32 0.5, %v2048_v0  ;;  %v2260_v6 = vld [vmem:[%s5636_s22 + $0x1a8] sm:$0xff]  ;;  %vm7130_vm15 = vmor %vm2022_vm7, %vm2023_vm3 }
 0x248   : > { %vm2072_vm9 = vweird.f32 %v6803_v37  ;;  %v7063_v22 = vadd.f32 0.001, %v1371_v57  ;;  %2690 = vperm.xlu1 %3718, %v2409_v7   ;;  %v2030_v61 = vsub.f32 1.5, %v2029_v54  ;;  %vm2073_vm8 = vweird.f32 %v6896_v33 }
 0x249   : > { %v7018_v49 = vpop.permute.xlu2 %2520  ;;  %v7068_v32 = vadd.f32 0.001, %v1372_v63  ;;  %v1995_v9 = vsel %vm7055_vm5, %v6793_v19, %v1991_v62  ;;  %v7074_v58 = vpop.eup %3850  ;;  %v2058_v57 = vmul.f32 %v7009_v40, %v2057_v43  ;;  %3852 = vrsqrt.f32 %v7038_v50  ;;  %v8668_v43 = vld [vmem:[#allocation161_spill] sm:$0xff]  ;;  %vm7109_vm12 = vmor %vm2072_vm9, %vm2073_vm8 }
 0x24a   : > { %v7065_v4 = vpop.permute.xlu1 %2495  ;;  %v1379_v52 = vmul.f32 0.0051020407, %v6622_v8  ;;  %v2416_v54 = vmul.f32 %v2265_v38, %v2045_v1  ;;  %v2071_v19 = vmul.f32 %v6896_v33, %v2070_v51  ;;  %v2099_v62 = vmul.f32 0.5, %v2098_v15 }
 0x24b   : > { %v2127_v63 = vmul.f32 %v7049_v39, %v6964_v20  ;;  %v2005_v26 = vsel %vm7080_vm10, %v6841_v5, %v2001_v59  ;;  %v2077_v7 = vmul.f32 %v7040_v48, %v6951_v10  ;;  %3854 = vrsqrt.f32 %v7063_v22  ;;  %v2264_v59 = vld [vmem:[%s5636_s22 + $0x1c8] sm:$0xff] }
 0x24c   : > { %v1374_v60 = vmul.f32 0.0051020407, %v8668_v43  ;;  %2725 = vperm.xlu0 %3717, %v2416_v54   ;;  %v2411_v8 = vmul.f32 %v2260_v6, %v1995_v9  ;;  %v2050_v51 = vsub.f32 1.5, %v2049_v24  ;;  %v2087_v15 = vmul.f32 %v7074_v58, %v6988_v46  ;;  %v2268_v54 = vld [vmem:[%s5636_s22 + $0x1e8] sm:$0xff] }
 0x24d   : > { %3856 = vrsqrt.f32 %v7068_v32  ;;  %v1375_v5 = vmul.f32 0.0051020407, %v6486_v53  ;;  %vm2033_vm11 = vweird.f32 %v6920_v34  ;;  %v2059_v38 = vmul.f32 0.5, %v2058_v57 }
 0x24e   : > { %v7113_v9 = vadd.f32 0.001, %v1379_v52  ;;  %2700 = vperm.xlu2 %3719, %v2411_v8   ;;  %v2412_v24 = vmul.f32 %v2261_v44, %v2005_v26  ;;  %vm2052_vm13 = vweird.f32 %v6851_v36  ;;  %v2031_v6 = vmul.f32 %v6920_v34, %v2030_v61  ;;  %v7122_v43 = vpop.permute.xlu0 %2530  ;;  %v2263_v26 = vld [vmem:[%s5636_s22 + $0x1c0] sm:$0xff] }
 0x24f   : > { %v2100_v53 = vsub.f32 1.5, %v2099_v62  ;;  %v2128_v0 = vmul.f32 %v7049_v39, %v2127_v63  ;;  %v2075_v37 = vsel %vm7109_vm12, %v6896_v33, %v2071_v19  ;;  %v7124_v57 = vpop.eup %3852  ;;  %vm2053_vm14 = vweird.f32 %v6947_v45 }
 0x250   : > { %vm2032_vm1 = vweird.f32 %v6829_v11  ;;  %v2078_v61 = vmul.f32 %v7040_v48, %v2077_v7  ;;  %v7137_v33 = vadd.f32 0.001, %v1374_v60  ;;  %2705 = vperm.xlu1 %3718, %v2412_v24   ;;  %v7140_v19 = vmul.f32 %v6947_v45, %v2050_v51  ;;  %vm7201_vm5 = vmor %vm2052_vm13, %vm2053_vm14 }
 0x251   : > { %v7098_v1 = vpop.permute.xlu2 %2535  ;;  %v2088_v62 = vmul.f32 %v7074_v58, %v2087_v15  ;;  %v7143_v56 = vadd.f32 0.001, %v1375_v5  ;;  %v2025_v63 = vsel %vm7130_vm15, %v6805_v47, %v7060_v30  ;;  %v7150_v11 = vpop.eup %3854  ;;  %vm7154_vm3 = vmor %vm2032_vm1, %vm2033_vm11  ;;  %v2060_v7 = vsub.f32 1.5, %v2059_v38 }
 0x252   : > { %vm2103_vm2 = vweird.f32 %v6975_v13  ;;  %3858 = vrsqrt.f32 %v7113_v9  ;;  %v2419_v60 = vmul.f32 %v2268_v54, %v2075_v37  ;;  %v7160_v8 = vpop.permute.xlu1 %2510  ;;  %v2101_v47 = vmul.f32 %v6975_v13, %v2100_v53 }
 0x253   : > { %v7162_v51 = vpop.eup %3856  ;;  %v2129_v30 = vmul.f32 0.5, %v2128_v0  ;;  %v2157_v15 = vmul.f32 %v7124_v57, %v7038_v50  ;;  %v2035_v5 = vsel %vm7154_vm3, %v6920_v34, %v2031_v6  ;;  %v2079_v38 = vmul.f32 0.5, %v2078_v61  ;;  %v2267_v34 = vld [vmem:[%s5636_s22 + $0x1e0] sm:$0xff] }
 0x254   : > { %3860 = vrsqrt.f32 %v7137_v33  ;;  %v1377_v24 = vmul.f32 0.0051020407, %v6387_v23  ;;  %2740 = vperm.xlu0 %3717, %v2419_v60   ;;  %v2414_v37 = vmul.f32 %v2263_v26, %v2025_v63  ;;  %v2107_v53 = vmul.f32 %v7150_v11, %v7063_v22  ;;  %v2271_v26 = vld [vmem:[%s5636_s22 + $0x200] sm:$0xff] }
 0x255   : > { %vm2102_vm4 = vweird.f32 %v6887_v28  ;;  %v2089_v0 = vmul.f32 0.5, %v2088_v62  ;;  %3862 = vrsqrt.f32 %v7143_v56  ;;  %vm2063_vm6 = vweird.f32 %v7009_v40 }
 0x256   : > { %vm7182_vm7 = vmor %vm2102_vm4, %vm2103_vm2  ;;  %v2117_v23 = vmul.f32 %v7162_v51, %v7068_v32  ;;  %v1378_v6 = vmul.f32 0.0051020407, %v6580_v31  ;;  %2715 = vperm.xlu2 %3719, %v2414_v37   ;;  %v2415_v52 = vmul.f32 %v2264_v59, %v2035_v5  ;;  %v2061_v28 = vmul.f32 %v7009_v40, %v2060_v7 }
 0x257   : > { %v2130_v61 = vsub.f32 1.5, %v2129_v30  ;;  %v2158_v62 = vmul.f32 %v7124_v57, %v2157_v15  ;;  %v2105_v63 = vsel %vm7182_vm7, %v6975_v13, %v2101_v47  ;;  %v2080_v7 = vsub.f32 1.5, %v2079_v38  ;;  %v7211_v30 = vpop.permute.xlu0 %2545  ;;  %v2266_v15 = vld [vmem:[%s5636_s22 + $0x1d8] sm:$0xff] }
 0x258   : > { %v7195_v44 = vpop.eup %3858  ;;  %vm2082_vm9 = vweird.f32 %v6951_v10  ;;  %vm2062_vm8 = vweird.f32 %v6913_v17  ;;  %v7207_v60 = vadd.f32 0.001, %v1377_v24  ;;  %2720 = vperm.xlu1 %3718, %v2415_v52   ;;  %vm2083_vm10 = vweird.f32 %v7040_v48 }
 0x259   : > { %v7173_v54 = vpop.permute.xlu2 %2550  ;;  %v2108_v13 = vmul.f32 %v7150_v11, %v2107_v53  ;;  %v2090_v47 = vsub.f32 1.5, %v2089_v0  ;;  %v2055_v36 = vsel %vm7201_vm5, %v6947_v45, %v7140_v19  ;;  %vm7222_vm11 = vmor %vm2062_vm8, %vm2063_vm6  ;;  %vm2133_vm12 = vweird.f32 %v7049_v39 }
 0x25a   : > { %v7218_v5 = vpop.eup %3860  ;;  %v2118_v59 = vmul.f32 %v7162_v51, %v2117_v23  ;;  %v7228_v38 = vadd.f32 0.001, %v1378_v6  ;;  %v2422_v24 = vmul.f32 %v2271_v26, %v2105_v63  ;;  %v2131_v45 = vmul.f32 %v7049_v39, %v2130_v61  ;;  %v7242_v63 = vpop.permute.xlu1 %2525  ;;  %vm7269_vm1 = vmor %vm2082_vm9, %vm2083_vm10 }
 0x25b   : > { %v7230_v37 = vpop.eup %3862  ;;  %v2159_v19 = vmul.f32 0.5, %v2158_v62  ;;  %v2187_v53 = vmul.f32 %v7195_v44, %v7113_v9  ;;  %v2065_v0 = vsel %vm7222_vm11, %v7009_v40, %v2061_v28  ;;  %v2081_v52 = vmul.f32 %v7040_v48, %v2080_v7 }
 0x25c   : > { %3864 = vrsqrt.f32 %v7207_v60  ;;  %v1380_v23 = vmul.f32 0.0051020407, %v6462_v27  ;;  %2755 = vperm.xlu0 %3717, %v2422_v24   ;;  %v2417_v6 = vmul.f32 %v2266_v15, %v2055_v36  ;;  %v2109_v61 = vmul.f32 0.5, %v2108_v13  ;;  %v2274_v15 = vld [vmem:[%s5636_s22 + $0x218] sm:$0xff] }
 0x25d   : > { %vm2093_vm13 = vweird.f32 %v7074_v58  ;;  %v2137_v62 = vmul.f32 %v7218_v5, %v7137_v33  ;;  %vm2132_vm15 = vweird.f32 %v6964_v20  ;;  %v2119_v27 = vmul.f32 0.5, %v2118_v59 }
 0x25e   : > { %vm7250_vm14 = vmor %vm2132_vm15, %vm2133_vm12  ;;  %v2147_v28 = vmul.f32 %v7230_v37, %v7143_v56  ;;  %3866 = vrsqrt.f32 %v7228_v38  ;;  %2730 = vperm.xlu2 %3719, %v2417_v6   ;;  %v2418_v26 = vmul.f32 %v2267_v34, %v2065_v0  ;;  %v2091_v7 = vmul.f32 %v7074_v58, %v2090_v47 }
 0x25f   : > { %v2160_v20 = vsub.f32 1.5, %v2159_v19  ;;  %v2188_v13 = vmul.f32 %v7195_v44, %v2187_v53  ;;  %v2135_v36 = vsel %vm7250_vm14, %v7049_v39, %v2131_v45  ;;  %v7273_v59 = vadd.f32 0.001, %v1380_v23  ;;  %v2269_v45 = vld [vmem:[%s5636_s22 + $0x1f0] sm:$0xff]  ;;  %v7292_v6 = vpop.permute.xlu0 %2560 }
 0x260   : > { %2735 = vperm.xlu1 %3718, %v2418_v26   ;;  %v2110_v47 = vsub.f32 1.5, %v2109_v61  ;;  %vm2092_vm3 = vweird.f32 %v6988_v46  ;;  %v2138_v24 = vmul.f32 %v7218_v5, %v2137_v62  ;;  %v2085_v39 = vsel %vm7269_vm1, %v7040_v48, %v2081_v52  ;;  %v2270_v52 = vld [vmem:[%s5636_s22 + $0x1f8] sm:$0xff] }
 0x261   : > { %v7257_v31 = vpop.permute.xlu2 %2565  ;;  %vm7285_vm2 = vmor %vm2092_vm3, %vm2093_vm13  ;;  %v2120_v53 = vsub.f32 1.5, %v2119_v27  ;;  %v2148_v0 = vmul.f32 %v7230_v37, %v2147_v28  ;;  %v2425_v34 = vmul.f32 %v2274_v15, %v2135_v36  ;;  %v2161_v46 = vmul.f32 %v7124_v57, %v2160_v20  ;;  %v2277_v15 = vld [vmem:[%s5636_s22 + $0x230] sm:$0xff] }
 0x262   : > { %v7281_v19 = vpop.eup %3864  ;;  %vm2163_vm4 = vweird.f32 %v7124_v57  ;;  %v2189_v23 = vmul.f32 0.5, %v2188_v13  ;;  %v2095_v48 = vsel %vm7285_vm2, %v7074_v58, %v2091_v7  ;;  %vm2113_vm6 = vweird.f32 %v7150_v11  ;;  %v7306_v26 = vpop.permute.xlu1 %2540 }
 0x263   : > { %3868 = vrsqrt.f32 %v7273_v59  ;;  %v2420_v62 = vmul.f32 %v2269_v45, %v2085_v39  ;;  %v2111_v40 = vmul.f32 %v7150_v11, %v2110_v47  ;;  %v2139_v27 = vmul.f32 0.5, %v2138_v24  ;;  %v2272_v45 = vld [vmem:[%s5636_s22 + $0x208] sm:$0xff] }
 0x264   : > { %v7298_v61 = vpop.eup %3866  ;;  %2770 = vperm.xlu0 %3717, %v2425_v34   ;;  %v2167_v28 = vmul.f32 %v7281_v19, %v7207_v60  ;;  %vm2162_vm7 = vweird.f32 %v7038_v50  ;;  %vm2112_vm5 = vweird.f32 %v7063_v22  ;;  %vm2123_vm9 = vweird.f32 %v7162_v51 }
 0x265   : > { %vm7312_vm8 = vmor %vm2162_vm7, %vm2163_vm4  ;;  %v2149_v7 = vmul.f32 0.5, %v2148_v0  ;;  %v2421_v20 = vmul.f32 %v2270_v52, %v2095_v48  ;;  %v2121_v13 = vmul.f32 %v7162_v51, %v2120_v53  ;;  %v2190_v36 = vsub.f32 1.5, %v2189_v23  ;;  %v2273_v48 = vld [vmem:[%s5636_s22 + $0x210] sm:$0xff] }
 0x266   : > { %2745 = vperm.xlu2 %3719, %v2420_v62   ;;  %v2177_v50 = vmul.f32 %v7298_v61, %v7228_v38  ;;  %v2165_v22 = vsel %vm7312_vm8, %v7124_v57, %v2161_v46  ;;  %vm7327_vm10 = vmor %vm2112_vm5, %vm2113_vm6  ;;  %v2140_v24 = vsub.f32 1.5, %v2139_v27  ;;  %vm2122_vm11 = vweird.f32 %v7068_v32 }
 0x267   : > { %v2168_v39 = vmul.f32 %v7281_v19, %v2167_v28  ;;  %v2115_v57 = vsel %vm7327_vm10, %v7150_v11, %v2111_v40  ;;  %vm7341_vm12 = vmor %vm2122_vm11, %vm2123_vm9  ;;  %v2150_v0 = vsub.f32 1.5, %v2149_v7  ;;  %v2428_v34 = vmul.f32 %v2277_v15, %v2165_v22  ;;  %v7348_v23 = vpop.permute.xlu0 %2575  ;;  %v2275_v15 = vld [vmem:[%s5636_s22 + $0x220] sm:$0xff] }
 0x268   : > { %2750 = vperm.xlu1 %3718, %v2421_v20   ;;  %v2191_v46 = vmul.f32 %v7195_v44, %v2190_v36  ;;  %vm2193_vm13 = vweird.f32 %v7195_v44  ;;  %v2178_v32 = vmul.f32 %v7298_v61, %v2177_v50  ;;  %v2125_v11 = vsel %vm7341_vm12, %v7162_v51, %v2121_v13  ;;  %v2280_v13 = vld [vmem:[%s5636_s22 + $0x248] sm:$0xff]  ;;  %v2287_v51 = vld [vmem:[%s7390_s25 + $0x20] sm:$0xff] }
 0x269   : > { %v7323_v17 = vpop.permute.xlu2 %2580  ;;  %v7337_v10 = vpop.eup %3868  ;;  %vm2143_vm15 = vweird.f32 %v7218_v5  ;;  %v2423_v52 = vmul.f32 %v2272_v45, %v2115_v57  ;;  %v2141_v62 = vmul.f32 %v7218_v5, %v2140_v24  ;;  %v2169_v40 = vmul.f32 0.5, %v2168_v39  ;;  %v2276_v39 = vld [vmem:[%s5636_s22 + $0x228] sm:$0xff] }
 0x26a   : > { %v2197_v27 = vmul.f32 %v7337_v10, %v7273_v59  ;;  %vm2192_vm14 = vweird.f32 %v7113_v9  ;;  %v7359_v28 = vpop.permute.xlu1 %2555  ;;  %vm2142_vm1 = vweird.f32 %v7137_v33  ;;  %v2424_v58 = vmul.f32 %v2273_v48, %v2125_v11  ;;  %v2278_v48 = vld [vmem:[%s5636_s22 + $0x238] sm:$0xff] }
 0x26b   : > { %vm7362_vm3 = vmor %vm2192_vm14, %vm2193_vm13  ;;  %v2151_v7 = vmul.f32 %v7230_v37, %v2150_v0  ;;  %vm2153_vm2 = vweird.f32 %v7230_v37  ;;  %v2179_v20 = vmul.f32 0.5, %v2178_v32  ;;  %v2170_v33 = vsub.f32 1.5, %v2169_v40  ;;  %v2284_v32 = vld [vmem:[%s7390_s25 + $0x8] sm:$0xff] }
 0x26c   : > { %2785 = vperm.xlu0 %3717, %v2428_v34   ;;  %v2195_v9 = vsel %vm7362_vm3, %v7195_v44, %v2191_v46  ;;  %vm2144_vm4 = vmor %vm2142_vm1, %vm2143_vm15  ;;  %vm2152_vm6 = vweird.f32 %v7143_v56  ;;  %v2198_v50 = vmul.f32 %v7337_v10, %v2197_v27  ;;  %vm2173_vm5 = vweird.f32 %v7281_v19 }
 0x26d   : > { %v2145_v22 = vsel %vm2144_vm4, %v7218_v5, %v2141_v62  ;;  %vm2154_vm7 = vmor %vm2152_vm6, %vm2153_vm2  ;;  %v2431_v47 = vmul.f32 %v2280_v13, %v2195_v9  ;;  %v2180_v24 = vsub.f32 1.5, %v2179_v20  ;;  %v2171_v45 = vmul.f32 %v7281_v19, %v2170_v33  ;;  %v2283_v9 = vld [vmem:[%s7390_s25] sm:$0xff] }
 0x26e   : > { %2760 = vperm.xlu2 %3719, %v2423_v52   ;;  %v2155_v44 = vsel %vm2154_vm7, %v7230_v37, %v2151_v7  ;;  %v2426_v57 = vmul.f32 %v2275_v15, %v2145_v22  ;;  %v2199_v53 = vmul.f32 0.5, %v2198_v50  ;;  %vm2172_vm9 = vweird.f32 %v7207_v60  ;;  %v2279_v52 = vld [vmem:[%s5636_s22 + $0x240] sm:$0xff]  ;;  %v2281_v7 = vld [vmem:[%s5636_s22 + $0x250] sm:$0xff]  ;;  %v2290_v50 = vld [vmem:[%s7390_s25 + $0x38] sm:$0xff] }
 0x26f   : > { %v2427_v0 = vmul.f32 %v2276_v39, %v2155_v44  ;;  %v2181_v5 = vmul.f32 %v7298_v61, %v2180_v24  ;;  %vm2183_vm8 = vweird.f32 %v7298_v61  ;;  %vm2174_vm10 = vmor %vm2172_vm9, %vm2173_vm5  ;;  %vm2182_vm11 = vweird.f32 %v7228_v38  ;;  %v2285_v22 = vld [vmem:[%s7390_s25 + $0x10] sm:$0xff]  ;;  %v2288_v39 = vld [vmem:[%s7390_s25 + $0x28] sm:$0xff] }
 0x270   : > { %2765 = vperm.xlu1 %3718, %v2424_v58   ;;  %v2200_v46 = vsub.f32 1.5, %v2199_v53  ;;  %v2175_v11 = vsel %vm2174_vm10, %v7281_v19, %v2171_v45  ;;  %vm2184_vm12 = vmor %vm2182_vm11, %vm2183_vm8  ;;  %vm2203_vm13 = vweird.f32 %v7337_v10  ;;  %vm2202_vm15 = vweird.f32 %v7273_v59  ;;  %v2293_v24 = vld [vmem:[%s7390_s25 + $0x50] sm:$0xff] }
 0x271   : > { %v7372_v36 = vpop.permute.xlu2 %2595  ;;  %v7384_v56 = vpop.permute.xlu0 %2590  ;;  %v2185_v60 = vsel %vm2184_vm12, %v7298_v61, %v2181_v5  ;;  %v2429_v62 = vmul.f32 %v2278_v48, %v2175_v11  ;;  %vm2204_vm14 = vmor %vm2202_vm15, %vm2203_vm13 }
 0x272   : > { %v2201_v40 = vmul.f32 %v7337_v10, %v2200_v46  ;;  %v2430_v38 = vmul.f32 %v2279_v52, %v2185_v60  ;;  %v2291_v46 = vld [vmem:[%s7390_s25 + $0x40] sm:$0xff] }
 0x273   : > { %v2299_v60 = vld [vmem:[%s7390_s25 + $0x80] sm:$0xff] }
 0x274   : > { %2800 = vperm.xlu0 %3717, %v2431_v47   ;;  %v2205_v58 = vsel %vm2204_vm14, %v7337_v10, %v2201_v40  ;;  %v2286_v10 = vld [vmem:[%s7390_s25 + $0x18] sm:$0xff]  ;;  %v2295_v40 = vld [vmem:[%s7390_s25 + $0x60] sm:$0xff] }
 0x275   : > { %v2432_v20 = vmul.f32 %v2281_v7, %v2205_v58  ;;  %v2302_v58 = vld [vmem:[%s7390_s25 + $0x98] sm:$0xff] }
 0x276   : > { %2775 = vperm.xlu2 %3719, %v2426_v57   ;;  %v2289_v57 = vld [vmem:[%s7390_s25 + $0x30] sm:$0xff] }
 0x277   : > { %v7395_v37 = vpop.permute.xlu1 %2570 }
 0x278   : > { %2780 = vperm.xlu1 %3718, %v2427_v0   ;;  %v2296_v0 = vld [vmem:[%s7390_s25 + $0x68] sm:$0xff] }
 0x279   : > { %v7397_v34 = vpop.permute.xlu2 %2610  ;;  %v7407_v27 = vpop.permute.xlu0 %2605 }
 0x27c   : > { %2965 = vperm.xlu0 %3717, %v2284_v32   ;;  %v2292_v32 = vld [vmem:[%s7390_s25 + $0x48] sm:$0xff] }
 0x27e   : > { %2790 = vperm.xlu2 %3719, %v2429_v62   ;;  %v2294_v62 = vld [vmem:[%s7390_s25 + $0x58] sm:$0xff] }
 0x27f   : > { %v7410_v19 = vpop.permute.xlu1 %2585 }
 0x280   : > { %2795 = vperm.xlu1 %3718, %v2430_v38  }
 0x281   : > { %v7412_v61 = vpop.permute.xlu2 %2625  ;;  %v7418_v13 = vpop.permute.xlu0 %2620 }
 0x284   : > { %2980 = vperm.xlu0 %3717, %v2287_v51  }
 0x286   : > { %2805 = vperm.xlu2 %3719, %v2432_v20   ;;  %v2297_v20 = vld [vmem:[%s7390_s25 + $0x70] sm:$0xff] }
 0x287   : > { %v7420_v59 = vpop.permute.xlu1 %2600 }
 0x288   : > { %2960 = vperm.xlu1 %3718, %v2283_v9   ;;  %v2298_v9 = vld [vmem:[%s7390_s25 + $0x78] sm:$0xff] }
 0x289   : > { %v7422_v33 = vpop.permute.xlu2 %2640 }
 0x28a   : > { %v7427_v15 = vpop.permute.xlu0 %2635 }
 0x28c   : > { %2995 = vperm.xlu0 %3717, %v2290_v50  }
 0x28e   : > { %2970 = vperm.xlu2 %3719, %v2285_v22  }
 0x28f   : > { %v7432_v44 = vpop.permute.xlu1 %2615 }
 0x290   : > { %2975 = vperm.xlu1 %3718, %v2286_v10   ;;  %v2305_v10 = vld [vmem:[%s7390_s25 + $0xb0] sm:$0xff] }
 0x291   : > { %v7429_v47 = vpop.permute.xlu2 %2655 }
 0x293   : > { %v7436_v45 = vpop.permute.xlu0 %2650 }
 0x294   : > { %3010 = vperm.xlu0 %3717, %v2293_v24  }
 0x296   : > { %2985 = vperm.xlu2 %3719, %v2288_v39   ;;  %v2300_v39 = vld [vmem:[%s7390_s25 + $0x88] sm:$0xff] }
 0x297   : > { %v7441_v5 = vpop.permute.xlu1 %2630 }
 0x298   : > { %2990 = vperm.xlu1 %3718, %v2289_v57   ;;  %v2301_v57 = vld [vmem:[%s7390_s25 + $0x90] sm:$0xff] }
 0x299   : > { %v7438_v53 = vpop.permute.xlu2 %2670 }
 0x29c   : > { %3025 = vperm.xlu0 %3717, %v2296_v0   ;;  %v7445_v11 = vpop.permute.xlu0 %2665 }
 0x29e   : > { %3000 = vperm.xlu2 %3719, %v2291_v46  }
 0x2a0   : > { %3005 = vperm.xlu1 %3718, %v2292_v32   ;;  %v7450_v52 = vpop.permute.xlu1 %2645  ;;  %v2308_v32 = vld [vmem:[%s7390_s25 + $0xc8] sm:$0xff] }
 0x2a1   : > { %v7447_v48 = vpop.permute.xlu2 %2685 }
 0x2a4   : > { %3040 = vperm.xlu0 %3717, %v2299_v60   ;;  %v7454_v38 = vpop.permute.xlu0 %2680 }
 0x2a6   : > { %3015 = vperm.xlu2 %3719, %v2294_v62   ;;  %v2303_v62 = vld [vmem:[%s7390_s25 + $0xa0] sm:$0xff] }
 0x2a8   : > { %3020 = vperm.xlu1 %3718, %v2295_v40   ;;  %v7459_v7 = vpop.permute.xlu1 %2660  ;;  %v2304_v40 = vld [vmem:[%s7390_s25 + $0xa8] sm:$0xff] }
 0x2a9   : > { %v7456_v51 = vpop.permute.xlu2 %2700 }
 0x2ac   : > { %3055 = vperm.xlu0 %3717, %v2302_v58  }
 0x2ad   : > { %v7463_v50 = vpop.permute.xlu0 %2695 }
 0x2ae   : > { %3030 = vperm.xlu2 %3719, %v2297_v20  }
 0x2b0   : > { %3035 = vperm.xlu1 %3718, %v2298_v9   ;;  %v2311_v9 = vld [vmem:[%s7390_s25 + $0xe0] sm:$0xff] }
 0x2b1   : > { %v7465_v22 = vpop.permute.xlu2 %2715  ;;  %v7468_v24 = vpop.permute.xlu1 %2675 }
 0x2b2   : > { %8695 = vst [vmem:[#allocation159_spill] sm:$0xff] %v7465_v22 }
 0x2b3   : > { %8696 = vst [vmem:[#allocation156_spill] sm:$0xff] %v7468_v24 }
 0x2b4   : > { %3070 = vperm.xlu0 %3717, %v2305_v10  }
 0x2b5   : > { %v7472_v0 = vpop.permute.xlu0 %2710 }
 0x2b6   : > { %8697 = vst [vmem:[#allocation155_spill] sm:$0xff] %v7472_v0  ;;  %3045 = vperm.xlu2 %3719, %v2300_v39   ;;  %v2306_v39 = vld [vmem:[%s7390_s25 + $0xb8] sm:$0xff] }
 0x2b8   : > { %3050 = vperm.xlu1 %3718, %v2301_v57   ;;  %v2307_v57 = vld [vmem:[%s7390_s25 + $0xc0] sm:$0xff] }
 0x2b9   : > { %v7474_v46 = vpop.permute.xlu2 %2730 }
 0x2ba   : > { %8698 = vst [vmem:[#allocation162_spill] sm:$0xff] %v7474_v46  ;;  %v7477_v60 = vpop.permute.xlu1 %2690 }
 0x2bb   : > { %8699 = vst [vmem:[#allocation152_spill] sm:$0xff] %v7477_v60 }
 0x2bc   : > { %3085 = vperm.xlu0 %3717, %v2308_v32  }
 0x2be   : > { %v7481_v58 = vpop.permute.xlu0 %2725  ;;  %3060 = vperm.xlu2 %3719, %v2303_v62   ;;  %v2314_v62 = vld [vmem:[%s7390_s25 + $0xf8] sm:$0xff] }
 0x2bf   : > { %8700 = vst [vmem:[#allocation158_spill] sm:$0xff] %v7481_v58 }
 0x2c0   : > { %3065 = vperm.xlu1 %3718, %v2304_v40   ;;  %v2309_v40 = vld [vmem:[%s7390_s25 + $0xd0] sm:$0xff] }
 0x2c1   : > { %v7483_v20 = vpop.permute.xlu2 %2745 }
 0x2c2   : > { %8701 = vst [vmem:[#allocation160_spill] sm:$0xff] %v7483_v20  ;;  %v7486_v10 = vpop.permute.xlu1 %2705  ;;  %v2310_v20 = vld [vmem:[%s7390_s25 + $0xd8] sm:$0xff] }
 0x2c3   : > { %8702 = vst [vmem:[#allocation153_spill] sm:$0xff] %v7486_v10 }
 0x2c4   : > { %3100 = vperm.xlu0 %3717, %v2311_v9  }
 0x2c6   : > { %v7490_v60 = vpop.permute.xlu0 %2740  ;;  %3075 = vperm.xlu2 %3719, %v2306_v39   ;;  %v2317_v39 = vld [vmem:[%s7390_s25 + $0x110] sm:$0xff] }
 0x2c7   : > { %8703 = vst [vmem:[#allocation161_spill] sm:$0xff] %v7490_v60 }
 0x2c8   : > { %3080 = vperm.xlu1 %3718, %v2307_v57   ;;  %v2312_v57 = vld [vmem:[%s7390_s25 + $0xe8] sm:$0xff] }
 0x2c9   : > { %v7492_v32 = vpop.permute.xlu2 %2760 }
 0x2ca   : > { %8704 = vst [vmem:[#allocation163_spill] sm:$0xff] %v7492_v32  ;;  %v7495_v58 = vpop.permute.xlu1 %2720  ;;  %v2313_v32 = vld [vmem:[%s7390_s25 + $0xf0] sm:$0xff] }
 0x2cb   : > { %8705 = vst [vmem:[#allocation164_spill] sm:$0xff] %v7495_v58 }
 0x2cc   : > { %3115 = vperm.xlu0 %3717, %v2314_v62  }
 0x2ce   : > { %v7499_v10 = vpop.permute.xlu0 %2755  ;;  %3090 = vperm.xlu2 %3719, %v2309_v40   ;;  %v2320_v40 = vld [vmem:[%s7390_s25 + $0x128] sm:$0xff] }
 0x2cf   : > { %8706 = vst [vmem:[#allocation165_spill] sm:$0xff] %v7499_v10 }
 0x2d0   : > { %3095 = vperm.xlu1 %3718, %v2310_v20   ;;  %v2315_v20 = vld [vmem:[%s7390_s25 + $0x100] sm:$0xff] }
 0x2d1   : > { %v7501_v9 = vpop.permute.xlu2 %2775 }
 0x2d2   : > { %8707 = vst [vmem:[#allocation166_spill] sm:$0xff] %v7501_v9  ;;  %v7504_v60 = vpop.permute.xlu1 %2735  ;;  %v2316_v9 = vld [vmem:[%s7390_s25 + $0x108] sm:$0xff] }
 0x2d3   : > { %8708 = vst [vmem:[#allocation167_spill] sm:$0xff] %v7504_v60 }
 0x2d4   : > { %3130 = vperm.xlu0 %3717, %v2317_v39  }
 0x2d6   : > { %v7508_v58 = vpop.permute.xlu0 %2770  ;;  %3105 = vperm.xlu2 %3719, %v2312_v57  }
 0x2d7   : > { %8709 = vst [vmem:[#allocation168_spill] sm:$0xff] %v7508_v58  ;;  %v2323_v58 = vld [vmem:[%s7390_s25 + $0x140] sm:$0xff] }
 0x2d8   : > { %3110 = vperm.xlu1 %3718, %v2313_v32   ;;  %v2318_v32 = vld [vmem:[%s7390_s25 + $0x118] sm:$0xff] }
 0x2d9   : > { %v7510_v62 = vpop.permute.xlu2 %2790 }
 0x2da   : > { %8710 = vst [vmem:[#allocation169_spill] sm:$0xff] %v7510_v62  ;;  %v7513_v10 = vpop.permute.xlu1 %2750  ;;  %v2319_v62 = vld [vmem:[%s7390_s25 + $0x120] sm:$0xff] }
 0x2db   : > { %8711 = vst [vmem:[#allocation170_spill] sm:$0xff] %v7513_v10 }
 0x2dc   : > { %3145 = vperm.xlu0 %3717, %v2320_v40   ;;  %v8716_v40 = vld [vmem:[#allocation44_spill] sm:$0xff] }
 0x2dd   : > { %v2812_v10 = vmul.f32 %v6542_v41, %v8716_v40  ;;  %v2322_v40 = vld [vmem:[%s7390_s25 + $0x138] sm:$0xff] }
 0x2de   : > { %v7517_v60 = vpop.permute.xlu0 %2785  ;;  %3120 = vperm.xlu2 %3719, %v2315_v20  }
 0x2df   : > { %8712 = vst [vmem:[#allocation171_spill] sm:$0xff] %v7517_v60  ;;  %v8717_v60 = vld [vmem:[#allocation41_spill] sm:$0xff] }
 0x2e0   : > { %3125 = vperm.xlu1 %3718, %v2316_v9   ;;  %v2813_v9 = vmul.f32 %v6542_v41, %v8717_v60  ;;  %v8719_v41 = vld [vmem:[#allocation46_spill] sm:$0xff] }
 0x2e1   : > { %v7519_v39 = vpop.permute.xlu2 %2805  ;;  %v2810_v60 = vmul.f32 %v6709_v35, %v8719_v41 }
 0x2e2   : > { %8713 = vst [vmem:[#allocation172_spill] sm:$0xff] %v7519_v39  ;;  %v7522_v57 = vpop.permute.xlu1 %2765  ;;  %v2326_v39 = vld [vmem:[%s7390_s25 + $0x158] sm:$0xff] }
 0x2e3   : > { %8714 = vst [vmem:[#allocation173_spill] sm:$0xff] %v7522_v57  ;;  %v2329_v57 = vld [vmem:[%s7390_s25 + $0x170] sm:$0xff] }
 0x2e4   : > { %3160 = vperm.xlu0 %3717, %v2323_v58  }
 0x2e6   : > { %v7526_v46 = vpop.permute.xlu0 %2800  ;;  %3135 = vperm.xlu2 %3719, %v2318_v32   ;;  %v2321_v32 = vld [vmem:[%s7390_s25 + $0x130] sm:$0xff] }
 0x2e7   : > { %8715 = vst [vmem:[#allocation174_spill] sm:$0xff] %v7526_v46 }
 0x2e8   : > { %3140 = vperm.xlu1 %3718, %v2319_v62  }
 0x2e9   : > { %v2971_v20 = vpop.permute.xlu2 %2970 }
 0x2ea   : > { %v3337_v0 = vadd.f32 %v2971_v20, %v2812_v10  ;;  %v3338_v24 = vadd.f32 %v2971_v20, %v2813_v9  ;;  %v7540_v58 = vpop.permute.xlu1 %2780  ;;  %v8720_v10 = vld [vmem:[#allocation43_spill] sm:$0xff] }
 0x2eb   : > { %8718 = vst [vmem:[#allocation44_spill] sm:$0xff] %v7540_v58  ;;  %v2811_v62 = vmul.f32 %v6709_v35, %v8720_v10  ;;  %v8721_v20 = vld [vmem:[#allocation51_spill] sm:$0xff] }
 0x2ec   : > { %3487 = vst [vmem:[%s7538_s28 + $0x20] sm:$0xff] %v3337_v0  ;;  %3175 = vperm.xlu0 %3717, %v2326_v39   ;;  %v2818_v58 = vmul.f32 %v6702_v18, %v8721_v20  ;;  %v8722_v0 = vld [vmem:[#allocation48_spill] sm:$0xff] }
 0x2ed   : > { %3488 = vst.msk [vmem:[%s7538_s28 + $0x28] sm:$0xff] %vm330_vm0, %v3338_v24  ;;  %v2819_v39 = vmul.f32 %v6702_v18, %v8722_v0  ;;  %v8723_v18 = vld [vmem:[#allocation50_spill] sm:$0xff]  ;;  %v8726_v0 = vld [vmem:[#allocation53_spill] sm:$0xff] }
 0x2ee   : > { %v2966_v9 = vpop.permute.xlu0 %2965  ;;  %3150 = vperm.xlu2 %3719, %v2321_v32   ;;  %v2324_v32 = vld [vmem:[%s7390_s25 + $0x148] sm:$0xff] }
 0x2ef   : > { %v3335_v24 = vadd.f32 %v2966_v9, %v2810_v60  ;;  %v3336_v46 = vadd.f32 %v2966_v9, %v2811_v62  ;;  %v2816_v60 = vmul.f32 %v6788_v14, %v8723_v18  ;;  %v8724_v62 = vld [vmem:[#allocation47_spill] sm:$0xff] }
 0x2f0   : > { %3155 = vperm.xlu1 %3718, %v2322_v40   ;;  %v2817_v40 = vmul.f32 %v6788_v14, %v8724_v62  ;;  %v2332_v18 = vld [vmem:[%s7390_s25 + $0x188] sm:$0xff] }
 0x2f1   : > { %v2986_v41 = vpop.permute.xlu2 %2985  ;;  %3485 = vst [vmem:[%s7538_s28 + $0x10] sm:$0xff] %v3335_v24 }
 0x2f2   : > { %v3343_v35 = vadd.f32 %v2986_v41, %v2818_v58  ;;  %v3344_v10 = vadd.f32 %v2986_v41, %v2819_v39  ;;  %3486 = vst.msk [vmem:[%s7538_s28 + $0x18] sm:$0xff] %vm330_vm0, %v3336_v46  ;;  %v7559_v22 = vpop.permute.xlu1 %2795  ;;  %v2325_v58 = vld [vmem:[%s7390_s25 + $0x150] sm:$0xff] }
 0x2f3   : > { %v8725_v46 = vld [vmem:[#allocation56_spill] sm:$0xff] }
 0x2f4   : > { %3493 = vst [vmem:[%s7538_s28 + $0x50] sm:$0xff] %v3343_v35  ;;  %3190 = vperm.xlu0 %3717, %v2329_v57   ;;  %v2824_v20 = vmul.f32 %v6782_v55, %v8725_v46  ;;  %v2825_v57 = vmul.f32 %v6782_v55, %v8726_v0  ;;  %v8727_v35 = vld [vmem:[#allocation45_spill] sm:$0xff]  ;;  %v8730_v0 = vld [vmem:[#allocation54_spill] sm:$0xff] }
 0x2f5   : > { %3494 = vst.msk [vmem:[%s7538_s28 + $0x58] sm:$0xff] %vm330_vm0, %v3344_v10  ;;  %v2808_v14 = vmul.f32 %v6669_v29, %v8727_v35  ;;  %v8728_v10 = vld [vmem:[#allocation42_spill] sm:$0xff]  ;;  %v8732_v35 = vld [vmem:[#allocation59_spill] sm:$0xff] }
 0x2f6   : > { %v2981_v9 = vpop.permute.xlu0 %2980  ;;  %3165 = vperm.xlu2 %3719, %v2324_v32   ;;  %v2809_v32 = vmul.f32 %v6669_v29, %v8728_v10 }
 0x2f7   : > { %v3341_v39 = vadd.f32 %v2981_v9, %v2816_v60  ;;  %v3342_v24 = vadd.f32 %v2981_v9, %v2817_v40  ;;  %v8729_v9 = vld [vmem:[#allocation57_spill] sm:$0xff] }
 0x2f8   : > { %3170 = vperm.xlu1 %3718, %v2325_v58   ;;  %v2327_v58 = vld [vmem:[%s7390_s25 + $0x160] sm:$0xff]  ;;  %v2822_v29 = vmul.f32 %v6750_v25, %v8729_v9 }
 0x2f9   : > { %v3001_v41 = vpop.permute.xlu2 %3000  ;;  %3491 = vst [vmem:[%s7538_s28 + $0x40] sm:$0xff] %v3341_v39  ;;  %v2823_v39 = vmul.f32 %v6750_v25, %v8730_v0  ;;  %v2330_v0 = vld [vmem:[%s7390_s25 + $0x178] sm:$0xff] }
 0x2fa   : > { %v3349_v62 = vadd.f32 %v3001_v41, %v2824_v20  ;;  %v3350_v46 = vadd.f32 %v3001_v41, %v2825_v57  ;;  %3492 = vst.msk [vmem:[%s7538_s28 + $0x48] sm:$0xff] %vm330_vm0, %v3342_v24  ;;  %v2961_v55 = vpop.permute.xlu1 %2960  ;;  %v2328_v20 = vld [vmem:[%s7390_s25 + $0x168] sm:$0xff]  ;;  %v8731_v24 = vld [vmem:[#allocation62_spill] sm:$0xff] }
 0x2fb   : > { %v3333_v60 = vadd.f32 %v2961_v55, %v2808_v14  ;;  %v3334_v40 = vadd.f32 %v2961_v55, %v2809_v32  ;;  %v2830_v41 = vmul.f32 %v6862_v12, %v8731_v24  ;;  %v2831_v14 = vmul.f32 %v6862_v12, %v8732_v35 }
 0x2fc   : > { %3499 = vst [vmem:[%s7538_s28 + $0x80] sm:$0xff] %v3349_v62  ;;  %3205 = vperm.xlu0 %3717, %v2332_v18   ;;  %v8733_v18 = vld [vmem:[#allocation52_spill] sm:$0xff] }
 0x2fd   : > { %3500 = vst.msk [vmem:[%s7538_s28 + $0x88] sm:$0xff] %vm330_vm0, %v3350_v46  ;;  %v2814_v62 = vmul.f32 %v6617_v42, %v8733_v18  ;;  %v8734_v46 = vld [vmem:[#allocation49_spill] sm:$0xff] }
 0x2fe   : > { %3483 = vst [vmem:[%s7538_s28] sm:$0xff] %v3333_v60  ;;  %v2996_v57 = vpop.permute.xlu0 %2995  ;;  %3180 = vperm.xlu2 %3719, %v2327_v58   ;;  %v2815_v55 = vmul.f32 %v6617_v42, %v8734_v46  ;;  %v2335_v60 = vld [vmem:[%s7390_s25 + $0x1a0] sm:$0xff] }
 0x2ff   : > { %3484 = vst.msk [vmem:[%s7538_s28 + $0x8] sm:$0xff] %vm330_vm0, %v3334_v40  ;;  %v3347_v10 = vadd.f32 %v2996_v57, %v2822_v29  ;;  %v3348_v32 = vadd.f32 %v2996_v57, %v2823_v39  ;;  %v8735_v39 = vld [vmem:[#allocation63_spill] sm:$0xff]  ;;  %v8737_v57 = vld [vmem:[#allocation60_spill] sm:$0xff] }
 0x300   : > { %3185 = vperm.xlu1 %3718, %v2328_v20   ;;  %v8736_v20 = vld [vmem:[#allocation157_spill] sm:$0xff] }
 0x301   : > { %v3016_v25 = vpop.permute.xlu2 %3015  ;;  %3497 = vst [vmem:[%s7538_s28 + $0x70] sm:$0xff] %v3347_v10  ;;  %v2828_v42 = vmul.f32 %v8736_v20, %v8735_v39  ;;  %v2829_v24 = vmul.f32 %v8736_v20, %v8737_v57  ;;  %v8743_v57 = vld [vmem:[#allocation69_spill] sm:$0xff] }
 0x302   : > { %v3355_v40 = vadd.f32 %v3016_v25, %v2830_v41  ;;  %v3356_v58 = vadd.f32 %v3016_v25, %v2831_v14  ;;  %3498 = vst.msk [vmem:[%s7538_s28 + $0x78] sm:$0xff] %vm330_vm0, %v3348_v32  ;;  %v2976_v12 = vpop.permute.xlu1 %2975  ;;  %v2331_v41 = vld [vmem:[%s7390_s25 + $0x180] sm:$0xff]  ;;  %v8738_v14 = vld [vmem:[#allocation68_spill] sm:$0xff]  ;;  %v8739_v32 = vld [vmem:[#allocation65_spill] sm:$0xff] }
 0x303   : > { %v3339_v9 = vadd.f32 %v2976_v12, %v2814_v62  ;;  %v3340_v29 = vadd.f32 %v2976_v12, %v2815_v55  ;;  %v2836_v10 = vmul.f32 %v6942_v2, %v8738_v14  ;;  %v2837_v25 = vmul.f32 %v6942_v2, %v8739_v32  ;;  %v8740_v55 = vld [vmem:[#allocation58_spill] sm:$0xff]  ;;  %v2334_v14 = vld [vmem:[%s7390_s25 + $0x198] sm:$0xff]  ;;  %v8745_v32 = vld [vmem:[#allocation3_spill] sm:$0xff] }
 0x304   : > { %3505 = vst [vmem:[%s7538_s28 + $0xb0] sm:$0xff] %v3355_v40  ;;  %3220 = vperm.xlu0 %3717, %v2335_v60   ;;  %v8741_v60 = vld [vmem:[#allocation154_spill] sm:$0xff] }
 0x305   : > { %3506 = vst.msk [vmem:[%s7538_s28 + $0xb8] sm:$0xff] %vm330_vm0, %v3356_v58  ;;  %v2820_v40 = vmul.f32 %v8741_v60, %v8740_v55  ;;  %v8742_v58 = vld [vmem:[#allocation55_spill] sm:$0xff] }
 0x306   : > { %3489 = vst [vmem:[%s7538_s28 + $0x30] sm:$0xff] %v3339_v9  ;;  %v3011_v35 = vpop.permute.xlu0 %3010  ;;  %3195 = vperm.xlu2 %3719, %v2330_v0   ;;  %v2821_v12 = vmul.f32 %v8741_v60, %v8742_v58  ;;  %v2338_v9 = vld [vmem:[%s7390_s25 + $0x1b8] sm:$0xff]  ;;  %v8747_v60 = vld [vmem:[#allocation64_spill] sm:$0xff] }
 0x307   : > { %3490 = vst.msk [vmem:[%s7538_s28 + $0x38] sm:$0xff] %vm330_vm0, %v3340_v29  ;;  %v3353_v18 = vadd.f32 %v3011_v35, %v2828_v42  ;;  %v3354_v62 = vadd.f32 %v3011_v35, %v2829_v24  ;;  %v2333_v42 = vld [vmem:[%s7390_s25 + $0x190] sm:$0xff]  ;;  %v2834_v24 = vmul.f32 %v6940_v16, %v8743_v57  ;;  %v8748_v58 = vld [vmem:[#allocation61_spill] sm:$0xff]  ;;  %v8750_v57 = vld [vmem:[#allocation31_spill] sm:$0xff] }
 0x308   : > { %3200 = vperm.xlu1 %3718, %v2331_v41   ;;  %v8744_v41 = vld [vmem:[#allocation66_spill] sm:$0xff] }
 0x309   : > { %v3031_v46 = vpop.permute.xlu2 %3030  ;;  %3503 = vst [vmem:[%s7538_s28 + $0xa0] sm:$0xff] %v3353_v18  ;;  %v2835_v35 = vmul.f32 %v6940_v16, %v8744_v41  ;;  %v8746_v18 = vld [vmem:[#allocation30_spill] sm:$0xff]  ;;  %v2337_v41 = vld [vmem:[%s7390_s25 + $0x1b0] sm:$0xff] }
 0x30a   : > { %v3361_v29 = vadd.f32 %v3031_v46, %v2836_v10  ;;  %v3362_v0 = vadd.f32 %v3031_v46, %v2837_v25  ;;  %3504 = vst.msk [vmem:[%s7538_s28 + $0xa8] sm:$0xff] %vm330_vm0, %v3354_v62  ;;  %v2991_v2 = vpop.permute.xlu1 %2990  ;;  %v2842_v25 = vmul.f32 %v7018_v49, %v8745_v32  ;;  %v2843_v62 = vmul.f32 %v7018_v49, %v8746_v18  ;;  %v8752_v32 = vld [vmem:[#allocation6_spill] sm:$0xff] }
 0x30b   : > { %v3345_v39 = vadd.f32 %v2991_v2, %v2820_v40  ;;  %v3346_v20 = vadd.f32 %v2991_v2, %v2821_v12  ;;  %v2826_v40 = vmul.f32 %v6966_v21, %v8747_v60  ;;  %v2827_v12 = vmul.f32 %v6966_v21, %v8748_v58 }
 0x30c   : > { %3511 = vst [vmem:[%s7538_s28 + $0xe0] sm:$0xff] %v3361_v29  ;;  %3235 = vperm.xlu0 %3717, %v2338_v9   ;;  %v2341_v9 = vld [vmem:[%s7390_s25 + $0x1d0] sm:$0xff] }
 0x30d   : > { %3512 = vst.msk [vmem:[%s7538_s28 + $0xe8] sm:$0xff] %vm330_vm0, %v3362_v0 }
 0x30e   : > { %3495 = vst [vmem:[%s7538_s28 + $0x60] sm:$0xff] %v3345_v39  ;;  %v3026_v10 = vpop.permute.xlu0 %3025  ;;  %3210 = vperm.xlu2 %3719, %v2333_v42   ;;  %v8749_v42 = vld [vmem:[#allocation4_spill] sm:$0xff] }
 0x30f   : > { %3496 = vst.msk [vmem:[%s7538_s28 + $0x68] sm:$0xff] %vm330_vm0, %v3346_v20  ;;  %v3359_v46 = vadd.f32 %v3026_v10, %v2834_v24  ;;  %v3360_v55 = vadd.f32 %v3026_v10, %v2835_v35  ;;  %v2336_v20 = vld [vmem:[%s7390_s25 + $0x1a8] sm:$0xff]  ;;  %v2840_v21 = vmul.f32 %v7027_v3, %v8749_v42  ;;  %v2841_v24 = vmul.f32 %v7027_v3, %v8750_v57 }
 0x310   : > { %3215 = vperm.xlu1 %3718, %v2334_v14   ;;  %v8751_v14 = vld [vmem:[#allocation7_spill] sm:$0xff] }
 0x311   : > { %v3046_v16 = vpop.permute.xlu2 %3045  ;;  %3509 = vst [vmem:[%s7538_s28 + $0xd0] sm:$0xff] %v3359_v46  ;;  %v2848_v10 = vmul.f32 %v7098_v1, %v8751_v14  ;;  %v8753_v46 = vld [vmem:[#allocation70_spill] sm:$0xff] }
 0x312   : > { %v3367_v29 = vadd.f32 %v3046_v16, %v2842_v25  ;;  %v3368_v0 = vadd.f32 %v3046_v16, %v2843_v62  ;;  %3510 = vst.msk [vmem:[%s7538_s28 + $0xd8] sm:$0xff] %vm330_vm0, %v3360_v55  ;;  %v3006_v49 = vpop.permute.xlu1 %3005  ;;  %v2849_v25 = vmul.f32 %v7098_v1, %v8752_v32  ;;  %v2832_v55 = vmul.f32 %v7065_v4, %v8753_v46  ;;  %v8754_v16 = vld [vmem:[#allocation67_spill] sm:$0xff] }
 0x313   : > { %v3351_v2 = vadd.f32 %v3006_v49, %v2826_v40  ;;  %v3352_v39 = vadd.f32 %v3006_v49, %v2827_v12  ;;  %v2833_v60 = vmul.f32 %v7065_v4, %v8754_v16  ;;  %v2344_v40 = vld [vmem:[%s7390_s25 + $0x1e8] sm:$0xff]  ;;  %v8755_v49 = vld [vmem:[#allocation34_spill] sm:$0xff] }
 0x314   : > { %3517 = vst [vmem:[%s7538_s28 + $0x110] sm:$0xff] %v3367_v29  ;;  %3250 = vperm.xlu0 %3717, %v2341_v9   ;;  %v2846_v4 = vmul.f32 %v7122_v43, %v8755_v49  ;;  %v8764_v49 = vld [vmem:[#allocation36_spill] sm:$0xff] }
 0x315   : > { %3518 = vst.msk [vmem:[%s7538_s28 + $0x118] sm:$0xff] %vm330_vm0, %v3368_v0  ;;  %v2339_v0 = vld [vmem:[%s7390_s25 + $0x1c0] sm:$0xff] }
 0x316   : > { %3501 = vst [vmem:[%s7538_s28 + $0x90] sm:$0xff] %v3351_v2  ;;  %v3041_v35 = vpop.permute.xlu0 %3040  ;;  %3225 = vperm.xlu2 %3719, %v2336_v20   ;;  %v8756_v2 = vld [vmem:[#allocation32_spill] sm:$0xff]  ;;  %v2340_v20 = vld [vmem:[%s7390_s25 + $0x1c8] sm:$0xff] }
 0x317   : > { %3502 = vst.msk [vmem:[%s7538_s28 + $0x98] sm:$0xff] %vm330_vm0, %v3352_v39  ;;  %v3365_v18 = vadd.f32 %v3041_v35, %v2840_v21  ;;  %v3366_v62 = vadd.f32 %v3041_v35, %v2841_v24  ;;  %v2847_v39 = vmul.f32 %v7122_v43, %v8756_v2  ;;  %v8757_v21 = vld [vmem:[#allocation12_spill] sm:$0xff]  ;;  %v8758_v24 = vld [vmem:[#allocation9_spill] sm:$0xff] }
 0x318   : > { %3230 = vperm.xlu1 %3718, %v2337_v41   ;;  %v2854_v57 = vmul.f32 %v7173_v54, %v8757_v21  ;;  %v2855_v41 = vmul.f32 %v7173_v54, %v8758_v24  ;;  %v8766_v21 = vld [vmem:[#allocation33_spill] sm:$0xff] }
 0x319   : > { %v3061_v3 = vpop.permute.xlu2 %3060  ;;  %3515 = vst [vmem:[%s7538_s28 + $0x100] sm:$0xff] %v3365_v18  ;;  %v2350_v24 = vld [vmem:[%s7390_s25 + $0x218] sm:$0xff] }
 0x31a   : > { %v3373_v58 = vadd.f32 %v3061_v3, %v2848_v10  ;;  %v3374_v12 = vadd.f32 %v3061_v3, %v2849_v25  ;;  %3516 = vst.msk [vmem:[%s7538_s28 + $0x108] sm:$0xff] %vm330_vm0, %v3366_v62  ;;  %v3021_v1 = vpop.permute.xlu1 %3020  ;;  %v8759_v10 = vld [vmem:[#allocation5_spill] sm:$0xff]  ;;  %v8760_v25 = vld [vmem:[#allocation2_spill] sm:$0xff] }
 0x31b   : > { %v3357_v9 = vadd.f32 %v3021_v1, %v2832_v55  ;;  %v3358_v29 = vadd.f32 %v3021_v1, %v2833_v60  ;;  %v2838_v32 = vmul.f32 %v7160_v8, %v8759_v10  ;;  %v2839_v18 = vmul.f32 %v7160_v8, %v8760_v25  ;;  %v2347_v62 = vld [vmem:[%s7390_s25 + $0x200] sm:$0xff]  ;;  %v2342_v60 = vld [vmem:[%s7390_s25 + $0x1d8] sm:$0xff]  ;;  %v2345_v10 = vld [vmem:[%s7390_s25 + $0x1f0] sm:$0xff] }
 0x31c   : > { %3523 = vst [vmem:[%s7538_s28 + $0x140] sm:$0xff] %v3373_v58  ;;  %3265 = vperm.xlu0 %3717, %v2344_v40   ;;  %v8761_v40 = vld [vmem:[#allocation13_spill] sm:$0xff]  ;;  %v8762_v58 = vld [vmem:[#allocation10_spill] sm:$0xff] }
 0x31d   : > { %3524 = vst.msk [vmem:[%s7538_s28 + $0x148] sm:$0xff] %vm330_vm0, %v3374_v12  ;;  %v2852_v8 = vmul.f32 %v7211_v30, %v8761_v40  ;;  %v2853_v12 = vmul.f32 %v7211_v30, %v8762_v58  ;;  %v2343_v1 = vld [vmem:[%s7390_s25 + $0x1e0] sm:$0xff]  ;;  %v8768_v25 = vld [vmem:[#allocation37_spill] sm:$0xff] }
 0x31e   : > { %3507 = vst [vmem:[%s7538_s28 + $0xc0] sm:$0xff] %v3357_v9  ;;  %v3056_v42 = vpop.permute.xlu0 %3055  ;;  %3240 = vperm.xlu2 %3719, %v2339_v0  }
 0x31f   : > { %3508 = vst.msk [vmem:[%s7538_s28 + $0xc8] sm:$0xff] %vm330_vm0, %v3358_v29  ;;  %v3371_v35 = vadd.f32 %v3056_v42, %v2846_v4  ;;  %v3372_v14 = vadd.f32 %v3056_v42, %v2847_v39  ;;  %v8763_v29 = vld [vmem:[#allocation15_spill] sm:$0xff]  ;;  %v2861_v4 = vmul.f32 %v7257_v31, %v8764_v49 }
 0x320   : > { %3245 = vperm.xlu1 %3718, %v2340_v20   ;;  %v2860_v0 = vmul.f32 %v7257_v31, %v8763_v29  ;;  %v8765_v20 = vld [vmem:[#allocation8_spill] sm:$0xff] }
 0x321   : > { %v3076_v43 = vpop.permute.xlu2 %3075  ;;  %3521 = vst [vmem:[%s7538_s28 + $0x130] sm:$0xff] %v3371_v35  ;;  %v2844_v42 = vmul.f32 %v7242_v63, %v8765_v20 }
 0x322   : > { %v3379_v3 = vadd.f32 %v3076_v43, %v2854_v57  ;;  %v3380_v46 = vadd.f32 %v3076_v43, %v2855_v41  ;;  %3522 = vst.msk [vmem:[%s7538_s28 + $0x138] sm:$0xff] %vm330_vm0, %v3372_v14  ;;  %v3036_v54 = vpop.permute.xlu1 %3035  ;;  %v2845_v57 = vmul.f32 %v7242_v63, %v8766_v21 }
 0x323   : > { %v3363_v55 = vadd.f32 %v3036_v54, %v2838_v32  ;;  %v3364_v16 = vadd.f32 %v3036_v54, %v2839_v18  ;;  %v8767_v32 = vld [vmem:[#allocation16_spill] sm:$0xff]  ;;  %v2859_v18 = vmul.f32 %v7292_v6, %v8768_v25  ;;  %v2356_v25 = vld [vmem:[%s7390_s25 + $0x248] sm:$0xff] }
 0x324   : > { %3529 = vst [vmem:[%s7538_s28 + $0x170] sm:$0xff] %v3379_v3  ;;  %3280 = vperm.xlu0 %3717, %v2347_v62   ;;  %v2858_v63 = vmul.f32 %v7292_v6, %v8767_v32  ;;  %v2346_v62 = vld [vmem:[%s7390_s25 + $0x1f8] sm:$0xff]  ;;  %v8778_v32 = vld [vmem:[#allocation14_spill] sm:$0xff] }
 0x325   : > { %3530 = vst.msk [vmem:[%s7538_s28 + $0x178] sm:$0xff] %vm330_vm0, %v3380_v46  ;;  %v8769_v46 = vld [vmem:[#allocation39_spill] sm:$0xff] }
 0x326   : > { %3513 = vst [vmem:[%s7538_s28 + $0xf0] sm:$0xff] %v3363_v55  ;;  %v3071_v9 = vpop.permute.xlu0 %3070  ;;  %3255 = vperm.xlu2 %3719, %v2342_v60   ;;  %v2866_v54 = vmul.f32 %v7323_v17, %v8769_v46  ;;  %v8770_v55 = vld [vmem:[#allocation18_spill] sm:$0xff] }
 0x327   : > { %3514 = vst.msk [vmem:[%s7538_s28 + $0xf8] sm:$0xff] %vm330_vm0, %v3364_v16  ;;  %v3377_v2 = vadd.f32 %v3071_v9, %v2852_v8  ;;  %v3378_v39 = vadd.f32 %v3071_v9, %v2853_v12  ;;  %v2867_v16 = vmul.f32 %v7323_v17, %v8770_v55  ;;  %v8771_v8 = vld [vmem:[#allocation35_spill] sm:$0xff]  ;;  %v2353_v9 = vld [vmem:[%s7390_s25 + $0x230] sm:$0xff]  ;;  %v8779_v55 = vld [vmem:[#allocation25_spill] sm:$0xff] }
 0x328   : > { %3260 = vperm.xlu1 %3718, %v2343_v1   ;;  %v2850_v58 = vmul.f32 %v7306_v26, %v8771_v8  ;;  %v8772_v12 = vld [vmem:[#allocation11_spill] sm:$0xff] }
 0x329   : > { %v3091_v30 = vpop.permute.xlu2 %3090  ;;  %3527 = vst [vmem:[%s7538_s28 + $0x160] sm:$0xff] %v3377_v2  ;;  %v2851_v1 = vmul.f32 %v7306_v26, %v8772_v12  ;;  %v2348_v2 = vld [vmem:[%s7390_s25 + $0x208] sm:$0xff] }
 0x32a   : > { %v3385_v41 = vadd.f32 %v3091_v30, %v2860_v0  ;;  %v3386_v35 = vadd.f32 %v3091_v30, %v2861_v4  ;;  %3528 = vst.msk [vmem:[%s7538_s28 + $0x168] sm:$0xff] %vm330_vm0, %v3378_v39  ;;  %v3051_v31 = vpop.permute.xlu1 %3050  ;;  %v8773_v39 = vld [vmem:[#allocation40_spill] sm:$0xff]  ;;  %v8774_v30 = vld [vmem:[#allocation38_spill] sm:$0xff]  ;;  %v8781_v8 = vld [vmem:[#allocation71_spill] sm:$0xff] }
 0x32b   : > { %v3369_v14 = vadd.f32 %v3051_v31, %v2844_v42  ;;  %v3370_v43 = vadd.f32 %v3051_v31, %v2845_v57  ;;  %v2864_v26 = vmul.f32 %v7348_v23, %v8773_v39  ;;  %v2865_v20 = vmul.f32 %v7348_v23, %v8774_v30  ;;  %v2349_v42 = vld [vmem:[%s7390_s25 + $0x210] sm:$0xff]  ;;  %v8782_v12 = vld [vmem:[#allocation27_spill] sm:$0xff] }
 0x32c   : > { %3535 = vst [vmem:[%s7538_s28 + $0x1a0] sm:$0xff] %v3385_v41  ;;  %3295 = vperm.xlu0 %3717, %v2350_v24   ;;  %v8775_v57 = vld [vmem:[#allocation24_spill] sm:$0xff]  ;;  %v8776_v41 = vld [vmem:[#allocation21_spill] sm:$0xff] }
 0x32d   : > { %3536 = vst.msk [vmem:[%s7538_s28 + $0x1a8] sm:$0xff] %vm330_vm0, %v3386_v35  ;;  %v2872_v24 = vmul.f32 %v7372_v36, %v8775_v57  ;;  %v2873_v35 = vmul.f32 %v7372_v36, %v8776_v41  ;;  %v8786_v57 = vld [vmem:[#allocation28_spill] sm:$0xff] }
 0x32e   : > { %3519 = vst [vmem:[%s7538_s28 + $0x120] sm:$0xff] %v3369_v14  ;;  %v3086_v3 = vpop.permute.xlu0 %3085  ;;  %3270 = vperm.xlu2 %3719, %v2345_v10  }
 0x32f   : > { %3520 = vst.msk [vmem:[%s7538_s28 + $0x128] sm:$0xff] %vm330_vm0, %v3370_v43  ;;  %v3383_v60 = vadd.f32 %v3086_v3, %v2858_v63  ;;  %v3384_v40 = vadd.f32 %v3086_v3, %v2859_v18  ;;  %v8777_v43 = vld [vmem:[#allocation17_spill] sm:$0xff]  ;;  %v2857_v63 = vmul.f32 %v7359_v28, %v8778_v32  ;;  %v8789_v32 = vld [vmem:[#allocation26_spill] sm:$0xff] }
 0x330   : > { %3275 = vperm.xlu1 %3718, %v2346_v62   ;;  %v2856_v10 = vmul.f32 %v7359_v28, %v8777_v43  ;;  %v2870_v28 = vmul.f32 %v7384_v56, %v8779_v55  ;;  %v8791_v55 = vld [vmem:[#allocation78_spill] sm:$0xff] }
 0x331   : > { %v3106_v6 = vpop.permute.xlu2 %3105  ;;  %3533 = vst [vmem:[%s7538_s28 + $0x190] sm:$0xff] %v3383_v60 }
 0x332   : > { %v3391_v29 = vadd.f32 %v3106_v6, %v2866_v54  ;;  %v3392_v0 = vadd.f32 %v3106_v6, %v2867_v16  ;;  %3534 = vst.msk [vmem:[%s7538_s28 + $0x198] sm:$0xff] %vm330_vm0, %v3384_v40  ;;  %v3066_v17 = vpop.permute.xlu1 %3065  ;;  %v2351_v54 = vld [vmem:[%s7390_s25 + $0x220] sm:$0xff]  ;;  %v2352_v40 = vld [vmem:[%s7390_s25 + $0x228] sm:$0xff] }
 0x333   : > { %v3375_v49 = vadd.f32 %v3066_v17, %v2850_v58  ;;  %v3376_v4 = vadd.f32 %v3066_v17, %v2851_v1  ;;  %v8780_v16 = vld [vmem:[#allocation22_spill] sm:$0xff]  ;;  %v2878_v58 = vmul.f32 %v7397_v34, %v8781_v8  ;;  %v2879_v1 = vmul.f32 %v7397_v34, %v8782_v12  ;;  %v8794_v8 = vld [vmem:[#allocation80_spill] sm:$0xff] }
 0x334   : > { %3541 = vst [vmem:[%s7538_s28 + $0x1d0] sm:$0xff] %v3391_v29  ;;  %3310 = vperm.xlu0 %3717, %v2353_v9   ;;  %v2871_v60 = vmul.f32 %v7384_v56, %v8780_v16  ;;  %v8792_v16 = vld [vmem:[#allocation75_spill] sm:$0xff] }
 0x335   : > { %3542 = vst.msk [vmem:[%s7538_s28 + $0x1d8] sm:$0xff] %vm330_vm0, %v3392_v0  ;;  %v8783_v0 = vld [vmem:[#allocation20_spill] sm:$0xff] }
 0x336   : > { %3525 = vst [vmem:[%s7538_s28 + $0x150] sm:$0xff] %v3375_v49  ;;  %v3101_v21 = vpop.permute.xlu0 %3100  ;;  %3285 = vperm.xlu2 %3719, %v2348_v2   ;;  %v2862_v17 = vmul.f32 %v7395_v37, %v8783_v0  ;;  %v8784_v49 = vld [vmem:[#allocation19_spill] sm:$0xff] }
 0x337   : > { %3526 = vst.msk [vmem:[%s7538_s28 + $0x158] sm:$0xff] %vm330_vm0, %v3376_v4  ;;  %v3389_v31 = vadd.f32 %v3101_v21, %v2864_v26  ;;  %v3390_v14 = vadd.f32 %v3101_v21, %v2865_v20  ;;  %v2863_v4 = vmul.f32 %v7395_v37, %v8784_v49  ;;  %v2354_v20 = vld [vmem:[%s7390_s25 + $0x238] sm:$0xff]  ;;  %v2355_v37 = vld [vmem:[%s7390_s25 + $0x240] sm:$0xff] }
 0x338   : > { %3290 = vperm.xlu1 %3718, %v2349_v42   ;;  %v8785_v42 = vld [vmem:[#allocation72_spill] sm:$0xff] }
 0x339   : > { %v3121_v23 = vpop.permute.xlu2 %3120  ;;  %3539 = vst [vmem:[%s7538_s28 + $0x1c0] sm:$0xff] %v3389_v31  ;;  %v2876_v21 = vmul.f32 %v7407_v27, %v8785_v42 }
 0x33a   : > { %v3397_v18 = vadd.f32 %v3121_v23, %v2872_v24  ;;  %v3398_v62 = vadd.f32 %v3121_v23, %v2873_v35  ;;  %3540 = vst.msk [vmem:[%s7538_s28 + $0x1c8] sm:$0xff] %vm330_vm0, %v3390_v14  ;;  %v3081_v36 = vpop.permute.xlu1 %3080  ;;  %v2877_v24 = vmul.f32 %v7407_v27, %v8786_v57  ;;  %v8787_v35 = vld [vmem:[#allocation77_spill] sm:$0xff]  ;;  %v8788_v14 = vld [vmem:[#allocation74_spill] sm:$0xff] }
 0x33b   : > { %v3381_v3 = vadd.f32 %v3081_v36, %v2856_v10  ;;  %v3382_v46 = vadd.f32 %v3081_v36, %v2857_v63  ;;  %v2884_v31 = vmul.f32 %v7412_v61, %v8787_v35  ;;  %v2885_v23 = vmul.f32 %v7412_v61, %v8788_v14  ;;  %v8801_v35 = vld [vmem:[#allocation79_spill] sm:$0xff] }
 0x33c   : > { %3547 = vst [vmem:[%s7538_s28 + $0x200] sm:$0xff] %v3397_v18  ;;  %3325 = vperm.xlu0 %3717, %v2356_v25   ;;  %v2868_v63 = vmul.f32 %v7410_v19, %v8789_v32  ;;  %v8790_v25 = vld [vmem:[#allocation23_spill] sm:$0xff]  ;;  %v8803_v32 = vld [vmem:[#allocation90_spill] sm:$0xff] }
 0x33d   : > { %3548 = vst.msk [vmem:[%s7538_s28 + $0x208] sm:$0xff] %vm330_vm0, %v3398_v62  ;;  %v2869_v18 = vmul.f32 %v7410_v19, %v8790_v25  ;;  %v2883_v19 = vmul.f32 %v7418_v13, %v8792_v16  ;;  %v8804_v25 = vld [vmem:[#allocation87_spill] sm:$0xff]  ;;  %v8808_v16 = vld [vmem:[#allocation82_spill] sm:$0xff] }
 0x33e   : > { %3531 = vst [vmem:[%s7538_s28 + $0x180] sm:$0xff] %v3381_v3  ;;  %v3116_v6 = vpop.permute.xlu0 %3115  ;;  %3300 = vperm.xlu2 %3719, %v2351_v54   ;;  %v2357_v54 = vld [vmem:[%s7390_s25 + $0x250] sm:$0xff] }
 0x33f   : > { %3532 = vst.msk [vmem:[%s7538_s28 + $0x188] sm:$0xff] %vm330_vm0, %v3382_v46  ;;  %v3395_v9 = vadd.f32 %v3116_v6, %v2870_v28  ;;  %v3396_v29 = vadd.f32 %v3116_v6, %v2871_v60  ;;  %v2882_v28 = vmul.f32 %v7418_v13, %v8791_v55 }
 0x340   : > { %3305 = vperm.xlu1 %3718, %v2352_v40   ;;  %v8793_v40 = vld [vmem:[#allocation83_spill] sm:$0xff] }
 0x341   : > { %v3136_v56 = vpop.permute.xlu2 %3135  ;;  %3545 = vst [vmem:[%s7538_s28 + $0x1f0] sm:$0xff] %v3395_v9  ;;  %v2890_v6 = vmul.f32 %v7422_v33, %v8793_v40 }
 0x342   : > { %v3403_v2 = vadd.f32 %v3136_v56, %v2878_v58  ;;  %v3404_v39 = vadd.f32 %v3136_v56, %v2879_v1  ;;  %3546 = vst.msk [vmem:[%s7538_s28 + $0x1f8] sm:$0xff] %vm330_vm0, %v3396_v29  ;;  %v3096_v34 = vpop.permute.xlu1 %3095  ;;  %v2891_v58 = vmul.f32 %v7422_v33, %v8794_v8  ;;  %v8795_v29 = vld [vmem:[#allocation73_spill] sm:$0xff] }
 0x343   : > { %v3387_v26 = vadd.f32 %v3096_v34, %v2862_v17  ;;  %v3388_v30 = vadd.f32 %v3096_v34, %v2863_v4  ;;  %v2874_v13 = vmul.f32 %v7420_v59, %v8795_v29  ;;  %v8796_v56 = vld [vmem:[#allocation29_spill] sm:$0xff] }
 0x344   : > { %3553 = vst [vmem:[%s7538_s28 + $0x230] sm:$0xff] %v3403_v2  ;;  %v2875_v0 = vmul.f32 %v7420_v59, %v8796_v56  ;;  %v8811_v29 = vld [vmem:[#allocation101_spill] sm:$0xff]  ;;  %v8812_v56 = vld [vmem:[#allocation98_spill] sm:$0xff] }
 0x345   : > { %3554 = vst.msk [vmem:[%s7538_s28 + $0x238] sm:$0xff] %vm330_vm0, %v3404_v39  ;;  %v8797_v39 = vld [vmem:[#allocation84_spill] sm:$0xff] }
 0x346   : > { %3537 = vst [vmem:[%s7538_s28 + $0x1b0] sm:$0xff] %v3387_v26  ;;  %v3131_v41 = vpop.permute.xlu0 %3130  ;;  %3315 = vperm.xlu2 %3719, %v2354_v20   ;;  %v2888_v34 = vmul.f32 %v7427_v15, %v8797_v39  ;;  %v8798_v26 = vld [vmem:[#allocation81_spill] sm:$0xff] }
 0x347   : > { %3538 = vst.msk [vmem:[%s7538_s28 + $0x1b8] sm:$0xff] %vm330_vm0, %v3388_v30  ;;  %v3401_v43 = vadd.f32 %v3131_v41, %v2876_v21  ;;  %v3402_v10 = vadd.f32 %v3131_v41, %v2877_v24  ;;  %v2889_v30 = vmul.f32 %v7427_v15, %v8798_v26  ;;  %v8799_v20 = vld [vmem:[#allocation89_spill] sm:$0xff]  ;;  %v8800_v21 = vld [vmem:[#allocation86_spill] sm:$0xff]  ;;  %v2880_v15 = vmul.f32 %v7432_v44, %v8801_v35 }
 0x348   : > { %3320 = vperm.xlu1 %3718, %v2355_v37   ;;  %v2896_v42 = vmul.f32 %v7429_v47, %v8799_v20  ;;  %v2897_v57 = vmul.f32 %v7429_v47, %v8800_v21  ;;  %v8815_v20 = vld [vmem:[#allocation102_spill] sm:$0xff]  ;;  %v8816_v21 = vld [vmem:[#allocation99_spill] sm:$0xff] }
 0x349   : > { %v3151_v27 = vpop.permute.xlu2 %3150  ;;  %3551 = vst [vmem:[%s7538_s28 + $0x220] sm:$0xff] %v3401_v43 }
 0x34a   : > { %v3409_v62 = vadd.f32 %v3151_v27, %v2884_v31  ;;  %v3410_v36 = vadd.f32 %v3151_v27, %v2885_v23  ;;  %3552 = vst.msk [vmem:[%s7538_s28 + $0x228] sm:$0xff] %vm330_vm0, %v3402_v10  ;;  %v3111_v3 = vpop.permute.xlu1 %3110  ;;  %v8802_v31 = vld [vmem:[#allocation76_spill] sm:$0xff] }
 0x34b   : > { %v3393_v61 = vadd.f32 %v3111_v3, %v2868_v63  ;;  %v3394_v46 = vadd.f32 %v3111_v3, %v2869_v18  ;;  %v2881_v14 = vmul.f32 %v7432_v44, %v8802_v31  ;;  %v2894_v63 = vmul.f32 %v7436_v45, %v8803_v32  ;;  %v8806_v3 = vld [vmem:[#allocation92_spill] sm:$0xff] }
 0x34c   : > { %3559 = vst [vmem:[%s7538_s28 + $0x260] sm:$0xff] %v3409_v62  ;;  %v2895_v18 = vmul.f32 %v7436_v45, %v8804_v25  ;;  %v8805_v62 = vld [vmem:[#allocation95_spill] sm:$0xff]  ;;  %v8821_v25 = vld [vmem:[#allocation108_spill] sm:$0xff] }
 0x34d   : > { %3560 = vst.msk [vmem:[%s7538_s28 + $0x268] sm:$0xff] %vm330_vm0, %v3410_v36  ;;  %v2902_v36 = vmul.f32 %v7438_v53, %v8805_v62 }
 0x34e   : > { %3543 = vst [vmem:[%s7538_s28 + $0x1e0] sm:$0xff] %v3393_v61  ;;  %v3146_v60 = vpop.permute.xlu0 %3145  ;;  %3330 = vperm.xlu2 %3719, %v2357_v54   ;;  %v2903_v61 = vmul.f32 %v7438_v53, %v8806_v3  ;;  %v8824_v3 = vld [vmem:[#allocation159_spill] sm:$0xff] }
 0x34f   : > { %3544 = vst.msk [vmem:[%s7538_s28 + $0x1e8] sm:$0xff] %vm330_vm0, %v3394_v46  ;;  %v3407_v12 = vadd.f32 %v3146_v60, %v2882_v28  ;;  %v3408_v1 = vadd.f32 %v3146_v60, %v2883_v19  ;;  %v8807_v28 = vld [vmem:[#allocation85_spill] sm:$0xff]  ;;  %v2887_v19 = vmul.f32 %v7441_v5, %v8808_v16  ;;  %v8826_v16 = vld [vmem:[#allocation103_spill] sm:$0xff] }
 0x350   : > { %v2886_v45 = vmul.f32 %v7441_v5, %v8807_v28 }
 0x351   : > { %v3166_v9 = vpop.permute.xlu2 %3165  ;;  %3557 = vst [vmem:[%s7538_s28 + $0x250] sm:$0xff] %v3407_v12 }
 0x352   : > { %v3415_v17 = vadd.f32 %v3166_v9, %v2890_v6  ;;  %v3416_v49 = vadd.f32 %v3166_v9, %v2891_v58  ;;  %3558 = vst.msk [vmem:[%s7538_s28 + $0x258] sm:$0xff] %vm330_vm0, %v3408_v1  ;;  %v3126_v4 = vpop.permute.xlu1 %3125  ;;  %v8809_v58 = vld [vmem:[#allocation96_spill] sm:$0xff]  ;;  %v8810_v1 = vld [vmem:[#allocation93_spill] sm:$0xff] }
 0x353   : > { %v3399_v2 = vadd.f32 %v3126_v4, %v2874_v13  ;;  %v3400_v33 = vadd.f32 %v3126_v4, %v2875_v0  ;;  %v2900_v12 = vmul.f32 %v7445_v11, %v8809_v58  ;;  %v2901_v9 = vmul.f32 %v7445_v11, %v8810_v1  ;;  %v8829_v1 = vld [vmem:[#allocation114_spill] sm:$0xff] }
 0x354   : > { %3565 = vst [vmem:[%s7538_s28 + $0x290] sm:$0xff] %v3415_v17  ;;  %v2908_v13 = vmul.f32 %v7447_v48, %v8811_v29  ;;  %v2909_v0 = vmul.f32 %v7447_v48, %v8812_v56  ;;  %v8831_v29 = vld [vmem:[#allocation111_spill] sm:$0xff] }
 0x355   : > { %3566 = vst.msk [vmem:[%s7538_s28 + $0x298] sm:$0xff] %vm330_vm0, %v3416_v49 }
 0x356   : > { %3549 = vst [vmem:[%s7538_s28 + $0x210] sm:$0xff] %v3399_v2  ;;  %v3161_v59 = vpop.permute.xlu0 %3160  ;;  %v8813_v2 = vld [vmem:[#allocation91_spill] sm:$0xff] }
 0x357   : > { %3550 = vst.msk [vmem:[%s7538_s28 + $0x218] sm:$0xff] %vm330_vm0, %v3400_v33  ;;  %v3413_v24 = vadd.f32 %v3161_v59, %v2888_v34  ;;  %v3414_v37 = vadd.f32 %v3161_v59, %v2889_v30  ;;  %v2892_v11 = vmul.f32 %v7450_v52, %v8813_v2  ;;  %v8814_v33 = vld [vmem:[#allocation88_spill] sm:$0xff] }
 0x358   : > { %v2893_v39 = vmul.f32 %v7450_v52, %v8814_v33 }
 0x359   : > { %v3181_v41 = vpop.permute.xlu2 %3180  ;;  %3563 = vst [vmem:[%s7538_s28 + $0x280] sm:$0xff] %v3413_v24  ;;  %v8817_v24 = vld [vmem:[#allocation107_spill] sm:$0xff] }
 0x35a   : > { %v3421_v23 = vadd.f32 %v3181_v41, %v2896_v42  ;;  %v3422_v43 = vadd.f32 %v3181_v41, %v2897_v57  ;;  %3564 = vst.msk [vmem:[%s7538_s28 + $0x288] sm:$0xff] %vm330_vm0, %v3414_v37  ;;  %v3141_v10 = vpop.permute.xlu1 %3140  ;;  %v2906_v42 = vmul.f32 %v7454_v38, %v8815_v20  ;;  %v2907_v57 = vmul.f32 %v7454_v38, %v8816_v21  ;;  %v8818_v41 = vld [vmem:[#allocation104_spill] sm:$0xff] }
 0x35b   : > { %v3405_v27 = vadd.f32 %v3141_v10, %v2880_v15  ;;  %v3406_v47 = vadd.f32 %v3141_v10, %v2881_v14  ;;  %v2914_v37 = vmul.f32 %v7456_v51, %v8817_v24  ;;  %v2915_v35 = vmul.f32 %v7456_v51, %v8818_v41  ;;  %v8838_v24 = vld [vmem:[#allocation120_spill] sm:$0xff] }
 0x35c   : > { %3571 = vst [vmem:[%s7538_s28 + $0x2c0] sm:$0xff] %v3421_v23  ;;  %v8819_v23 = vld [vmem:[#allocation97_spill] sm:$0xff] }
 0x35d   : > { %3572 = vst.msk [vmem:[%s7538_s28 + $0x2c8] sm:$0xff] %vm330_vm0, %v3422_v43  ;;  %v2898_v38 = vmul.f32 %v7459_v7, %v8819_v23  ;;  %v8820_v43 = vld [vmem:[#allocation94_spill] sm:$0xff]  ;;  %v8842_v23 = vld [vmem:[#allocation160_spill] sm:$0xff] }
 0x35e   : > { %3555 = vst [vmem:[%s7538_s28 + $0x240] sm:$0xff] %v3405_v27  ;;  %v3176_v44 = vpop.permute.xlu0 %3175  ;;  %v2899_v10 = vmul.f32 %v7459_v7, %v8820_v43  ;;  %v8843_v43 = vld [vmem:[#allocation122_spill] sm:$0xff] }
 0x35f   : > { %3556 = vst.msk [vmem:[%s7538_s28 + $0x248] sm:$0xff] %vm330_vm0, %v3406_v47  ;;  %v3419_v46 = vadd.f32 %v3176_v44, %v2894_v63  ;;  %v3420_v54 = vadd.f32 %v3176_v44, %v2895_v18  ;;  %v2912_v18 = vmul.f32 %v7463_v50, %v8821_v25  ;;  %v8822_v44 = vld [vmem:[#allocation105_spill] sm:$0xff] }
 0x360   : > { %v2913_v62 = vmul.f32 %v7463_v50, %v8822_v44 }
 0x361   : > { %v3196_v55 = vpop.permute.xlu2 %3195  ;;  %3569 = vst [vmem:[%s7538_s28 + $0x2b0] sm:$0xff] %v3419_v46  ;;  %v8825_v46 = vld [vmem:[#allocation110_spill] sm:$0xff] }
 0x362   : > { %v3427_v60 = vadd.f32 %v3196_v55, %v2902_v36  ;;  %v3428_v40 = vadd.f32 %v3196_v55, %v2903_v61  ;;  %3570 = vst.msk [vmem:[%s7538_s28 + $0x2b8] sm:$0xff] %vm330_vm0, %v3420_v54  ;;  %v3156_v6 = vpop.permute.xlu1 %3155  ;;  %v8823_v36 = vld [vmem:[#allocation113_spill] sm:$0xff]  ;;  %v2921_v54 = vmul.f32 %v8824_v3, %v8825_v46  ;;  %v8847_v46 = vld [vmem:[#allocation126_spill] sm:$0xff] }
 0x363   : > { %v3411_v8 = vadd.f32 %v3156_v6, %v2886_v45  ;;  %v3412_v53 = vadd.f32 %v3156_v6, %v2887_v19  ;;  %v2920_v61 = vmul.f32 %v8824_v3, %v8823_v36  ;;  %v8827_v19 = vld [vmem:[#allocation156_spill] sm:$0xff] }
 0x364   : > { %3577 = vst [vmem:[%s7538_s28 + $0x2f0] sm:$0xff] %v3427_v60  ;;  %v2904_v50 = vmul.f32 %v8827_v19, %v8826_v16  ;;  %v8828_v60 = vld [vmem:[#allocation100_spill] sm:$0xff] }
 0x365   : > { %3578 = vst.msk [vmem:[%s7538_s28 + $0x2f8] sm:$0xff] %vm330_vm0, %v3428_v40  ;;  %v2905_v40 = vmul.f32 %v8827_v19, %v8828_v60  ;;  %v8850_v19 = vld [vmem:[#allocation131_spill] sm:$0xff] }
 0x366   : > { %3561 = vst [vmem:[%s7538_s28 + $0x270] sm:$0xff] %v3411_v8  ;;  %v3191_v5 = vpop.permute.xlu0 %3190 }
 0x367   : > { %3562 = vst.msk [vmem:[%s7538_s28 + $0x278] sm:$0xff] %vm330_vm0, %v3412_v53  ;;  %v3425_v17 = vadd.f32 %v3191_v5, %v2900_v12  ;;  %v3426_v49 = vadd.f32 %v3191_v5, %v2901_v9  ;;  %v8830_v9 = vld [vmem:[#allocation155_spill] sm:$0xff] }
 0x368   : > { %v2918_v5 = vmul.f32 %v8830_v9, %v8829_v1  ;;  %v8854_v1 = vld [vmem:[#allocation164_spill] sm:$0xff] }
 0x369   : > { %v3211_v4 = vpop.permute.xlu2 %3210  ;;  %3575 = vst [vmem:[%s7538_s28 + $0x2e0] sm:$0xff] %v3425_v17  ;;  %v8833_v17 = vld [vmem:[#allocation162_spill] sm:$0xff] }
 0x36a   : > { %v3433_v34 = vadd.f32 %v3211_v4, %v2908_v13  ;;  %v3434_v26 = vadd.f32 %v3211_v4, %v2909_v0  ;;  %3576 = vst.msk [vmem:[%s7538_s28 + $0x2e8] sm:$0xff] %vm330_vm0, %v3426_v49  ;;  %v3171_v30 = vpop.permute.xlu1 %3170  ;;  %v2919_v13 = vmul.f32 %v8830_v9, %v8831_v29  ;;  %v8832_v0 = vld [vmem:[#allocation119_spill] sm:$0xff]  ;;  %v8834_v4 = vld [vmem:[#allocation116_spill] sm:$0xff] }
 0x36b   : > { %v3417_v59 = vadd.f32 %v3171_v30, %v2892_v11  ;;  %v3418_v48 = vadd.f32 %v3171_v30, %v2893_v39  ;;  %v2926_v49 = vmul.f32 %v8833_v17, %v8832_v0  ;;  %v2927_v2 = vmul.f32 %v8833_v17, %v8834_v4  ;;  %v8856_v4 = vld [vmem:[#allocation132_spill] sm:$0xff] }
 0x36c   : > { %3583 = vst [vmem:[%s7538_s28 + $0x320] sm:$0xff] %v3433_v34  ;;  %v8835_v34 = vld [vmem:[#allocation109_spill] sm:$0xff] }
 0x36d   : > { %3584 = vst.msk [vmem:[%s7538_s28 + $0x328] sm:$0xff] %vm330_vm0, %v3434_v26  ;;  %v8836_v26 = vld [vmem:[#allocation152_spill] sm:$0xff] }
 0x36e   : > { %3567 = vst [vmem:[%s7538_s28 + $0x2a0] sm:$0xff] %v3417_v59  ;;  %v3206_v52 = vpop.permute.xlu0 %3205  ;;  %v2910_v30 = vmul.f32 %v8836_v26, %v8835_v34  ;;  %v8837_v59 = vld [vmem:[#allocation106_spill] sm:$0xff] }
 0x36f   : > { %3568 = vst.msk [vmem:[%s7538_s28 + $0x2a8] sm:$0xff] %vm330_vm0, %v3418_v48  ;;  %v3431_v15 = vadd.f32 %v3206_v52, %v2906_v42  ;;  %v3432_v31 = vadd.f32 %v3206_v52, %v2907_v57  ;;  %v2911_v48 = vmul.f32 %v8836_v26, %v8837_v59  ;;  %v8859_v26 = vld [vmem:[#allocation137_spill] sm:$0xff] }
 0x371   : > { %v3226_v14 = vpop.permute.xlu2 %3225  ;;  %3581 = vst [vmem:[%s7538_s28 + $0x310] sm:$0xff] %v3431_v15 }
 0x372   : > { %v3439_v27 = vadd.f32 %v3226_v14, %v2914_v37  ;;  %v3440_v47 = vadd.f32 %v3226_v14, %v2915_v35  ;;  %3582 = vst.msk [vmem:[%s7538_s28 + $0x318] sm:$0xff] %vm330_vm0, %v3432_v31  ;;  %v3186_v32 = vpop.permute.xlu1 %3185  ;;  %v8839_v37 = vld [vmem:[#allocation158_spill] sm:$0xff]  ;;  %v8840_v35 = vld [vmem:[#allocation117_spill] sm:$0xff] }
 0x373   : > { %v3423_v63 = vadd.f32 %v3186_v32, %v2898_v38  ;;  %v3424_v51 = vadd.f32 %v3186_v32, %v2899_v10  ;;  %v2924_v41 = vmul.f32 %v8839_v37, %v8838_v24  ;;  %v2925_v15 = vmul.f32 %v8839_v37, %v8840_v35  ;;  %v8841_v14 = vld [vmem:[#allocation125_spill] sm:$0xff]  ;;  %v8863_v24 = vld [vmem:[#allocation167_spill] sm:$0xff] }
 0x374   : > { %3589 = vst [vmem:[%s7538_s28 + $0x350] sm:$0xff] %v3439_v27  ;;  %v2932_v38 = vmul.f32 %v8842_v23, %v8841_v14  ;;  %v2933_v10 = vmul.f32 %v8842_v23, %v8843_v43  ;;  %v8865_v43 = vld [vmem:[#allocation138_spill] sm:$0xff] }
 0x375   : > { %3590 = vst.msk [vmem:[%s7538_s28 + $0x358] sm:$0xff] %vm330_vm0, %v3440_v47 }
 0x376   : > { %3573 = vst [vmem:[%s7538_s28 + $0x2d0] sm:$0xff] %v3423_v63  ;;  %v3221_v7 = vpop.permute.xlu0 %3220  ;;  %v8844_v63 = vld [vmem:[#allocation115_spill] sm:$0xff] }
 0x377   : > { %3574 = vst.msk [vmem:[%s7538_s28 + $0x2d8] sm:$0xff] %vm330_vm0, %v3424_v51  ;;  %v3437_v55 = vadd.f32 %v3221_v7, %v2912_v18  ;;  %v3438_v28 = vadd.f32 %v3221_v7, %v2913_v62  ;;  %v8845_v51 = vld [vmem:[#allocation153_spill] sm:$0xff]  ;;  %v8846_v18 = vld [vmem:[#allocation112_spill] sm:$0xff] }
 0x378   : > { %v2916_v25 = vmul.f32 %v8845_v51, %v8844_v63  ;;  %v2917_v44 = vmul.f32 %v8845_v51, %v8846_v18  ;;  %v8868_v51 = vld [vmem:[#allocation143_spill] sm:$0xff] }
 0x379   : > { %v3241_v45 = vpop.permute.xlu2 %3240  ;;  %3587 = vst [vmem:[%s7538_s28 + $0x340] sm:$0xff] %v3437_v55 }
 0x37a   : > { %v3445_v6 = vadd.f32 %v3241_v45, %v2920_v61  ;;  %v3446_v8 = vadd.f32 %v3241_v45, %v2921_v54  ;;  %3588 = vst.msk [vmem:[%s7538_s28 + $0x348] sm:$0xff] %vm330_vm0, %v3438_v28  ;;  %v3201_v53 = vpop.permute.xlu1 %3200  ;;  %v8848_v54 = vld [vmem:[#allocation161_spill] sm:$0xff]  ;;  %v8849_v28 = vld [vmem:[#allocation123_spill] sm:$0xff] }
 0x37b   : > { %v3429_v58 = vadd.f32 %v3201_v53, %v2904_v50  ;;  %v3430_v12 = vadd.f32 %v3201_v53, %v2905_v40  ;;  %v2930_v55 = vmul.f32 %v8848_v54, %v8847_v46  ;;  %v2931_v45 = vmul.f32 %v8848_v54, %v8849_v28  ;;  %v8851_v50 = vld [vmem:[#allocation163_spill] sm:$0xff]  ;;  %v8852_v40 = vld [vmem:[#allocation128_spill] sm:$0xff]  ;;  %v8872_v46 = vld [vmem:[#allocation170_spill] sm:$0xff] }
 0x37c   : > { %3595 = vst [vmem:[%s7538_s28 + $0x380] sm:$0xff] %v3445_v6  ;;  %v2938_v60 = vmul.f32 %v8851_v50, %v8850_v19  ;;  %v2939_v6 = vmul.f32 %v8851_v50, %v8852_v40  ;;  %v8874_v40 = vld [vmem:[#allocation144_spill] sm:$0xff] }
 0x37d   : > { %3596 = vst.msk [vmem:[%s7538_s28 + $0x388] sm:$0xff] %vm330_vm0, %v3446_v8 }
 0x37e   : > { %3579 = vst [vmem:[%s7538_s28 + $0x300] sm:$0xff] %v3429_v58  ;;  %v3236_v56 = vpop.permute.xlu0 %3235 }
 0x37f   : > { %3580 = vst.msk [vmem:[%s7538_s28 + $0x308] sm:$0xff] %vm330_vm0, %v3430_v12  ;;  %v3443_v11 = vadd.f32 %v3236_v56, %v2918_v5  ;;  %v3444_v33 = vadd.f32 %v3236_v56, %v2919_v13  ;;  %v8853_v12 = vld [vmem:[#allocation121_spill] sm:$0xff]  ;;  %v8855_v5 = vld [vmem:[#allocation118_spill] sm:$0xff] }
 0x380   : > { %v2922_v9 = vmul.f32 %v8854_v1, %v8853_v12  ;;  %v2923_v29 = vmul.f32 %v8854_v1, %v8855_v5  ;;  %v8877_v1 = vld [vmem:[#allocation149_spill] sm:$0xff] }
 0x381   : > { %v3256_v39 = vpop.permute.xlu2 %3255  ;;  %3593 = vst [vmem:[%s7538_s28 + $0x370] sm:$0xff] %v3443_v11 }
 0x382   : > { %v3451_v20 = vadd.f32 %v3256_v39, %v2926_v49  ;;  %v3452_v42 = vadd.f32 %v3256_v39, %v2927_v2  ;;  %3594 = vst.msk [vmem:[%s7538_s28 + $0x378] sm:$0xff] %vm330_vm0, %v3444_v33  ;;  %v3216_v21 = vpop.permute.xlu1 %3215  ;;  %v8857_v2 = vld [vmem:[#allocation165_spill] sm:$0xff] }
 0x383   : > { %v3435_v57 = vadd.f32 %v3216_v21, %v2910_v30  ;;  %v3436_v52 = vadd.f32 %v3216_v21, %v2911_v48  ;;  %v2936_v11 = vmul.f32 %v8857_v2, %v8856_v4  ;;  %v8858_v33 = vld [vmem:[#allocation129_spill] sm:$0xff]  ;;  %v8860_v30 = vld [vmem:[#allocation166_spill] sm:$0xff] }
 0x384   : > { %3601 = vst [vmem:[%s7538_s28 + $0x3b0] sm:$0xff] %v3451_v20  ;;  %v2937_v39 = vmul.f32 %v8857_v2, %v8858_v33  ;;  %v2944_v59 = vmul.f32 %v8860_v30, %v8859_v26  ;;  %v8861_v48 = vld [vmem:[#allocation134_spill] sm:$0xff]  ;;  %v8881_v4 = vld [vmem:[#allocation173_spill] sm:$0xff] }
 0x385   : > { %3602 = vst.msk [vmem:[%s7538_s28 + $0x3b8] sm:$0xff] %vm330_vm0, %v3452_v42  ;;  %v2945_v20 = vmul.f32 %v8860_v30, %v8861_v48  ;;  %v8883_v48 = vld [vmem:[#allocation150_spill] sm:$0xff] }
 0x386   : > { %3585 = vst [vmem:[%s7538_s28 + $0x330] sm:$0xff] %v3435_v57  ;;  %v3251_v31 = vpop.permute.xlu0 %3250 }
 0x387   : > { %3586 = vst.msk [vmem:[%s7538_s28 + $0x338] sm:$0xff] %vm330_vm0, %v3436_v52  ;;  %v3449_v27 = vadd.f32 %v3251_v31, %v2924_v41  ;;  %v3450_v47 = vadd.f32 %v3251_v31, %v2925_v15  ;;  %v8862_v52 = vld [vmem:[#allocation127_spill] sm:$0xff]  ;;  %v8864_v41 = vld [vmem:[#allocation124_spill] sm:$0xff] }
 0x388   : > { %v2928_v37 = vmul.f32 %v8863_v24, %v8862_v52  ;;  %v2929_v35 = vmul.f32 %v8863_v24, %v8864_v41  ;;  %v8886_v41 = vld [vmem:[#allocation145_spill] sm:$0xff] }
 0x389   : > { %v3271_v32 = vpop.permute.xlu2 %3270  ;;  %3599 = vst [vmem:[%s7538_s28 + $0x3a0] sm:$0xff] %v3449_v27 }
 0x38a   : > { %v3457_v62 = vadd.f32 %v3271_v32, %v2932_v38  ;;  %v3458_v7 = vadd.f32 %v3271_v32, %v2933_v10  ;;  %3600 = vst.msk [vmem:[%s7538_s28 + $0x3a8] sm:$0xff] %vm330_vm0, %v3450_v47  ;;  %v3231_v36 = vpop.permute.xlu1 %3230  ;;  %v8866_v10 = vld [vmem:[#allocation168_spill] sm:$0xff]  ;;  %v8867_v47 = vld [vmem:[#allocation135_spill] sm:$0xff] }
 0x38b   : > { %v3441_v3 = vadd.f32 %v3231_v36, %v2916_v25  ;;  %v3442_v61 = vadd.f32 %v3231_v36, %v2917_v44  ;;  %v2942_v27 = vmul.f32 %v8866_v10, %v8865_v43  ;;  %v2943_v32 = vmul.f32 %v8866_v10, %v8867_v47  ;;  %v8869_v25 = vld [vmem:[#allocation169_spill] sm:$0xff]  ;;  %v8870_v44 = vld [vmem:[#allocation140_spill] sm:$0xff]  ;;  %v8889_v10 = vld [vmem:[#allocation151_spill] sm:$0xff] }
 0x38c   : > { %3607 = vst [vmem:[%s7538_s28 + $0x3e0] sm:$0xff] %v3457_v62  ;;  %v2950_v18 = vmul.f32 %v8869_v25, %v8868_v51  ;;  %v2951_v62 = vmul.f32 %v8869_v25, %v8870_v44  ;;  %v8890_v47 = vld [vmem:[#allocation148_spill] sm:$0xff] }
 0x38d   : > { %3608 = vst.msk [vmem:[%s7538_s28 + $0x3e8] sm:$0xff] %vm330_vm0, %v3458_v7 }
 0x38e   : > { %3591 = vst [vmem:[%s7538_s28 + $0x360] sm:$0xff] %v3441_v3  ;;  %v3266_v16 = vpop.permute.xlu0 %3265 }
 0x38f   : > { %3592 = vst.msk [vmem:[%s7538_s28 + $0x368] sm:$0xff] %vm330_vm0, %v3442_v61  ;;  %v3455_v8 = vadd.f32 %v3266_v16, %v2930_v55  ;;  %v3456_v53 = vadd.f32 %v3266_v16, %v2931_v45  ;;  %v8871_v61 = vld [vmem:[#allocation133_spill] sm:$0xff]  ;;  %v8873_v55 = vld [vmem:[#allocation130_spill] sm:$0xff] }
 0x390   : > { %v2934_v54 = vmul.f32 %v8872_v46, %v8871_v61  ;;  %v2935_v28 = vmul.f32 %v8872_v46, %v8873_v55 }
 0x391   : > { %v3286_v58 = vpop.permute.xlu2 %3285  ;;  %3605 = vst [vmem:[%s7538_s28 + $0x3d0] sm:$0xff] %v3455_v8 }
 0x392   : > { %v3463_v13 = vadd.f32 %v3286_v58, %v2938_v60  ;;  %v3464_v56 = vadd.f32 %v3286_v58, %v2939_v6  ;;  %3606 = vst.msk [vmem:[%s7538_s28 + $0x3d8] sm:$0xff] %vm330_vm0, %v3456_v53  ;;  %v3246_v0 = vpop.permute.xlu1 %3245  ;;  %v8875_v6 = vld [vmem:[#allocation171_spill] sm:$0xff]  ;;  %v8876_v53 = vld [vmem:[#allocation141_spill] sm:$0xff] }
 0x393   : > { %v3447_v17 = vadd.f32 %v3246_v0, %v2922_v9  ;;  %v3448_v49 = vadd.f32 %v3246_v0, %v2923_v29  ;;  %v2948_v8 = vmul.f32 %v8875_v6, %v8874_v40  ;;  %v2949_v58 = vmul.f32 %v8875_v6, %v8876_v53  ;;  %v8878_v9 = vld [vmem:[#allocation172_spill] sm:$0xff]  ;;  %v8879_v29 = vld [vmem:[#allocation146_spill] sm:$0xff] }
 0x394   : > { %3613 = vst [vmem:[%s7538_s28 + $0x410] sm:$0xff] %v3463_v13  ;;  %v2956_v5 = vmul.f32 %v8878_v9, %v8877_v1  ;;  %v2957_v13 = vmul.f32 %v8878_v9, %v8879_v29 }
 0x395   : > { %3614 = vst.msk [vmem:[%s7538_s28 + $0x418] sm:$0xff] %vm330_vm0, %v3464_v56 }
 0x396   : > { %3597 = vst [vmem:[%s7538_s28 + $0x390] sm:$0xff] %v3447_v17  ;;  %v3281_v34 = vpop.permute.xlu0 %3280 }
 0x397   : > { %3598 = vst.msk [vmem:[%s7538_s28 + $0x398] sm:$0xff] %vm330_vm0, %v3448_v49  ;;  %v3461_v42 = vadd.f32 %v3281_v34, %v2936_v11  ;;  %v3462_v21 = vadd.f32 %v3281_v34, %v2937_v39  ;;  %v8880_v49 = vld [vmem:[#allocation139_spill] sm:$0xff]  ;;  %v8882_v11 = vld [vmem:[#allocation136_spill] sm:$0xff] }
 0x398   : > { %v2940_v2 = vmul.f32 %v8881_v4, %v8880_v49  ;;  %v2941_v33 = vmul.f32 %v8881_v4, %v8882_v11 }
 0x399   : > { %v3301_v57 = vpop.permute.xlu2 %3300  ;;  %3611 = vst [vmem:[%s7538_s28 + $0x400] sm:$0xff] %v3461_v42 }
 0x39a   : > { %v3469_v15 = vadd.f32 %v3301_v57, %v2944_v59  ;;  %v3470_v31 = vadd.f32 %v3301_v57, %v2945_v20  ;;  %3612 = vst.msk [vmem:[%s7538_s28 + $0x408] sm:$0xff] %vm330_vm0, %v3462_v21  ;;  %v3261_v14 = vpop.permute.xlu1 %3260  ;;  %v8884_v20 = vld [vmem:[#allocation174_spill] sm:$0xff]  ;;  %v8885_v21 = vld [vmem:[#allocation147_spill] sm:$0xff] }
 0x39b   : > { %v3453_v23 = vadd.f32 %v3261_v14, %v2928_v37  ;;  %v3454_v38 = vadd.f32 %v3261_v14, %v2929_v35  ;;  %v2954_v42 = vmul.f32 %v8884_v20, %v8883_v48  ;;  %v2955_v57 = vmul.f32 %v8884_v20, %v8885_v21  ;;  %v8887_v35 = vld [vmem:[#allocation44_spill] sm:$0xff] }
 0x39c   : > { %3619 = vst [vmem:[%s7538_s28 + $0x440] sm:$0xff] %v3469_v15  ;;  %v2946_v15 = vmul.f32 %v8887_v35, %v8886_v41 }
 0x39d   : > { %3620 = vst.msk [vmem:[%s7538_s28 + $0x448] sm:$0xff] %vm330_vm0, %v3470_v31  ;;  %v8888_v31 = vld [vmem:[#allocation142_spill] sm:$0xff] }
 0x39e   : > { %3603 = vst [vmem:[%s7538_s28 + $0x3c0] sm:$0xff] %v3453_v23  ;;  %v3296_v63 = vpop.permute.xlu0 %3295  ;;  %v2947_v14 = vmul.f32 %v8887_v35, %v8888_v31 }
 0x39f   : > { %3604 = vst.msk [vmem:[%s7538_s28 + $0x3c8] sm:$0xff] %vm330_vm0, %v3454_v38  ;;  %v3467_v7 = vadd.f32 %v3296_v63, %v2942_v27  ;;  %v3468_v36 = vadd.f32 %v3296_v63, %v2943_v32  ;;  %v2952_v27 = vmul.f32 %v7559_v22, %v8889_v10  ;;  %v2953_v32 = vmul.f32 %v7559_v22, %v8890_v47 }
 0x3a1   : > { %v3316_v3 = vpop.permute.xlu2 %3315  ;;  %3617 = vst [vmem:[%s7538_s28 + $0x430] sm:$0xff] %v3467_v7 }
 0x3a2   : > { %v3475_v45 = vadd.f32 %v3316_v3, %v2950_v18  ;;  %v3476_v16 = vadd.f32 %v3316_v3, %v2951_v62  ;;  %3618 = vst.msk [vmem:[%s7538_s28 + $0x438] sm:$0xff] %vm330_vm0, %v3468_v36  ;;  %v3276_v19 = vpop.permute.xlu1 %3275 }
 0x3a3   : > { %v3459_v50 = vadd.f32 %v3276_v19, %v2934_v54  ;;  %v3460_v60 = vadd.f32 %v3276_v19, %v2935_v28 }
 0x3a4   : > { %3625 = vst [vmem:[%s7538_s28 + $0x470] sm:$0xff] %v3475_v45 }
 0x3a5   : > { %3626 = vst.msk [vmem:[%s7538_s28 + $0x478] sm:$0xff] %vm330_vm0, %v3476_v16 }
 0x3a6   : > { %3609 = vst [vmem:[%s7538_s28 + $0x3f0] sm:$0xff] %v3459_v50  ;;  %v3311_v12 = vpop.permute.xlu0 %3310 }
 0x3a7   : > { %3610 = vst.msk [vmem:[%s7538_s28 + $0x3f8] sm:$0xff] %vm330_vm0, %v3460_v60  ;;  %v3473_v56 = vadd.f32 %v3311_v12, %v2948_v8  ;;  %v3474_v0 = vadd.f32 %v3311_v12, %v2949_v58 }
 0x3a9   : > { %v3331_v17 = vpop.permute.xlu2 %3330  ;;  %3623 = vst [vmem:[%s7538_s28 + $0x460] sm:$0xff] %v3473_v56 }
 0x3aa   : > { %v3481_v39 = vadd.f32 %v3331_v17, %v2956_v5  ;;  %v3482_v34 = vadd.f32 %v3331_v17, %v2957_v13  ;;  %3624 = vst.msk [vmem:[%s7538_s28 + $0x468] sm:$0xff] %vm330_vm0, %v3474_v0  ;;  %v3291_v26 = vpop.permute.xlu1 %3290 }
 0x3ab   : > { %v3465_v30 = vadd.f32 %v3291_v26, %v2940_v2  ;;  %v3466_v59 = vadd.f32 %v3291_v26, %v2941_v33 }
 0x3ac   : > { %3631 = vst [vmem:[%s7538_s28 + $0x4a0] sm:$0xff] %v3481_v39 }
 0x3ad   : > { %3632 = vst.msk [vmem:[%s7538_s28 + $0x4a8] sm:$0xff] %vm330_vm0, %v3482_v34 }
 0x3ae   : > { %3615 = vst [vmem:[%s7538_s28 + $0x420] sm:$0xff] %v3465_v30  ;;  %v3326_v52 = vpop.permute.xlu0 %3325 }
 0x3af   : > { %3616 = vst.msk [vmem:[%s7538_s28 + $0x428] sm:$0xff] %vm330_vm0, %v3466_v59  ;;  %v3479_v24 = vadd.f32 %v3326_v52, %v2954_v42  ;;  %v3480_v37 = vadd.f32 %v3326_v52, %v2955_v57 }
 0x3b1   : > { %3629 = vst [vmem:[%s7538_s28 + $0x490] sm:$0xff] %v3479_v24 }
 0x3b2   : > { %3630 = vst.msk [vmem:[%s7538_s28 + $0x498] sm:$0xff] %vm330_vm0, %v3480_v37  ;;  %v3306_v23 = vpop.permute.xlu1 %3305 }
 0x3b3   : > { %v3471_v38 = vadd.f32 %v3306_v23, %v2946_v15  ;;  %v3472_v43 = vadd.f32 %v3306_v23, %v2947_v14 }
 0x3b5   : > { %3621 = vst [vmem:[%s7538_s28 + $0x450] sm:$0xff] %v3471_v38 }
 0x3b6   : > { %3622 = vst.msk [vmem:[%s7538_s28 + $0x458] sm:$0xff] %vm330_vm0, %v3472_v43 }
 0x3ba   : > { %v3321_v63 = vpop.permute.xlu1 %3320 }
 0x3bb   : > { %v3477_v51 = vadd.f32 %v3321_v63, %v2952_v27  ;;  %v3478_v25 = vadd.f32 %v3321_v63, %v2953_v32 }
 0x3bd   : > { %3627 = vst [vmem:[%s7538_s28 + $0x480] sm:$0xff] %v3477_v51 }
 0x3be   : > { %3628 = vst.msk [vmem:[%s7538_s28 + $0x488] sm:$0xff] %vm330_vm0, %v3478_v25 }
 0x3bf PF: > { %s13_s12 = sadd.s32 1, %s3968_s12  }
 0x3c0   : > { %p10_p4 = scmp.ge.s32.totalorder %s13_s12, 4  }
 0x3c2   :  { %12 = sbr.rel (!%p10_p4) target bundleno = 1 (0x1), region = 64 }

</bundles_post_ra>
